<compile_context>
chip_gen: v6e
topology: v6e:2x2x1
jax: 0.10.0
libtpu: 0.0.40
codegen_flags: <defaults>
</compile_context>

<pallas_src>
import functools

import numpy as np
import jax
import jax.numpy as jnp
from jax.experimental import pallas as pl
from jax.experimental.pallas import tpu as pltpu

_ACTS = {
    "ReLU": lambda y: jnp.maximum(y, 0.0),
    "Tanh": jnp.tanh,
    "Sigmoid": jax.nn.sigmoid,
    # PyTorch nn.GELU default is the exact erf form.
    "GELU": lambda y: jax.nn.gelu(y, approximate=False),
}

_PAD_MODE = {"zeros": "constant", "reflect": "reflect",
             "replicate": "edge", "circular": "wrap"}

_HIGH = jax.lax.Precision.HIGHEST


# ---------------------------------------------------------------------------
# Layer geometry
# ---------------------------------------------------------------------------
class _LayerGeom:
    def __init__(self, s_in, cin, cout, k, pad, p):
        self.s_in, self.cin, self.cout = s_in, cin, cout
        self.spad = s_in + 2 * pad            # padded spatial extent
        self.so = self.spad - k + 1           # conv output extent
        self.sq = self.so // p                # pooled output extent
        # valid conv rows in the (do, ho) padded raster (ho stride = spad)
        self.rows = (self.so - 1) * self.spad + self.so
        self.in_cols = self.spad * cin        # (w, c) columns of the input raster
        self.out_cols = self.so * cout        # (wo, cout) columns of the conv out


# ---------------------------------------------------------------------------
# Constant-matrix builders (host side, weight/pooling/padding preprocessing)
# ---------------------------------------------------------------------------
def _pad_select_1d(src, pad, mode):
    """(src+2*pad, src) 0/1 matrix: padded position -> source position."""
    m = np.zeros((src + 2 * pad, src), np.float32)
    for i in range(src + 2 * pad):
        q = i - pad
        if mode == "zeros":
            if 0 <= q < src:
                m[i, q] = 1.0
            continue
        if mode == "replicate":
            q = min(max(q, 0), src - 1)
        elif mode == "circular":
            q = q % src
        elif mode == "reflect":
            if src == 1:
                q = 0
            else:
                period = 2 * (src - 1)
                q = abs(q) % period
                if q >= src:
                    q = period - q
        else:
            raise ValueError(f"unsupported padding_mode {mode}")
        m[i, q] = 1.0
    return m


def _pool_select_1d(so, p):
    sq = so // p
    m = np.zeros((sq, so), np.float32)
    for t in range(sq):
        m[t, t * p:t * p + p] = 1.0
    return m


def _conv_tap_matrices(w, geom, k):
    """w: (Cout, Cin, k, k, k) torch layout -> (k*k, spad*Cin, so*Cout):
    per-(kd,kh) block-banded matrices folding the kw taps + channel mixing."""
    cin, cout, spad, so = geom.cin, geom.cout, geom.spad, geom.so
    sel = np.zeros((k, spad, so), np.float32)
    for kw in range(k):
        for wo in range(so):
            sel[kw, wo + kw, wo] = 1.0
    w_r = jnp.transpose(w.astype(jnp.float32), (2, 3, 4, 1, 0))   # (kd,kh,kw,ci,co)
    taps = jnp.einsum("dhkio,kaw->dhaiwo", w_r, jnp.asarray(sel),
                      precision=_HIGH)
    return taps.reshape(k * k, spad * cin, so * cout)


def _bias_row(b, geom):
    return jnp.tile(b.astype(jnp.float32), (geom.so,)).reshape(1, geom.out_cols)


def _pool_matrices(geom, p):
    """prow: (sq^2, rows) with 1/p^3 folded in; pcol: (out_cols, sq*cout) 0/1."""
    pd = _pool_select_1d(geom.so, p)                         # (sq, so)
    ph = np.zeros((geom.sq, geom.spad), np.float32)
    ph[:, :geom.so] = pd
    prow = np.kron(pd, ph)[:, :geom.rows] * (1.0 / p ** 3)
    pcol = np.kron(pd.T, np.eye(geom.cout, dtype=np.float32))
    return prow, pcol


def _fold_pool_embed(geom, p, pad, mode):
    """Fold AvgPool3d + next-layer padding into L (left) / R (right) matrices."""
    prow, pcol = _pool_matrices(geom, p)
    e1 = _pad_select_1d(geom.sq, pad, mode)                  # (sq+2*pad, sq)
    erow = np.kron(e1, e1)                                   # (spad_next^2, sq^2)
    ecol = np.kron(e1.T, np.eye(geom.cout, dtype=np.float32))
    L = erow @ prow                                          # (spad_next^2, rows)
    R = pcol @ ecol                                          # (out_cols, spad_next*cout)
    return jnp.asarray(L), jnp.asarray(R)


def _fold_pool_fc(geom, p, w_fc):
    """Fold last-layer AvgPool3d + Flatten + Linear weight into G (rows, out_cols)."""
    prow, pcol = _pool_matrices(geom, p)
    sq, cout = geom.sq, geom.cout
    # PyTorch Flatten order is (c, dq, hq, wq).
    wf = w_fc[:, 0].astype(jnp.float32).reshape(cout, sq, sq, sq)
    wf = jnp.transpose(wf, (1, 2, 3, 0)).reshape(sq * sq, sq * cout)
    G = jnp.matmul(jnp.asarray(prow).T, wf, precision=_HIGH)
    G = jnp.matmul(G, jnp.asarray(pcol).T, precision=_HIGH)
    return G                                                  # (rows, out_cols)


def _prepare_input(x_ncdhw, pad, mode):
    """NCDHW -> padded raster (N, spad^2, spad*Cin), rows=(d,h), cols=(w,c)."""
    x = jnp.transpose(x_ncdhw, (0, 2, 3, 4, 1)).astype(jnp.float32)
    xp = jnp.pad(x, ((0, 0), (pad, pad), (pad, pad), (pad, pad), (0, 0)),
                 mode=_PAD_MODE[mode])
    n, dp, hp, wp, c = xp.shape
    return xp.reshape(n, dp * hp, wp * c)


# ---------------------------------------------------------------------------
# The fused kernel: 3x (conv taps -> bias -> act -> pool/embed) -> FC epilogue
# ---------------------------------------------------------------------------
def _fused_kernel(x_ref, w1_ref, b1_ref, l1_ref, r1_ref,
                  w2_ref, b2_ref, l2_ref, r2_ref,
                  w3_ref, b3_ref, g_ref, bfc_ref, o_ref,
                  *, act_name, k, geoms):
    act = _ACTS[act_name]

    def conv_act(fm, w_ref, b_ref, spad, n_rows):
        acc = None
        for kd in range(k):
            for kh in range(k):
                off = kd * spad + kh
                lhs = fm[off:off + n_rows, :]
                part = jnp.dot(lhs, w_ref[kd * k + kh],
                               preferred_element_type=jnp.float32)
                acc = part if acc is None else acc + part
        return act(acc + b_ref[...])

    (sp1, n1), (sp2, n2), (sp3, n3) = geoms

    # ---- layer 1 ----
    a1 = conv_act(x_ref[0], w1_ref, b1_ref, sp1, n1)           # (n1, so1*C)
    fm2 = jnp.dot(l1_ref[...],
                  jnp.dot(a1, r1_ref[...], preferred_element_type=jnp.float32),
                  preferred_element_type=jnp.float32)          # (spad2^2, spad2*C)
    # ---- layer 2 ----
    a2 = conv_act(fm2, w2_ref, b2_ref, sp2, n2)
    fm3 = jnp.dot(l2_ref[...],
                  jnp.dot(a2, r2_ref[...], preferred_element_type=jnp.float32),
                  preferred_element_type=jnp.float32)          # (spad3^2, spad3*C)
    # ---- layer 3 + (pool + flatten + linear) epilogue ----
    a3 = conv_act(fm3, w3_ref, b3_ref, sp3, n3)                # (n3, so3*C)
    contrib = a3 * g_ref[...]
    total = jnp.sum(jnp.sum(contrib, axis=1, keepdims=True),
                    axis=0, keepdims=True) + bfc_ref[...]      # (1, 1)
    o_ref[0] = total.astype(o_ref.dtype)


# ---------------------------------------------------------------------------
# Full model forward (single pallas_call)
# ---------------------------------------------------------------------------
def pilati_forward(x_ncdhw, params, cfg):
    k, pad, p = cfg["kernel_size"], cfg["padding"], cfg["pooling_size"]
    mode, act = cfg["padding_mode"], cfg["activation"]
    s = cfg["linear_input_size"]
    cin, ch = cfg["input_channel"], cfg["hidden_channel"]

    g1 = _LayerGeom(s, cin, ch, k, pad, p)
    g2 = _LayerGeom(g1.sq, ch, ch, k, pad, p)
    g3 = _LayerGeom(g2.sq, ch, ch, k, pad, p)
    assert params["w_fc"].shape[0] == ch * g3.sq ** 3

    x1 = _prepare_input(x_ncdhw, pad, mode)                    # (N, spad1^2, spad1*cin)
    N = x1.shape[0]

    w1 = _conv_tap_matrices(params["w1"], g1, k)
    w2 = _conv_tap_matrices(params["w2"], g2, k)
    w3 = _conv_tap_matrices(params["w3"], g3, k)
    b1, b2, b3 = _bias_row(params["b1"], g1), _bias_row(params["b2"], g2), \
        _bias_row(params["b3"], g3)
    L1, R1 = _fold_pool_embed(g1, p, pad, mode)
    L2, R2 = _fold_pool_embed(g2, p, pad, mode)
    G = _fold_pool_fc(g3, p, params["w_fc"])
    bfc = jnp.asarray(params["b_fc"], jnp.float32).reshape(1, 1)

    kernel = functools.partial(
        _fused_kernel, act_name=act, k=k,
        geoms=((g1.spad, g1.rows), (g2.spad, g2.rows), (g3.spad, g3.rows)))

    operands = (x1, w1, b1, L1, R1, w2, b2, L2, R2, w3, b3, G, bfc)

    def _full(a):
        return pl.BlockSpec(a.shape, lambda i, nd=a.ndim: (0,) * nd)

    in_specs = [pl.BlockSpec((1,) + x1.shape[1:], lambda i: (i, 0, 0))]
    in_specs += [_full(a) for a in operands[1:]]

    out = pl.pallas_call(
        kernel,
        out_shape=jax.ShapeDtypeStruct((N, 1, 1), jnp.float32),
        grid=(N,),
        in_specs=in_specs,
        out_specs=pl.BlockSpec((1, 1, 1), lambda i: (i, 0, 0)),
        compiler_params=pltpu.CompilerParams(
            dimension_semantics=("parallel",)),
    )(*operands)
    return out.reshape(N, 1)


# ---------------------------------------------------------------------------
# Pure-JAX reference (mirrors the PyTorch forward) for a correctness check
# ---------------------------------------------------------------------------
def reference_forward(x, params, cfg):
    act = _ACTS[cfg["activation"]]
    pad, p, mode = cfg["padding"], cfg["pooling_size"], cfg["padding_mode"]

    def layer(x, w, b):
        xp = jnp.pad(x, ((0, 0), (0, 0), (pad, pad), (pad, pad), (pad, pad)),
                     mode=_PAD_MODE[mode])
        y = jax.lax.conv_general_dilated(
            xp, w, window_strides=(1, 1, 1), padding=[(0, 0)] * 3,
            dimension_numbers=("NCDHW", "OIDHW", "NCDHW"), precision=_HIGH)
        y = act(y + b.reshape(1, -1, 1, 1, 1))
        N, C, D, H, W = y.shape
        Dp, Hp, Wp = D // p, H // p, W // p
        y = y[:, :, :Dp * p, :Hp * p, :Wp * p]
        return y.reshape(N, C, Dp, p, Hp, p, Wp, p).mean(axis=(3, 5, 7))

    x = layer(x, params["w1"], params["b1"])
    x = layer(x, params["w2"], params["b2"])
    x = layer(x, params["w3"], params["b3"])
    x = x.reshape(x.shape[0], -1)
    return x @ params["w_fc"] + params["b_fc"]


# ---------------------------------------------------------------------------
if __name__ == "__main__":
    cfg = dict(
        linear_input_size=16,     # spatial extent (D = H = W)
        input_channel=2,
        hidden_channel=4,
        output_size=1,            # final Linear hard-codes out_features=1
        kernel_size=3,
        padding=1,
        padding_mode="zeros",
        pooling_size=2,
        activation="ReLU",
    )
    k = cfg["kernel_size"]
    cin, ch = cfg["input_channel"], cfg["hidden_channel"]
    flat_features = ch * int(cfg["linear_input_size"] / cfg["pooling_size"] ** 3) ** 3

    root = jax.random.PRNGKey(0)
    kx, k1, k2, k3, k4, k5, k6, k7, k8 = jax.random.split(root, 9)

    def uinit(key, shape, fan_in):
        bound = 1.0 / (fan_in ** 0.5)
        return jax.random.uniform(key, shape, jnp.float32, -bound, bound)

    params = {
        "w1": uinit(k1, (ch, cin, k, k, k), cin * k ** 3),
        "b1": uinit(k2, (ch,), cin * k ** 3),
        "w2": uinit(k3, (ch, ch, k, k, k), ch * k ** 3),
        "b2": uinit(k4, (ch,), ch * k ** 3),
        "w3": uinit(k5, (ch, ch, k, k, k), ch * k ** 3),
        "b3": uinit(k6, (ch,), ch * k ** 3),
        # PyTorch Linear weight is (1, F); stored here pre-transposed as (F, 1).
        "w_fc": uinit(k7, (flat_features, 1), flat_features),
        "b_fc": uinit(k8, (1,), flat_features),
    }

    # input: NCDHW, batch=2, channels=2, spatial=16
    x = jax.random.normal(kx, (2, cin, 16, 16, 16), jnp.float32)

    out = jax.jit(lambda xx: pilati_forward(xx, params, cfg))(x)
    out = jax.block_until_ready(out)
    assert out.shape == (2, 1), out.shape

    ref = reference_forward(x, params, cfg)
    assert jnp.allclose(out, ref, rtol=2e-3, atol=2e-3), (out, ref)

    print("KERNEL_OK")
</pallas_src>

<mosaic_0001>
module attributes {stable_mosaic.version = 11 : i64} {
  func.func @_fused_kernel(%arg0: i32, %arg1: memref<1x324x36xf32, #tpu.memory_space<vmem>>, %arg2: memref<9x36x64xf32, #tpu.memory_space<vmem>>, %arg3: memref<1x64xf32, #tpu.memory_space<vmem>>, %arg4: memref<100x286xf32, #tpu.memory_space<vmem>>, %arg5: memref<64x40xf32, #tpu.memory_space<vmem>>, %arg6: memref<9x40x32xf32, #tpu.memory_space<vmem>>, %arg7: memref<1x32xf32, #tpu.memory_space<vmem>>, %arg8: memref<36x78xf32, #tpu.memory_space<vmem>>, %arg9: memref<32x24xf32, #tpu.memory_space<vmem>>, %arg10: memref<9x24x16xf32, #tpu.memory_space<vmem>>, %arg11: memref<1x16xf32, #tpu.memory_space<vmem>>, %arg12: memref<22x16xf32, #tpu.memory_space<vmem>>, %arg13: memref<1x1xf32, #tpu.memory_space<vmem>>, %arg14: memref<1x1x1xf32, #tpu.memory_space<vmem>>) attributes {dimension_semantics = [#tpu.dimension_semantics<parallel>], iteration_bounds = array<i64: 2>, scalar_prefetch = 0 : i64, scratch_operands = 0 : i64, tpu.core_type = #tpu.core_type<tc>, window_params = [{transform_indices = @transform_0, window_bounds = array<i64: 1, 324, 36>}, {pipeline_mode = #tpu.pipeline_mode<synchronous>, transform_indices = @transform_1, window_bounds = array<i64: 9, 36, 64>}, {pipeline_mode = #tpu.pipeline_mode<synchronous>, transform_indices = @transform_2, window_bounds = array<i64: 1, 64>}, {pipeline_mode = #tpu.pipeline_mode<synchronous>, transform_indices = @transform_3, window_bounds = array<i64: 100, 286>}, {pipeline_mode = #tpu.pipeline_mode<synchronous>, transform_indices = @transform_4, window_bounds = array<i64: 64, 40>}, {pipeline_mode = #tpu.pipeline_mode<synchronous>, transform_indices = @transform_5, window_bounds = array<i64: 9, 40, 32>}, {pipeline_mode = #tpu.pipeline_mode<synchronous>, transform_indices = @transform_6, window_bounds = array<i64: 1, 32>}, {pipeline_mode = #tpu.pipeline_mode<synchronous>, transform_indices = @transform_7, window_bounds = array<i64: 36, 78>}, {pipeline_mode = #tpu.pipeline_mode<synchronous>, transform_indices = @transform_8, window_bounds = array<i64: 32, 24>}, {pipeline_mode = #tpu.pipeline_mode<synchronous>, transform_indices = @transform_9, window_bounds = array<i64: 9, 24, 16>}, {pipeline_mode = #tpu.pipeline_mode<synchronous>, transform_indices = @transform_10, window_bounds = array<i64: 1, 16>}, {pipeline_mode = #tpu.pipeline_mode<synchronous>, transform_indices = @transform_11, window_bounds = array<i64: 22, 16>}, {pipeline_mode = #tpu.pipeline_mode<synchronous>, transform_indices = @transform_12, window_bounds = array<i64: 1, 1>}, {transform_indices = @transform_13, window_bounds = array<i64: 1, 1, 1>}]} {
    %c0 = arith.constant 0 : index
    %c0_0 = arith.constant 0 : index
    %c0_1 = arith.constant 0 : index
    %0 = vector.load %arg1[%c0, %c0_0, %c0_1] : memref<1x324x36xf32, #tpu.memory_space<vmem>>, vector<1x324x36xf32>
    %1 = vector.shape_cast %0 : vector<1x324x36xf32> to vector<324x36xf32>
    %2 = vector.extract_strided_slice %1 {offsets = [0, 0], sizes = [286, 36], strides = [1, 1]} : vector<324x36xf32> to vector<286x36xf32>
    %c0_2 = arith.constant 0 : index
    %c0_3 = arith.constant 0 : index
    %c0_4 = arith.constant 0 : index
    %3 = vector.load %arg2[%c0_2, %c0_3, %c0_4] : memref<9x36x64xf32, #tpu.memory_space<vmem>>, vector<1x36x64xf32>
    %4 = vector.shape_cast %3 : vector<1x36x64xf32> to vector<36x64xf32>
    %cst = arith.constant dense<0.000000e+00> : vector<286x64xf32>
    %5 = tpu.matmul %2, %4, %cst {dimension_numbers = #tpu.dot_dimension_numbers<[1], [0], [0], [1], [0, 0, 1, 1], [], []>} : vector<286x36xf32>, vector<36x64xf32>, vector<286x64xf32> -> vector<286x64xf32>
    %6 = vector.extract_strided_slice %1 {offsets = [1, 0], sizes = [286, 36], strides = [1, 1]} : vector<324x36xf32> to vector<286x36xf32>
    %c1 = arith.constant 1 : index
    %c0_5 = arith.constant 0 : index
    %c0_6 = arith.constant 0 : index
    %7 = vector.load %arg2[%c1, %c0_5, %c0_6] : memref<9x36x64xf32, #tpu.memory_space<vmem>>, vector<1x36x64xf32>
    %8 = vector.shape_cast %7 : vector<1x36x64xf32> to vector<36x64xf32>
    %cst_7 = arith.constant dense<0.000000e+00> : vector<286x64xf32>
    %9 = tpu.matmul %6, %8, %cst_7 {dimension_numbers = #tpu.dot_dimension_numbers<[1], [0], [0], [1], [0, 0, 1, 1], [], []>} : vector<286x36xf32>, vector<36x64xf32>, vector<286x64xf32> -> vector<286x64xf32>
    %10 = arith.addf %5, %9 : vector<286x64xf32>
    %11 = vector.extract_strided_slice %1 {offsets = [2, 0], sizes = [286, 36], strides = [1, 1]} : vector<324x36xf32> to vector<286x36xf32>
    %c2 = arith.constant 2 : index
    %c0_8 = arith.constant 0 : index
    %c0_9 = arith.constant 0 : index
    %12 = vector.load %arg2[%c2, %c0_8, %c0_9] : memref<9x36x64xf32, #tpu.memory_space<vmem>>, vector<1x36x64xf32>
    %13 = vector.shape_cast %12 : vector<1x36x64xf32> to vector<36x64xf32>
    %cst_10 = arith.constant dense<0.000000e+00> : vector<286x64xf32>
    %14 = tpu.matmul %11, %13, %cst_10 {dimension_numbers = #tpu.dot_dimension_numbers<[1], [0], [0], [1], [0, 0, 1, 1], [], []>} : vector<286x36xf32>, vector<36x64xf32>, vector<286x64xf32> -> vector<286x64xf32>
    %15 = arith.addf %10, %14 : vector<286x64xf32>
    %16 = vector.extract_strided_slice %1 {offsets = [18, 0], sizes = [286, 36], strides = [1, 1]} : vector<324x36xf32> to vector<286x36xf32>
    %c3 = arith.constant 3 : index
    %c0_11 = arith.constant 0 : index
    %c0_12 = arith.constant 0 : index
    %17 = vector.load %arg2[%c3, %c0_11, %c0_12] : memref<9x36x64xf32, #tpu.memory_space<vmem>>, vector<1x36x64xf32>
    %18 = vector.shape_cast %17 : vector<1x36x64xf32> to vector<36x64xf32>
    %cst_13 = arith.constant dense<0.000000e+00> : vector<286x64xf32>
    %19 = tpu.matmul %16, %18, %cst_13 {dimension_numbers = #tpu.dot_dimension_numbers<[1], [0], [0], [1], [0, 0, 1, 1], [], []>} : vector<286x36xf32>, vector<36x64xf32>, vector<286x64xf32> -> vector<286x64xf32>
    %20 = arith.addf %15, %19 : vector<286x64xf32>
    %21 = vector.extract_strided_slice %1 {offsets = [19, 0], sizes = [286, 36], strides = [1, 1]} : vector<324x36xf32> to vector<286x36xf32>
    %c4 = arith.constant 4 : index
    %c0_14 = arith.constant 0 : index
    %c0_15 = arith.constant 0 : index
    %22 = vector.load %arg2[%c4, %c0_14, %c0_15] : memref<9x36x64xf32, #tpu.memory_space<vmem>>, vector<1x36x64xf32>
    %23 = vector.shape_cast %22 : vector<1x36x64xf32> to vector<36x64xf32>
    %cst_16 = arith.constant dense<0.000000e+00> : vector<286x64xf32>
    %24 = tpu.matmul %21, %23, %cst_16 {dimension_numbers = #tpu.dot_dimension_numbers<[1], [0], [0], [1], [0, 0, 1, 1], [], []>} : vector<286x36xf32>, vector<36x64xf32>, vector<286x64xf32> -> vector<286x64xf32>
    %25 = arith.addf %20, %24 : vector<286x64xf32>
    %26 = vector.extract_strided_slice %1 {offsets = [20, 0], sizes = [286, 36], strides = [1, 1]} : vector<324x36xf32> to vector<286x36xf32>
    %c5 = arith.constant 5 : index
    %c0_17 = arith.constant 0 : index
    %c0_18 = arith.constant 0 : index
    %27 = vector.load %arg2[%c5, %c0_17, %c0_18] : memref<9x36x64xf32, #tpu.memory_space<vmem>>, vector<1x36x64xf32>
    %28 = vector.shape_cast %27 : vector<1x36x64xf32> to vector<36x64xf32>
    %cst_19 = arith.constant dense<0.000000e+00> : vector<286x64xf32>
    %29 = tpu.matmul %26, %28, %cst_19 {dimension_numbers = #tpu.dot_dimension_numbers<[1], [0], [0], [1], [0, 0, 1, 1], [], []>} : vector<286x36xf32>, vector<36x64xf32>, vector<286x64xf32> -> vector<286x64xf32>
    %30 = arith.addf %25, %29 : vector<286x64xf32>
    %31 = vector.extract_strided_slice %1 {offsets = [36, 0], sizes = [286, 36], strides = [1, 1]} : vector<324x36xf32> to vector<286x36xf32>
    %c6 = arith.constant 6 : index
    %c0_20 = arith.constant 0 : index
    %c0_21 = arith.constant 0 : index
    %32 = vector.load %arg2[%c6, %c0_20, %c0_21] : memref<9x36x64xf32, #tpu.memory_space<vmem>>, vector<1x36x64xf32>
    %33 = vector.shape_cast %32 : vector<1x36x64xf32> to vector<36x64xf32>
    %cst_22 = arith.constant dense<0.000000e+00> : vector<286x64xf32>
    %34 = tpu.matmul %31, %33, %cst_22 {dimension_numbers = #tpu.dot_dimension_numbers<[1], [0], [0], [1], [0, 0, 1, 1], [], []>} : vector<286x36xf32>, vector<36x64xf32>, vector<286x64xf32> -> vector<286x64xf32>
    %35 = arith.addf %30, %34 : vector<286x64xf32>
    %36 = vector.extract_strided_slice %1 {offsets = [37, 0], sizes = [286, 36], strides = [1, 1]} : vector<324x36xf32> to vector<286x36xf32>
    %c7 = arith.constant 7 : index
    %c0_23 = arith.constant 0 : index
    %c0_24 = arith.constant 0 : index
    %37 = vector.load %arg2[%c7, %c0_23, %c0_24] : memref<9x36x64xf32, #tpu.memory_space<vmem>>, vector<1x36x64xf32>
    %38 = vector.shape_cast %37 : vector<1x36x64xf32> to vector<36x64xf32>
    %cst_25 = arith.constant dense<0.000000e+00> : vector<286x64xf32>
    %39 = tpu.matmul %36, %38, %cst_25 {dimension_numbers = #tpu.dot_dimension_numbers<[1], [0], [0], [1], [0, 0, 1, 1], [], []>} : vector<286x36xf32>, vector<36x64xf32>, vector<286x64xf32> -> vector<286x64xf32>
    %40 = arith.addf %35, %39 : vector<286x64xf32>
    %41 = vector.extract_strided_slice %1 {offsets = [38, 0], sizes = [286, 36], strides = [1, 1]} : vector<324x36xf32> to vector<286x36xf32>
    %c8 = arith.constant 8 : index
    %c0_26 = arith.constant 0 : index
    %c0_27 = arith.constant 0 : index
    %42 = vector.load %arg2[%c8, %c0_26, %c0_27] : memref<9x36x64xf32, #tpu.memory_space<vmem>>, vector<1x36x64xf32>
    %43 = vector.shape_cast %42 : vector<1x36x64xf32> to vector<36x64xf32>
    %cst_28 = arith.constant dense<0.000000e+00> : vector<286x64xf32>
    %44 = tpu.matmul %41, %43, %cst_28 {dimension_numbers = #tpu.dot_dimension_numbers<[1], [0], [0], [1], [0, 0, 1, 1], [], []>} : vector<286x36xf32>, vector<36x64xf32>, vector<286x64xf32> -> vector<286x64xf32>
    %45 = arith.addf %40, %44 : vector<286x64xf32>
    %c0_29 = arith.constant 0 : index
    %c0_30 = arith.constant 0 : index
    %46 = vector.load %arg3[%c0_29, %c0_30] : memref<1x64xf32, #tpu.memory_space<vmem>>, vector<1x64xf32>
    %47 = vector.broadcast %46 : vector<1x64xf32> to vector<286x64xf32>
    %48 = arith.addf %45, %47 : vector<286x64xf32>
    %cst_31 = arith.constant 0.000000e+00 : f32
    %49 = vector.broadcast %cst_31 : f32 to vector<286x64xf32>
    %50 = arith.maximumf %48, %49 : vector<286x64xf32>
    %c0_32 = arith.constant 0 : index
    %c0_33 = arith.constant 0 : index
    %51 = vector.load %arg4[%c0_32, %c0_33] : memref<100x286xf32, #tpu.memory_space<vmem>>, vector<100x286xf32>
    %c0_34 = arith.constant 0 : index
    %c0_35 = arith.constant 0 : index
    %52 = vector.load %arg5[%c0_34, %c0_35] : memref<64x40xf32, #tpu.memory_space<vmem>>, vector<64x40xf32>
    %cst_36 = arith.constant dense<0.000000e+00> : vector<286x40xf32>
    %53 = tpu.matmul %50, %52, %cst_36 {dimension_numbers = #tpu.dot_dimension_numbers<[1], [0], [0], [1], [0, 0, 1, 1], [], []>} : vector<286x64xf32>, vector<64x40xf32>, vector<286x40xf32> -> vector<286x40xf32>
    %cst_37 = arith.constant dense<0.000000e+00> : vector<100x40xf32>
    %54 = tpu.matmul %51, %53, %cst_37 {dimension_numbers = #tpu.dot_dimension_numbers<[1], [0], [0], [1], [0, 0, 1, 1], [], []>} : vector<100x286xf32>, vector<286x40xf32>, vector<100x40xf32> -> vector<100x40xf32>
    %55 = vector.extract_strided_slice %54 {offsets = [0, 0], sizes = [78, 40], strides = [1, 1]} : vector<100x40xf32> to vector<78x40xf32>
    %c0_38 = arith.constant 0 : index
    %c0_39 = arith.constant 0 : index
    %c0_40 = arith.constant 0 : index
    %56 = vector.load %arg6[%c0_38, %c0_39, %c0_40] : memref<9x40x32xf32, #tpu.memory_space<vmem>>, vector<1x40x32xf32>
    %57 = vector.shape_cast %56 : vector<1x40x32xf32> to vector<40x32xf32>
    %cst_41 = arith.constant dense<0.000000e+00> : vector<78x32xf32>
    %58 = tpu.matmul %55, %57, %cst_41 {dimension_numbers = #tpu.dot_dimension_numbers<[1], [0], [0], [1], [0, 0, 1, 1], [], []>} : vector<78x40xf32>, vector<40x32xf32>, vector<78x32xf32> -> vector<78x32xf32>
    %59 = vector.extract_strided_slice %54 {offsets = [1, 0], sizes = [78, 40], strides = [1, 1]} : vector<100x40xf32> to vector<78x40xf32>
    %c1_42 = arith.constant 1 : index
    %c0_43 = arith.constant 0 : index
    %c0_44 = arith.constant 0 : index
    %60 = vector.load %arg6[%c1_42, %c0_43, %c0_44] : memref<9x40x32xf32, #tpu.memory_space<vmem>>, vector<1x40x32xf32>
    %61 = vector.shape_cast %60 : vector<1x40x32xf32> to vector<40x32xf32>
    %cst_45 = arith.constant dense<0.000000e+00> : vector<78x32xf32>
    %62 = tpu.matmul %59, %61, %cst_45 {dimension_numbers = #tpu.dot_dimension_numbers<[1], [0], [0], [1], [0, 0, 1, 1], [], []>} : vector<78x40xf32>, vector<40x32xf32>, vector<78x32xf32> -> vector<78x32xf32>
    %63 = arith.addf %58, %62 : vector<78x32xf32>
    %64 = vector.extract_strided_slice %54 {offsets = [2, 0], sizes = [78, 40], strides = [1, 1]} : vector<100x40xf32> to vector<78x40xf32>
    %c2_46 = arith.constant 2 : index
    %c0_47 = arith.constant 0 : index
    %c0_48 = arith.constant 0 : index
    %65 = vector.load %arg6[%c2_46, %c0_47, %c0_48] : memref<9x40x32xf32, #tpu.memory_space<vmem>>, vector<1x40x32xf32>
    %66 = vector.shape_cast %65 : vector<1x40x32xf32> to vector<40x32xf32>
    %cst_49 = arith.constant dense<0.000000e+00> : vector<78x32xf32>
    %67 = tpu.matmul %64, %66, %cst_49 {dimension_numbers = #tpu.dot_dimension_numbers<[1], [0], [0], [1], [0, 0, 1, 1], [], []>} : vector<78x40xf32>, vector<40x32xf32>, vector<78x32xf32> -> vector<78x32xf32>
    %68 = arith.addf %63, %67 : vector<78x32xf32>
    %69 = vector.extract_strided_slice %54 {offsets = [10, 0], sizes = [78, 40], strides = [1, 1]} : vector<100x40xf32> to vector<78x40xf32>
    %c3_50 = arith.constant 3 : index
    %c0_51 = arith.constant 0 : index
    %c0_52 = arith.constant 0 : index
    %70 = vector.load %arg6[%c3_50, %c0_51, %c0_52] : memref<9x40x32xf32, #tpu.memory_space<vmem>>, vector<1x40x32xf32>
    %71 = vector.shape_cast %70 : vector<1x40x32xf32> to vector<40x32xf32>
    %cst_53 = arith.constant dense<0.000000e+00> : vector<78x32xf32>
    %72 = tpu.matmul %69, %71, %cst_53 {dimension_numbers = #tpu.dot_dimension_numbers<[1], [0], [0], [1], [0, 0, 1, 1], [], []>} : vector<78x40xf32>, vector<40x32xf32>, vector<78x32xf32> -> vector<78x32xf32>
    %73 = arith.addf %68, %72 : vector<78x32xf32>
    %74 = vector.extract_strided_slice %54 {offsets = [11, 0], sizes = [78, 40], strides = [1, 1]} : vector<100x40xf32> to vector<78x40xf32>
    %c4_54 = arith.constant 4 : index
    %c0_55 = arith.constant 0 : index
    %c0_56 = arith.constant 0 : index
    %75 = vector.load %arg6[%c4_54, %c0_55, %c0_56] : memref<9x40x32xf32, #tpu.memory_space<vmem>>, vector<1x40x32xf32>
    %76 = vector.shape_cast %75 : vector<1x40x32xf32> to vector<40x32xf32>
    %cst_57 = arith.constant dense<0.000000e+00> : vector<78x32xf32>
    %77 = tpu.matmul %74, %76, %cst_57 {dimension_numbers = #tpu.dot_dimension_numbers<[1], [0], [0], [1], [0, 0, 1, 1], [], []>} : vector<78x40xf32>, vector<40x32xf32>, vector<78x32xf32> -> vector<78x32xf32>
    %78 = arith.addf %73, %77 : vector<78x32xf32>
    %79 = vector.extract_strided_slice %54 {offsets = [12, 0], sizes = [78, 40], strides = [1, 1]} : vector<100x40xf32> to vector<78x40xf32>
    %c5_58 = arith.constant 5 : index
    %c0_59 = arith.constant 0 : index
    %c0_60 = arith.constant 0 : index
    %80 = vector.load %arg6[%c5_58, %c0_59, %c0_60] : memref<9x40x32xf32, #tpu.memory_space<vmem>>, vector<1x40x32xf32>
    %81 = vector.shape_cast %80 : vector<1x40x32xf32> to vector<40x32xf32>
    %cst_61 = arith.constant dense<0.000000e+00> : vector<78x32xf32>
    %82 = tpu.matmul %79, %81, %cst_61 {dimension_numbers = #tpu.dot_dimension_numbers<[1], [0], [0], [1], [0, 0, 1, 1], [], []>} : vector<78x40xf32>, vector<40x32xf32>, vector<78x32xf32> -> vector<78x32xf32>
    %83 = arith.addf %78, %82 : vector<78x32xf32>
    %84 = vector.extract_strided_slice %54 {offsets = [20, 0], sizes = [78, 40], strides = [1, 1]} : vector<100x40xf32> to vector<78x40xf32>
    %c6_62 = arith.constant 6 : index
    %c0_63 = arith.constant 0 : index
    %c0_64 = arith.constant 0 : index
    %85 = vector.load %arg6[%c6_62, %c0_63, %c0_64] : memref<9x40x32xf32, #tpu.memory_space<vmem>>, vector<1x40x32xf32>
    %86 = vector.shape_cast %85 : vector<1x40x32xf32> to vector<40x32xf32>
    %cst_65 = arith.constant dense<0.000000e+00> : vector<78x32xf32>
    %87 = tpu.matmul %84, %86, %cst_65 {dimension_numbers = #tpu.dot_dimension_numbers<[1], [0], [0], [1], [0, 0, 1, 1], [], []>} : vector<78x40xf32>, vector<40x32xf32>, vector<78x32xf32> -> vector<78x32xf32>
    %88 = arith.addf %83, %87 : vector<78x32xf32>
    %89 = vector.extract_strided_slice %54 {offsets = [21, 0], sizes = [78, 40], strides = [1, 1]} : vector<100x40xf32> to vector<78x40xf32>
    %c7_66 = arith.constant 7 : index
    %c0_67 = arith.constant 0 : index
    %c0_68 = arith.constant 0 : index
    %90 = vector.load %arg6[%c7_66, %c0_67, %c0_68] : memref<9x40x32xf32, #tpu.memory_space<vmem>>, vector<1x40x32xf32>
    %91 = vector.shape_cast %90 : vector<1x40x32xf32> to vector<40x32xf32>
    %cst_69 = arith.constant dense<0.000000e+00> : vector<78x32xf32>
    %92 = tpu.matmul %89, %91, %cst_69 {dimension_numbers = #tpu.dot_dimension_numbers<[1], [0], [0], [1], [0, 0, 1, 1], [], []>} : vector<78x40xf32>, vector<40x32xf32>, vector<78x32xf32> -> vector<78x32xf32>
    %93 = arith.addf %88, %92 : vector<78x32xf32>
    %94 = vector.extract_strided_slice %54 {offsets = [22, 0], sizes = [78, 40], strides = [1, 1]} : vector<100x40xf32> to vector<78x40xf32>
    %c8_70 = arith.constant 8 : index
    %c0_71 = arith.constant 0 : index
    %c0_72 = arith.constant 0 : index
    %95 = vector.load %arg6[%c8_70, %c0_71, %c0_72] : memref<9x40x32xf32, #tpu.memory_space<vmem>>, vector<1x40x32xf32>
    %96 = vector.shape_cast %95 : vector<1x40x32xf32> to vector<40x32xf32>
    %cst_73 = arith.constant dense<0.000000e+00> : vector<78x32xf32>
    %97 = tpu.matmul %94, %96, %cst_73 {dimension_numbers = #tpu.dot_dimension_numbers<[1], [0], [0], [1], [0, 0, 1, 1], [], []>} : vector<78x40xf32>, vector<40x32xf32>, vector<78x32xf32> -> vector<78x32xf32>
    %98 = arith.addf %93, %97 : vector<78x32xf32>
    %c0_74 = arith.constant 0 : index
    %c0_75 = arith.constant 0 : index
    %99 = vector.load %arg7[%c0_74, %c0_75] : memref<1x32xf32, #tpu.memory_space<vmem>>, vector<1x32xf32>
    %100 = vector.broadcast %99 : vector<1x32xf32> to vector<78x32xf32>
    %101 = arith.addf %98, %100 : vector<78x32xf32>
    %cst_76 = arith.constant 0.000000e+00 : f32
    %102 = vector.broadcast %cst_76 : f32 to vector<78x32xf32>
    %103 = arith.maximumf %101, %102 : vector<78x32xf32>
    %c0_77 = arith.constant 0 : index
    %c0_78 = arith.constant 0 : index
    %104 = vector.load %arg8[%c0_77, %c0_78] : memref<36x78xf32, #tpu.memory_space<vmem>>, vector<36x78xf32>
    %c0_79 = arith.constant 0 : index
    %c0_80 = arith.constant 0 : index
    %105 = vector.load %arg9[%c0_79, %c0_80] : memref<32x24xf32, #tpu.memory_space<vmem>>, vector<32x24xf32>
    %cst_81 = arith.constant dense<0.000000e+00> : vector<78x24xf32>
    %106 = tpu.matmul %103, %105, %cst_81 {dimension_numbers = #tpu.dot_dimension_numbers<[1], [0], [0], [1], [0, 0, 1, 1], [], []>} : vector<78x32xf32>, vector<32x24xf32>, vector<78x24xf32> -> vector<78x24xf32>
    %cst_82 = arith.constant dense<0.000000e+00> : vector<36x24xf32>
    %107 = tpu.matmul %104, %106, %cst_82 {dimension_numbers = #tpu.dot_dimension_numbers<[1], [0], [0], [1], [0, 0, 1, 1], [], []>} : vector<36x78xf32>, vector<78x24xf32>, vector<36x24xf32> -> vector<36x24xf32>
    %108 = vector.extract_strided_slice %107 {offsets = [0, 0], sizes = [22, 24], strides = [1, 1]} : vector<36x24xf32> to vector<22x24xf32>
    %c0_83 = arith.constant 0 : index
    %c0_84 = arith.constant 0 : index
    %c0_85 = arith.constant 0 : index
    %109 = vector.load %arg10[%c0_83, %c0_84, %c0_85] : memref<9x24x16xf32, #tpu.memory_space<vmem>>, vector<1x24x16xf32>
    %110 = vector.shape_cast %109 : vector<1x24x16xf32> to vector<24x16xf32>
    %cst_86 = arith.constant dense<0.000000e+00> : vector<22x16xf32>
    %111 = tpu.matmul %108, %110, %cst_86 {dimension_numbers = #tpu.dot_dimension_numbers<[1], [0], [0], [1], [0, 0, 1, 1], [], []>} : vector<22x24xf32>, vector<24x16xf32>, vector<22x16xf32> -> vector<22x16xf32>
    %112 = vector.extract_strided_slice %107 {offsets = [1, 0], sizes = [22, 24], strides = [1, 1]} : vector<36x24xf32> to vector<22x24xf32>
    %c1_87 = arith.constant 1 : index
    %c0_88 = arith.constant 0 : index
    %c0_89 = arith.constant 0 : index
    %113 = vector.load %arg10[%c1_87, %c0_88, %c0_89] : memref<9x24x16xf32, #tpu.memory_space<vmem>>, vector<1x24x16xf32>
    %114 = vector.shape_cast %113 : vector<1x24x16xf32> to vector<24x16xf32>
    %cst_90 = arith.constant dense<0.000000e+00> : vector<22x16xf32>
    %115 = tpu.matmul %112, %114, %cst_90 {dimension_numbers = #tpu.dot_dimension_numbers<[1], [0], [0], [1], [0, 0, 1, 1], [], []>} : vector<22x24xf32>, vector<24x16xf32>, vector<22x16xf32> -> vector<22x16xf32>
    %116 = arith.addf %111, %115 : vector<22x16xf32>
    %117 = vector.extract_strided_slice %107 {offsets = [2, 0], sizes = [22, 24], strides = [1, 1]} : vector<36x24xf32> to vector<22x24xf32>
    %c2_91 = arith.constant 2 : index
    %c0_92 = arith.constant 0 : index
    %c0_93 = arith.constant 0 : index
    %118 = vector.load %arg10[%c2_91, %c0_92, %c0_93] : memref<9x24x16xf32, #tpu.memory_space<vmem>>, vector<1x24x16xf32>
    %119 = vector.shape_cast %118 : vector<1x24x16xf32> to vector<24x16xf32>
    %cst_94 = arith.constant dense<0.000000e+00> : vector<22x16xf32>
    %120 = tpu.matmul %117, %119, %cst_94 {dimension_numbers = #tpu.dot_dimension_numbers<[1], [0], [0], [1], [0, 0, 1, 1], [], []>} : vector<22x24xf32>, vector<24x16xf32>, vector<22x16xf32> -> vector<22x16xf32>
    %121 = arith.addf %116, %120 : vector<22x16xf32>
    %122 = vector.extract_strided_slice %107 {offsets = [6, 0], sizes = [22, 24], strides = [1, 1]} : vector<36x24xf32> to vector<22x24xf32>
    %c3_95 = arith.constant 3 : index
    %c0_96 = arith.constant 0 : index
    %c0_97 = arith.constant 0 : index
    %123 = vector.load %arg10[%c3_95, %c0_96, %c0_97] : memref<9x24x16xf32, #tpu.memory_space<vmem>>, vector<1x24x16xf32>
    %124 = vector.shape_cast %123 : vector<1x24x16xf32> to vector<24x16xf32>
    %cst_98 = arith.constant dense<0.000000e+00> : vector<22x16xf32>
    %125 = tpu.matmul %122, %124, %cst_98 {dimension_numbers = #tpu.dot_dimension_numbers<[1], [0], [0], [1], [0, 0, 1, 1], [], []>} : vector<22x24xf32>, vector<24x16xf32>, vector<22x16xf32> -> vector<22x16xf32>
    %126 = arith.addf %121, %125 : vector<22x16xf32>
    %127 = vector.extract_strided_slice %107 {offsets = [7, 0], sizes = [22, 24], strides = [1, 1]} : vector<36x24xf32> to vector<22x24xf32>
    %c4_99 = arith.constant 4 : index
    %c0_100 = arith.constant 0 : index
    %c0_101 = arith.constant 0 : index
    %128 = vector.load %arg10[%c4_99, %c0_100, %c0_101] : memref<9x24x16xf32, #tpu.memory_space<vmem>>, vector<1x24x16xf32>
    %129 = vector.shape_cast %128 : vector<1x24x16xf32> to vector<24x16xf32>
    %cst_102 = arith.constant dense<0.000000e+00> : vector<22x16xf32>
    %130 = tpu.matmul %127, %129, %cst_102 {dimension_numbers = #tpu.dot_dimension_numbers<[1], [0], [0], [1], [0, 0, 1, 1], [], []>} : vector<22x24xf32>, vector<24x16xf32>, vector<22x16xf32> -> vector<22x16xf32>
    %131 = arith.addf %126, %130 : vector<22x16xf32>
    %132 = vector.extract_strided_slice %107 {offsets = [8, 0], sizes = [22, 24], strides = [1, 1]} : vector<36x24xf32> to vector<22x24xf32>
    %c5_103 = arith.constant 5 : index
    %c0_104 = arith.constant 0 : index
    %c0_105 = arith.constant 0 : index
    %133 = vector.load %arg10[%c5_103, %c0_104, %c0_105] : memref<9x24x16xf32, #tpu.memory_space<vmem>>, vector<1x24x16xf32>
    %134 = vector.shape_cast %133 : vector<1x24x16xf32> to vector<24x16xf32>
    %cst_106 = arith.constant dense<0.000000e+00> : vector<22x16xf32>
    %135 = tpu.matmul %132, %134, %cst_106 {dimension_numbers = #tpu.dot_dimension_numbers<[1], [0], [0], [1], [0, 0, 1, 1], [], []>} : vector<22x24xf32>, vector<24x16xf32>, vector<22x16xf32> -> vector<22x16xf32>
    %136 = arith.addf %131, %135 : vector<22x16xf32>
    %137 = vector.extract_strided_slice %107 {offsets = [12, 0], sizes = [22, 24], strides = [1, 1]} : vector<36x24xf32> to vector<22x24xf32>
    %c6_107 = arith.constant 6 : index
    %c0_108 = arith.constant 0 : index
    %c0_109 = arith.constant 0 : index
    %138 = vector.load %arg10[%c6_107, %c0_108, %c0_109] : memref<9x24x16xf32, #tpu.memory_space<vmem>>, vector<1x24x16xf32>
    %139 = vector.shape_cast %138 : vector<1x24x16xf32> to vector<24x16xf32>
    %cst_110 = arith.constant dense<0.000000e+00> : vector<22x16xf32>
    %140 = tpu.matmul %137, %139, %cst_110 {dimension_numbers = #tpu.dot_dimension_numbers<[1], [0], [0], [1], [0, 0, 1, 1], [], []>} : vector<22x24xf32>, vector<24x16xf32>, vector<22x16xf32> -> vector<22x16xf32>
    %141 = arith.addf %136, %140 : vector<22x16xf32>
    %142 = vector.extract_strided_slice %107 {offsets = [13, 0], sizes = [22, 24], strides = [1, 1]} : vector<36x24xf32> to vector<22x24xf32>
    %c7_111 = arith.constant 7 : index
    %c0_112 = arith.constant 0 : index
    %c0_113 = arith.constant 0 : index
    %143 = vector.load %arg10[%c7_111, %c0_112, %c0_113] : memref<9x24x16xf32, #tpu.memory_space<vmem>>, vector<1x24x16xf32>
    %144 = vector.shape_cast %143 : vector<1x24x16xf32> to vector<24x16xf32>
    %cst_114 = arith.constant dense<0.000000e+00> : vector<22x16xf32>
    %145 = tpu.matmul %142, %144, %cst_114 {dimension_numbers = #tpu.dot_dimension_numbers<[1], [0], [0], [1], [0, 0, 1, 1], [], []>} : vector<22x24xf32>, vector<24x16xf32>, vector<22x16xf32> -> vector<22x16xf32>
    %146 = arith.addf %141, %145 : vector<22x16xf32>
    %147 = vector.extract_strided_slice %107 {offsets = [14, 0], sizes = [22, 24], strides = [1, 1]} : vector<36x24xf32> to vector<22x24xf32>
    %c8_115 = arith.constant 8 : index
    %c0_116 = arith.constant 0 : index
    %c0_117 = arith.constant 0 : index
    %148 = vector.load %arg10[%c8_115, %c0_116, %c0_117] : memref<9x24x16xf32, #tpu.memory_space<vmem>>, vector<1x24x16xf32>
    %149 = vector.shape_cast %148 : vector<1x24x16xf32> to vector<24x16xf32>
    %cst_118 = arith.constant dense<0.000000e+00> : vector<22x16xf32>
    %150 = tpu.matmul %147, %149, %cst_118 {dimension_numbers = #tpu.dot_dimension_numbers<[1], [0], [0], [1], [0, 0, 1, 1], [], []>} : vector<22x24xf32>, vector<24x16xf32>, vector<22x16xf32> -> vector<22x16xf32>
    %151 = arith.addf %146, %150 : vector<22x16xf32>
    %c0_119 = arith.constant 0 : index
    %c0_120 = arith.constant 0 : index
    %152 = vector.load %arg11[%c0_119, %c0_120] : memref<1x16xf32, #tpu.memory_space<vmem>>, vector<1x16xf32>
    %153 = vector.broadcast %152 : vector<1x16xf32> to vector<22x16xf32>
    %154 = arith.addf %151, %153 : vector<22x16xf32>
    %cst_121 = arith.constant 0.000000e+00 : f32
    %155 = vector.broadcast %cst_121 : f32 to vector<22x16xf32>
    %156 = arith.maximumf %154, %155 : vector<22x16xf32>
    %c0_122 = arith.constant 0 : index
    %c0_123 = arith.constant 0 : index
    %157 = vector.load %arg12[%c0_122, %c0_123] : memref<22x16xf32, #tpu.memory_space<vmem>>, vector<22x16xf32>
    %158 = arith.mulf %156, %157 : vector<22x16xf32>
    %cst_124 = arith.constant dense<0.000000e+00> : vector<22xf32>
    %159 = vector.multi_reduction <add>, %158, %cst_124 [1] : vector<22x16xf32> to vector<22xf32>
    %160 = vector.shape_cast %159 : vector<22xf32> to vector<22x1xf32>
    %cst_125 = arith.constant dense<0.000000e+00> : vector<1xf32>
    %161 = vector.multi_reduction <add>, %160, %cst_125 [0] : vector<22x1xf32> to vector<1xf32>
    %162 = vector.shape_cast %161 : vector<1xf32> to vector<1x1xf32>
    %c0_126 = arith.constant 0 : index
    %c0_127 = arith.constant 0 : index
    %163 = vector.load %arg13[%c0_126, %c0_127] : memref<1x1xf32, #tpu.memory_space<vmem>>, vector<1x1xf32>
    %164 = arith.addf %162, %163 : vector<1x1xf32>
    %c0_128 = arith.constant 0 : index
    %c0_129 = arith.constant 0 : index
    %c0_130 = arith.constant 0 : index
    %165 = vector.load %arg14[%c0_128, %c0_129, %c0_130] : memref<1x1x1xf32, #tpu.memory_space<vmem>>, vector<1x1x1xf32>
    %166 = vector.shape_cast %165 : vector<1x1x1xf32> to vector<1x1xf32>
    %167 = vector.shape_cast %164 : vector<1x1xf32> to vector<1x1x1xf32>
    tpu.vector_store %arg14[%c0_128, %c0_129, %c0_130], %167 {strides = array<i32>} : memref<1x1x1xf32, #tpu.memory_space<vmem>>, vector<1x1x1xf32>,
    return
  }
  func.func @transform_0(%arg0: i32) -> (i32, i32, i32) {
    %c0_i32 = arith.constant 0 : i32
    %c0_i32_0 = arith.constant 0 : i32
    %c0_i32_1 = arith.constant 0 : i32
    return %arg0, %c0_i32, %c0_i32_0 : i32, i32, i32
  }
  func.func @transform_1(%arg0: i32) -> (i32, i32, i32) {
    %c0_i32 = arith.constant 0 : i32
    %c0_i32_0 = arith.constant 0 : i32
    %c0_i32_1 = arith.constant 0 : i32
    %c0_i32_2 = arith.constant 0 : i32
    return %c0_i32, %c0_i32_0, %c0_i32_1 : i32, i32, i32
  }
  func.func @transform_2(%arg0: i32) -> (i32, i32) {
    %c0_i32 = arith.constant 0 : i32
    %c0_i32_0 = arith.constant 0 : i32
    %c0_i32_1 = arith.constant 0 : i32
    return %c0_i32, %c0_i32_0 : i32, i32
  }
  func.func @transform_3(%arg0: i32) -> (i32, i32) {
    %c0_i32 = arith.constant 0 : i32
    %c0_i32_0 = arith.constant 0 : i32
    %c0_i32_1 = arith.constant 0 : i32
    return %c0_i32, %c0_i32_0 : i32, i32
  }
  func.func @transform_4(%arg0: i32) -> (i32, i32) {
    %c0_i32 = arith.constant 0 : i32
    %c0_i32_0 = arith.constant 0 : i32
    %c0_i32_1 = arith.constant 0 : i32
    return %c0_i32, %c0_i32_0 : i32, i32
  }
  func.func @transform_5(%arg0: i32) -> (i32, i32, i32) {
    %c0_i32 = arith.constant 0 : i32
    %c0_i32_0 = arith.constant 0 : i32
    %c0_i32_1 = arith.constant 0 : i32
    %c0_i32_2 = arith.constant 0 : i32
    return %c0_i32, %c0_i32_0, %c0_i32_1 : i32, i32, i32
  }
  func.func @transform_6(%arg0: i32) -> (i32, i32) {
    %c0_i32 = arith.constant 0 : i32
    %c0_i32_0 = arith.constant 0 : i32
    %c0_i32_1 = arith.constant 0 : i32
    return %c0_i32, %c0_i32_0 : i32, i32
  }
  func.func @transform_7(%arg0: i32) -> (i32, i32) {
    %c0_i32 = arith.constant 0 : i32
    %c0_i32_0 = arith.constant 0 : i32
    %c0_i32_1 = arith.constant 0 : i32
    return %c0_i32, %c0_i32_0 : i32, i32
  }
  func.func @transform_8(%arg0: i32) -> (i32, i32) {
    %c0_i32 = arith.constant 0 : i32
    %c0_i32_0 = arith.constant 0 : i32
    %c0_i32_1 = arith.constant 0 : i32
    return %c0_i32, %c0_i32_0 : i32, i32
  }
  func.func @transform_9(%arg0: i32) -> (i32, i32, i32) {
    %c0_i32 = arith.constant 0 : i32
    %c0_i32_0 = arith.constant 0 : i32
    %c0_i32_1 = arith.constant 0 : i32
    %c0_i32_2 = arith.constant 0 : i32
    return %c0_i32, %c0_i32_0, %c0_i32_1 : i32, i32, i32
  }
  func.func @transform_10(%arg0: i32) -> (i32, i32) {
    %c0_i32 = arith.constant 0 : i32
    %c0_i32_0 = arith.constant 0 : i32
    %c0_i32_1 = arith.constant 0 : i32
    return %c0_i32, %c0_i32_0 : i32, i32
  }
  func.func @transform_11(%arg0: i32) -> (i32, i32) {
    %c0_i32 = arith.constant 0 : i32
    %c0_i32_0 = arith.constant 0 : i32
    %c0_i32_1 = arith.constant 0 : i32
    return %c0_i32, %c0_i32_0 : i32, i32
  }
  func.func @transform_12(%arg0: i32) -> (i32, i32) {
    %c0_i32 = arith.constant 0 : i32
    %c0_i32_0 = arith.constant 0 : i32
    %c0_i32_1 = arith.constant 0 : i32
    return %c0_i32, %c0_i32_0 : i32, i32
  }
  func.func @transform_13(%arg0: i32) -> (i32, i32, i32) {
    %c0_i32 = arith.constant 0 : i32
    %c0_i32_0 = arith.constant 0 : i32
    %c0_i32_1 = arith.constant 0 : i32
    return %arg0, %c0_i32, %c0_i32_0 : i32, i32, i32
  }
}

</mosaic_0001>

<bundles_post_ra>
// kernel: tile.14
= control target key start
LH: loop header
LB: loop body
LE: loop exit
PB: predicated region body
PF: predicated region fallthrough
CT: control target
= control target key end

     0   :  { %s28_s0 = inlined_call_operand.vmem [shape: f32[4], index: 0, kind: input, shape index: {}]   ;;  %s29_s1 = inlined_call_operand.vmem [shape: f32[16,4], index: 1, kind: output, shape index: {}]  }
   0x1   :  { %v4_v0 = vld [vmem:[%s28_s0] ss:$0 sm:$0xff] }
   0x2   :  { %5 = vst [vmem:[%s29_s1] sm:$0xff] %v4_v0  ;;  %8 = vst [vmem:[%s29_s1 + $0x8] sm:$0xff] %v4_v0 }

// kernel: tile.15
= control target key start
LH: loop header
LB: loop body
LE: loop exit
PB: predicated region body
PF: predicated region fallthrough
CT: control target
= control target key end

     0   :  { %s133_s10 = smov 60   ;;  %s134_s11 = smov 52   ;;  %vm3_vm0 = vcmask 31744   ;;  %vm9_vm1 = vcmask 523744   ;;  %vm15_vm2 = vcmask 490944   ;;  %vm21_vm3 = vcmask 458144   ;;  %s209_s0 = inlined_call_operand.vmem [shape: f32[16,4], index: 0, kind: input, shape index: {}]   ;;  %s210_s1 = inlined_call_operand.vmem [shape: f32[1,64], index: 1, kind: output, shape index: {}]  }
   0x1   :  { %v103_v0 = vld [vmem:[%s209_s0 + $0xf] sm:$0x1]   ;;  %v105_v1 = vld [vmem:[%s209_s0 + $0xd] sm:$0x1]   ;;  %v104_v2 = vld [vmem:[%s209_s0 + $0xe] sm:$0x1]  }
   0x2   :  { %7 = vrot.lane.b32.xlu0 %v103_v0, %s133_s10  ;;  %19 = vrot.lane.b32.xlu1 %v105_v1, %s134_s11  ;;  %v106_v3 = vld [vmem:[%s209_s0 + $0xc] sm:$0x1]   ;;  %s135_s16 = smov 56   ;;  %s136_s17 = smov 48   ;;  %v107_v4 = vld [vmem:[%s209_s0 + $0xb] sm:$0x1]  }
   0x3   :  { %v108_v5 = vld [vmem:[%s209_s0 + $0xa] sm:$0x1]   ;;  %v2_v6 = vld [vmem:[%s209_s0] sm:$0x1]   ;;  %s137_s24 = smov 44   ;;  %s138_s25 = smov 40  }
   0x4   :  { %4 = vst.msk [vmem:[#allocation0] sm:$0x1] %vm3_vm0, %v2_v6   ;;  %v109_v7 = vld [vmem:[%s209_s0 + $0x9] sm:$0x1]   ;;  %v110_v8 = vld [vmem:[%s209_s0 + $0x8] sm:$0x1]  }
   0x5   :  { %s139_s30 = smov 36   ;;  %s140_s2 = smov 32   ;;  %v111_v9 = vld [vmem:[%s209_s0 + $0x7] sm:$0x1]   ;;  %v112_v10 = vld [vmem:[%s209_s0 + $0x6] sm:$0x1]  }
   0x6   :  { %13 = vrot.lane.b32.xlu0 %v104_v2, %s135_s16  ;;  %25 = vrot.lane.b32.xlu1 %v106_v3, %s136_s17  ;;  %s141_s7 = smov 28   ;;  %s142_s8 = smov 24   ;;  %v113_v11 = vld [vmem:[%s209_s0 + $0x5] sm:$0x1]   ;;  %v114_v12 = vld [vmem:[%s209_s0 + $0x4] sm:$0x1]  }
   0x7   :  { %s143_s13 = smov 20   ;;  %s144_s14 = smov 16   ;;  %v115_v13 = vld [vmem:[%s209_s0 + $0x3] sm:$0x1]   ;;  %v116_v14 = vld [vmem:[%s209_s0 + $0x2] sm:$0x1]  }
   0x8   :  { %s145_s19 = smov 12   ;;  %s146_s20 = smov 8   ;;  %v117_v15 = vld [vmem:[%s209_s0 + $0x1] sm:$0x1]   ;;  %vm27_vm4 = vcmask 425344   ;;  %vm33_vm5 = vcmask 392544  }
   0x9   :  { %s147_s0 = smov 4   ;;  %vm39_vm6 = vcmask 359744   ;;  %vm45_vm7 = vcmask 326944   ;;  %vm51_vm8 = vcmask 294144   ;;  %vm57_vm9 = vcmask 261344  }
   0xa   :  { %31 = vrot.lane.b32.xlu0 %v107_v4, %s137_s24  ;;  %37 = vrot.lane.b32.xlu1 %v108_v5, %s138_s25  ;;  %vm63_vm10 = vcmask 228544   ;;  %vm69_vm11 = vcmask 195744   ;;  %vm75_vm12 = vcmask 162944   ;;  %vm81_vm13 = vcmask 130144  }
   0xb   :  { %vm87_vm14 = vcmask 97344   ;;  %vm93_vm15 = vcmask 64544  }
   0xe   :  { %43 = vrot.lane.b32.xlu0 %v109_v7, %s139_s30  ;;  %49 = vrot.lane.b32.xlu1 %v110_v8, %s140_s2 }
  0x12   :  { %55 = vrot.lane.b32.xlu0 %v111_v9, %s141_s7  ;;  %61 = vrot.lane.b32.xlu1 %v112_v10, %s142_s8 }
  0x16   :  { %67 = vrot.lane.b32.xlu0 %v113_v11, %s143_s13  ;;  %73 = vrot.lane.b32.xlu1 %v114_v12, %s144_s14 }
  0x1a   :  { %79 = vrot.lane.b32.xlu0 %v115_v13, %s145_s19  ;;  %85 = vrot.lane.b32.xlu1 %v116_v14, %s146_s20 }
  0x1e   :  { %91 = vrot.lane.b32.xlu0 %v117_v15, %s147_s0 }
  0x74   :  { %v8_v16 = vpop.permute.xlu0 %7   ;;  %v20_v17 = vpop.permute.xlu1 %19  }
  0x75   :  { %10 = vst.msk [vmem:[#allocation0] sm:$0x1] %vm9_vm1, %v8_v16  }
  0x78   :  { %v14_v18 = vpop.permute.xlu0 %13   ;;  %v26_v19 = vpop.permute.xlu1 %25  }
  0x79   :  { %16 = vst.msk [vmem:[#allocation0] sm:$0x1] %vm15_vm2, %v14_v18  }
  0x7a   :  { %22 = vst.msk [vmem:[#allocation0] sm:$0x1] %vm21_vm3, %v20_v17  }
  0x7b   :  { %28 = vst.msk [vmem:[#allocation0] sm:$0x1] %vm27_vm4, %v26_v19  }
  0x7c   :  { %v32_v20 = vpop.permute.xlu0 %31   ;;  %v38_v21 = vpop.permute.xlu1 %37  }
  0x7d   :  { %34 = vst.msk [vmem:[#allocation0] sm:$0x1] %vm33_vm5, %v32_v20  }
  0x7e   :  { %40 = vst.msk [vmem:[#allocation0] sm:$0x1] %vm39_vm6, %v38_v21  }
  0x80   :  { %v44_v22 = vpop.permute.xlu0 %43   ;;  %v50_v23 = vpop.permute.xlu1 %49  }
  0x81   :  { %46 = vst.msk [vmem:[#allocation0] sm:$0x1] %vm45_vm7, %v44_v22  }
  0x82   :  { %52 = vst.msk [vmem:[#allocation0] sm:$0x1] %vm51_vm8, %v50_v23  }
  0x84   :  { %v56_v24 = vpop.permute.xlu0 %55   ;;  %v62_v25 = vpop.permute.xlu1 %61  }
  0x85   :  { %58 = vst.msk [vmem:[#allocation0] sm:$0x1] %vm57_vm9, %v56_v24  }
  0x86   :  { %64 = vst.msk [vmem:[#allocation0] sm:$0x1] %vm63_vm10, %v62_v25  }
  0x88   :  { %v68_v26 = vpop.permute.xlu0 %67   ;;  %v74_v27 = vpop.permute.xlu1 %73  }
  0x89   :  { %70 = vst.msk [vmem:[#allocation0] sm:$0x1] %vm69_vm11, %v68_v26  }
  0x8a   :  { %76 = vst.msk [vmem:[#allocation0] sm:$0x1] %vm75_vm12, %v74_v27  }
  0x8c   :  { %v80_v28 = vpop.permute.xlu0 %79   ;;  %v86_v29 = vpop.permute.xlu1 %85  }
  0x8d   :  { %82 = vst.msk [vmem:[#allocation0] sm:$0x1] %vm81_vm13, %v80_v28  }
  0x8e   :  { %88 = vst.msk [vmem:[#allocation0] sm:$0x1] %vm87_vm14, %v86_v29  }
  0x90   :  { %v92_v30 = vpop.permute.xlu0 %91  }
  0x91   :  { %94 = vst.msk [vmem:[#allocation0] sm:$0x1] %vm93_vm15, %v92_v30  }
  0x98   :  { %v99_v31 = vld [vmem:[#allocation0] sm:$0x1] }
  0x99   :  { %102 = vst [vmem:[%s210_s1] sm:$0x1] %v99_v31 }

// kernel: tile.18
= control target key start
LH: loop header
LB: loop body
LE: loop exit
PB: predicated region body
PF: predicated region fallthrough
CT: control target
= control target key end

     0   :  { %s22_s0 = inlined_call_operand.vmem [shape: f32[4], index: 0, kind: input, shape index: {}]   ;;  %s23_s1 = inlined_call_operand.vmem [shape: f32[8,4], index: 1, kind: output, shape index: {}]  }
   0x1   :  { %v4_v0 = vld [vmem:[%s22_s0] ss:$0 sm:$0xff] }
   0x2   :  { %5 = vst [vmem:[%s23_s1] sm:$0xff] %v4_v0 }

// kernel: tile.19
= control target key start
LH: loop header
LB: loop body
LE: loop exit
PB: predicated region body
PF: predicated region fallthrough
CT: control target
= control target key end

     0   :  { %s69_s10 = smov 28   ;;  %s70_s11 = smov 20   ;;  %vm3_vm0 = vcmask 31744   ;;  %vm9_vm1 = vcmask 261344   ;;  %vm15_vm2 = vcmask 228544   ;;  %vm21_vm3 = vcmask 195744   ;;  %s113_s0 = inlined_call_operand.vmem [shape: f32[8,4], index: 0, kind: input, shape index: {}]   ;;  %s114_s1 = inlined_call_operand.vmem [shape: f32[1,32], index: 1, kind: output, shape index: {}]  }
   0x1   :  { %v55_v0 = vld [vmem:[%s113_s0 + $0x7] sm:$0x1]   ;;  %v57_v1 = vld [vmem:[%s113_s0 + $0x5] sm:$0x1]   ;;  %v56_v2 = vld [vmem:[%s113_s0 + $0x6] sm:$0x1]  }
   0x2   :  { %7 = vrot.lane.b32.xlu0 %v55_v0, %s69_s10  ;;  %19 = vrot.lane.b32.xlu1 %v57_v1, %s70_s11  ;;  %v58_v3 = vld [vmem:[%s113_s0 + $0x4] sm:$0x1]   ;;  %v2_v4 = vld [vmem:[%s113_s0] sm:$0x1]   ;;  %s71_s18 = smov 24   ;;  %s72_s19 = smov 16  }
   0x3   :  { %4 = vst.msk [vmem:[#allocation0] sm:$0x1] %vm3_vm0, %v2_v4   ;;  %v59_v5 = vld [vmem:[%s113_s0 + $0x3] sm:$0x1]   ;;  %v60_v6 = vld [vmem:[%s113_s0 + $0x2] sm:$0x1]  }
   0x4   :  { %s73_s24 = smov 12   ;;  %s74_s25 = smov 8   ;;  %v61_v7 = vld [vmem:[%s113_s0 + $0x1] sm:$0x1]   ;;  %vm27_vm4 = vcmask 162944   ;;  %vm33_vm5 = vcmask 130144  }
   0x5   :  { %s75_s0 = smov 4   ;;  %vm39_vm6 = vcmask 97344   ;;  %vm45_vm7 = vcmask 64544  }
   0x6   :  { %13 = vrot.lane.b32.xlu0 %v56_v2, %s71_s18  ;;  %25 = vrot.lane.b32.xlu1 %v58_v3, %s72_s19 }
   0xa   :  { %31 = vrot.lane.b32.xlu0 %v59_v5, %s73_s24  ;;  %37 = vrot.lane.b32.xlu1 %v60_v6, %s74_s25 }
   0xe   :  { %43 = vrot.lane.b32.xlu0 %v61_v7, %s75_s0 }
  0x74   :  { %v8_v8 = vpop.permute.xlu0 %7   ;;  %v20_v9 = vpop.permute.xlu1 %19  }
  0x75   :  { %10 = vst.msk [vmem:[#allocation0] sm:$0x1] %vm9_vm1, %v8_v8  }
  0x78   :  { %v14_v10 = vpop.permute.xlu0 %13   ;;  %v26_v11 = vpop.permute.xlu1 %25  }
  0x79   :  { %16 = vst.msk [vmem:[#allocation0] sm:$0x1] %vm15_vm2, %v14_v10  }
  0x7a   :  { %22 = vst.msk [vmem:[#allocation0] sm:$0x1] %vm21_vm3, %v20_v9  }
  0x7b   :  { %28 = vst.msk [vmem:[#allocation0] sm:$0x1] %vm27_vm4, %v26_v11  }
  0x7c   :  { %v32_v12 = vpop.permute.xlu0 %31   ;;  %v38_v13 = vpop.permute.xlu1 %37  }
  0x7d   :  { %34 = vst.msk [vmem:[#allocation0] sm:$0x1] %vm33_vm5, %v32_v12  }
  0x7e   :  { %40 = vst.msk [vmem:[#allocation0] sm:$0x1] %vm39_vm6, %v38_v13  }
  0x80   :  { %v44_v14 = vpop.permute.xlu0 %43  }
  0x81   :  { %46 = vst.msk [vmem:[#allocation0] sm:$0x1] %vm45_vm7, %v44_v14  }
  0x88   :  { %v51_v15 = vld [vmem:[#allocation0] sm:$0x1] }
  0x89   :  { %54 = vst [vmem:[%s114_s1] sm:$0x1] %v51_v15 }

// kernel: tile.22
= control target key start
LH: loop header
LB: loop body
LE: loop exit
PB: predicated region body
PF: predicated region fallthrough
CT: control target
= control target key end

     0   :  { %s22_s0 = inlined_call_operand.vmem [shape: f32[4], index: 0, kind: input, shape index: {}]   ;;  %s23_s1 = inlined_call_operand.vmem [shape: f32[4,4], index: 1, kind: output, shape index: {}]  }
   0x1   :  { %v4_v0 = vld [vmem:[%s22_s0] ss:$0 sm:$0xff] }
   0x2   :  { %5 = vst [vmem:[%s23_s1] sm:$0xf] %v4_v0 }

// kernel: tile.23
= control target key start
LH: loop header
LB: loop body
LE: loop exit
PB: predicated region body
PF: predicated region fallthrough
CT: control target
= control target key end

     0   :  { %vm8_vm0 = vcmask 31744   ;;  %s40_s8 = smov 4   ;;  %s41_s9 = smov 8   ;;  %vm14_vm1 = vcmask 130144   ;;  %vm20_vm2 = vcmask 97344   ;;  %vm26_vm3 = vcmask 64544   ;;  %s58_s0 = inlined_call_operand.vmem [shape: f32[4,4], index: 0, kind: input, shape index: {}]   ;;  %s59_s1 = inlined_call_operand.vmem [shape: f32[1,16], index: 1, kind: output, shape index: {}]  }
   0x1   :  { %v5_v0 = vld [vmem:[%s58_s0] sm:$0xf]  ;;  %s39_s0 = smov 12  }
   0x2   :  { %6 = vst [vmem:[#allocation1] sm:$0xf] %v5_v0 }
   0x9   :  { %v11_v1 = vld [vmem:[#allocation1 + $0x3] sm:$0x1]   ;;  %v23_v2 = vld [vmem:[#allocation1 + $0x1] sm:$0x1]   ;;  %v7_v3 = vld [vmem:[#allocation1] sm:$0x1]  }
   0xa   :  { %12 = vrot.lane.b32.xlu0 %v11_v1, %s39_s0  ;;  %24 = vrot.lane.b32.xlu1 %v23_v2, %s40_s8  ;;  %v17_v4 = vld [vmem:[#allocation1 + $0x2] sm:$0x1]   ;;  %9 = vst.msk [vmem:[#allocation0] sm:$0x1] %vm8_vm0, %v7_v3  }
   0xe   :  { %18 = vrot.lane.b32.xlu0 %v17_v4, %s41_s9 }
  0x7c   :  { %v13_v5 = vpop.permute.xlu0 %12   ;;  %v25_v6 = vpop.permute.xlu1 %24  }
  0x7d   :  { %15 = vst.msk [vmem:[#allocation0] sm:$0x1] %vm14_vm1, %v13_v5  }
  0x80   :  { %v19_v7 = vpop.permute.xlu0 %18  }
  0x81   :  { %21 = vst.msk [vmem:[#allocation0] sm:$0x1] %vm20_vm2, %v19_v7  }
  0x82   :  { %27 = vst.msk [vmem:[#allocation0] sm:$0x1] %vm26_vm3, %v25_v6  }
  0x89   :  { %v32_v8 = vld [vmem:[#allocation0] sm:$0x1] }
  0x8a   :  { %35 = vst [vmem:[%s59_s1] sm:$0x1] %v32_v8 }

// kernel: _lambda_.1
= control target key start
LH: loop header
LB: loop body
LE: loop exit
PB: predicated region body
PF: predicated region fallthrough
CT: control target
= control target key end

     0   :  { %s10094_s27 = smov 0   ;;  %s13344_s0 = inlined_call_operand.vmem [shape: f32[2,324,36], index: 0, kind: input, shape index: {}]   ;;  %s13345_s1 = inlined_call_operand.vmem [shape: f32[9,36,64], index: 1, kind: input, shape index: {}]   ;;  %s13346_s2 = inlined_call_operand.vmem [shape: f32[1,64], index: 2, kind: input, shape index: {}]   ;;  %s13347_s3 = inlined_call_operand.vmem [shape: f32[100,286], index: 3, kind: input, shape index: {}]   ;;  %s13348_s4 = inlined_call_operand.vmem [shape: f32[64,40], index: 4, kind: input, shape index: {}]   ;;  %s13349_s5 = inlined_call_operand.vmem [shape: f32[9,40,32], index: 5, kind: input, shape index: {}]   ;;  %s13350_s6 = inlined_call_operand.vmem [shape: f32[1,32], index: 6, kind: input, shape index: {}]   ;;  %s13351_s7 = inlined_call_operand.vmem [shape: f32[36,78], index: 7, kind: input, shape index: {}]   ;;  %s13352_s8 = inlined_call_operand.vmem [shape: f32[32,24], index: 8, kind: input, shape index: {}]   ;;  %s13353_s9 = inlined_call_operand.vmem [shape: f32[9,24,16], index: 9, kind: input, shape index: {}]   ;;  %s13354_s10 = inlined_call_operand.vmem [shape: f32[1,16], index: 10, kind: input, shape index: {}]   ;;  %s13355_s11 = inlined_call_operand.vmem [shape: f32[22,16], index: 11, kind: input, shape index: {}]   ;;  %s13356_s12 = inlined_call_operand.<no memory space> [shape: f32[1,1], index: 12, kind: input, shape index: {}]   ;;  %s13357_s13 = inlined_call_operand.vmem [shape: f32[2,1,1], index: 13, kind: output, shape index: {}]  }
   0x1   :  { %v18_v0 = vstv %s13356_s12 }
   0x2   :  { %19 = vst [vmem:[#allocation2] sm:$0x1] %v18_v0 }
   0x3 LB: > { %s7498_s28 = sadd.s32 4294967295, %s10017_s27   ;;  %p7502_p0 = scmp.ge.s32.totalorder %s10017_s27, 1  ;;  %s10017_s27 = sphi %s10094_s27, %s25_s27  }
   0x4   : > { %p389_p1 = scmp.lt.s32.totalorder %s10017_s27, 3 }
   0x6   : > { %p390_p2 = pnand %p7502_p0, %p389_p1 }
   0x8   : > { %393 = sbr.rel (%p390_p2) target bundleno = 2152 (0x868), region = 72 }
   0xd   : > { %v7508_v1 = vld [vmem:[%s13345_s1 + $0x48] sm:$0xf]  ;;  %vm672_vm0 = vcmask 1043456   ;;  %v484_v2 = vld [vmem:[%s13345_s1 + $0x20] sm:$0xf]  ;;  %v483_v4 = vld [vmem:[%s13345_s1 + $0x18] sm:$0xff] }
   0xe   : > { %v7507_v3 = vld [vmem:[%s13345_s1 + $0x40] sm:$0xff]  ;;  %8848 = vmatprep.subr.msk.mxu0 %vm672_vm0, %v7508_v1  ;;  %8912 = vmatprep.subr.msk.mxu1 %vm672_vm0, %v484_v2  ;;  %p431_p3 = scmp.lt.s32.totalorder %s7498_s28, 1  ;;  %v7506_v5 = vld [vmem:[%s13345_s1 + $0x38] sm:$0xff]  ;;  %v482_v6 = vld [vmem:[%s13345_s1 + $0x10] sm:$0xff]  ;;  %vm527_vm1 = vcmask 1046528   ;;  %vm599_vm2 = vcmask 293888  }
   0xf   : > { %8849 = vmatpush3.msk.msra.mxu0 %vm672_vm0, %v7508_v1  ;;  %8913 = vmatpush3.msk.msra.mxu1 %vm672_vm0, %v484_v2  ;;  %v7505_v7 = vld [vmem:[%s13345_s1 + $0x30] sm:$0xff]  ;;  %v481_v8 = vld [vmem:[%s13345_s1 + $0x8] sm:$0xff]  ;;  %v480_v10 = vld [vmem:[%s13345_s1] sm:$0xff]  ;;  %vm1247_vm3 = vcmask 1045504   ;;  %vm1984_vm4 = vcmask 1044480   ;;  %vm3155_vm5 = vcmask 1042432  }
  0x10   : > { %8850 = vmatprep.subr.mxu0 %v7507_v3  ;;  %8914 = vmatprep.subr.mxu1 %v483_v4  ;;  %s13605_s28 = smov (!%p431_p3, %s7498_s28), 1  ;;  %v7504_v9 = vld [vmem:[%s13345_s1 + $0x28] sm:$0xff]  ;;  %v7587_v11 = vld [vmem:[%s13345_s1 + $0x70] sm:$0xf]  ;;  %v7629_v30 = vld [vmem:[%s13345_s1 + $0x98] sm:$0xf] }
  0x11   : > { %8851 = vmatpush3.msra.mxu0 %v7507_v3  ;;  %8915 = vmatpush3.msra.mxu1 %v483_v4  ;;  %s9965_s29 = smul.u32 328, %s13605_s28  ;;  %v7586_v29 = vld [vmem:[%s13345_s1 + $0x68] sm:$0xff]  ;;  %v7585_v37 = vld [vmem:[%s13345_s1 + $0x60] sm:$0xff]  ;;  %v7628_v38 = vld [vmem:[%s13345_s1 + $0x90] sm:$0xff]  ;;  %vm3591_vm6 = vcmask 1041408   ;;  %vm4147_vm7 = vcmask 523264  }
  0x12   : > { %8852 = vmatprep.subr.mxu0 %v7506_v5  ;;  %8916 = vmatprep.subr.mxu1 %v482_v6  ;;  %v7584_v45 = vld [vmem:[%s13345_s1 + $0x58] sm:$0xff]  ;;  %v7627_v46 = vld [vmem:[%s13345_s1 + $0x88] sm:$0xff]  ;;  %v7583_v53 = vld [vmem:[%s13345_s1 + $0x50] sm:$0xff]  ;;  %vm10020_vm8 = vmmov 0   ;;  %vm4501_vm9 = vcmask 244736   ;;  %vm4844_vm10 = vcmask 326656  }
  0x13   : > { %8853 = vmatpush3.msra.mxu0 %v7506_v5  ;;  %8917 = vmatpush3.msra.mxu1 %v482_v6  ;;  %s10142_s18 = scalar_lea.vmem %s13344_s0, %s9965_s29  ;;  %v7626_v54 = vld [vmem:[%s13345_s1 + $0x80] sm:$0xff]  ;;  %v7625_v2 = vld [vmem:[%s13345_s1 + $0x78] sm:$0xff]  ;;  %vm6284_vm11 = vcmask 261120   ;;  %vm6430_vm12 = vcmask 637952   ;;  %vm6554_vm13 = vcmask 195584   ;;  %vm6930_vm14 = vcmask 1040384   ;;  %s438_s29 = scalar_lea.vmem %s13357_s13, %s13605_s28 }
  0x14   : > { %8854 = vmatprep.subr.mxu0 %v7505_v7  ;;  %8918 = vmatprep.subr.mxu1 %v481_v8  ;;  %v10148_v12 = vld [vmem:[%s10142_s18] sm:$0xff]  ;;  %v10151_v13 = vld [vmem:[%s10142_s18 + $0x8] sm:$0xff]  ;;  %v10154_v14 = vld [vmem:[%s10142_s18 + $0x10] sm:$0xff]  ;;  %vm7427_vm15 = vcmask 130048  }
  0x15   : > { %8855 = vmatpush3.msra.mxu0 %v7505_v7  ;;  %8919 = vmatpush3.msra.mxu1 %v481_v8  ;;  %v528_v15 = vrot.slane %v10148_v12, 1  ;;  %v529_v16 = vrot.slane %v10151_v13, 1  ;;  %v531_v17 = vrot.slane %v10154_v14, 1  ;;  %v10160_v18 = vld [vmem:[%s10142_s18 + $0x18] sm:$0xff]  ;;  %v10163_v19 = vld [vmem:[%s10142_s18 + $0x20] sm:$0xff]  ;;  %v10166_v20 = vld [vmem:[%s10142_s18 + $0x28] sm:$0xff] }
  0x16   : > { %8856 = vmatprep.subr.mxu0 %v7504_v9  ;;  %8920 = vmatprep.subr.mxu1 %v480_v10  ;;  %v533_v21 = vrot.slane %v10160_v18, 1  ;;  %v535_v22 = vrot.slane %v10163_v19, 1  ;;  %v537_v25 = vrot.slane %v10166_v20, 1  ;;  %v10176_v26 = vld [vmem:[%s10142_s18 + $0x30] sm:$0xff]  ;;  %v10184_v28 = vld [vmem:[%s10142_s18 + $0x38] sm:$0xff]  ;;  %v10202_v35 = vld [vmem:[%s10142_s18 + $0x40] sm:$0xff] }
  0x17   : > { %8857 = vmatpush3.msra.mxu0 %v7504_v9  ;;  %8921 = vmatpush3.msra.mxu1 %v480_v10  ;;  %v530_v23 = vsel %vm527_vm1, %v528_v15, %v529_v16  ;;  %v532_v24 = vsel %vm527_vm1, %v529_v16, %v531_v17  ;;  %v539_v32 = vrot.slane %v10176_v26, 1  ;;  %v541_v34 = vrot.slane %v10184_v28, 1  ;;  %v10208_v36 = vld [vmem:[%s10142_s18 + $0x48] sm:$0xff]  ;;  %v10226_v43 = vld [vmem:[%s10142_s18 + $0x50] sm:$0xff]  ;;  %v10231_v44 = vld [vmem:[%s10142_s18 + $0x58] sm:$0xff] }
  0x18   : > { %8922 = vmatprep.mubr.msk.f32.mxu1 %vm599_vm2, %v10148_v12  ;;  %8976 = vmatprep.subr.msk.mxu0 %vm672_vm0, %v7587_v11  ;;  %v534_v27 = vsel %vm527_vm1, %v531_v17, %v533_v21  ;;  %v536_v31 = vsel %vm527_vm1, %v533_v21, %v535_v22  ;;  %v538_v33 = vsel %vm527_vm1, %v535_v22, %v537_v25  ;;  %v543_v40 = vrot.slane %v10202_v35, 1  ;;  %v10248_v51 = vld [vmem:[%s10142_s18 + $0x60] sm:$0xff]  ;;  %v10253_v52 = vld [vmem:[%s10142_s18 + $0x68] sm:$0xff]  ;;  %v10272_v61 = vld [vmem:[%s10142_s18 + $0x70] sm:$0xff] }
  0x19   : > { %8858 = vmatprep.mubr.msk.f32.mxu0 %vm599_vm2, %v530_v23  ;;  %8923 = vmatmul.mubr.msk.f32.vlgmr.msra.gmra.mxu1 %vm599_vm2, %v10151_v13  ;;  %v540_v39 = vsel %vm527_vm1, %v537_v25, %v539_v32  ;;  %v542_v41 = vsel %vm527_vm1, %v539_v32, %v541_v34  ;;  %v545_v42 = vrot.slane %v10208_v36, 1  ;;  %v547_v48 = vrot.slane %v10226_v43, 1  ;;  %v10279_v0 = vld [vmem:[%s10142_s18 + $0x78] sm:$0xff]  ;;  %v10290_v3 = vld [vmem:[%s13345_s1 + $0xc0] sm:$0xf]  ;;  %v10332_v21 = vld [vmem:[%s10142_s18 + $0x90] sm:$0xff] }
  0x1a   : > { %8859 = vmatmul.mubr.msk.f32.vlgmr.msra.gmra.mxu0 %vm599_vm2, %v532_v24  ;;  %8925 = vmatprep.mubr.msk.f32.mxu1 %vm599_vm2, %v10154_v14  ;;  %v544_v47 = vsel %vm527_vm1, %v541_v34, %v543_v40  ;;  %v549_v50 = vrot.slane %v10231_v44, 1  ;;  %v551_v56 = vrot.slane %v10248_v51, 1  ;;  %v1248_v57 = vrot.slane %v10148_v12, 2  ;;  %v10309_v10 = vld [vmem:[%s10142_s18 + $0x80] sm:$0xff]  ;;  %v10321_v12 = vld [vmem:[%s13345_s1 + $0xe8] sm:$0xf] }
  0x1b   : > { %8861 = vmatprep.mubr.msk.f32.mxu0 %vm599_vm2, %v534_v27  ;;  %8977 = vmatpush3.msk.msra.mxu0 %vm672_vm0, %v7587_v11  ;;  %v546_v49 = vsel %vm527_vm1, %v543_v40, %v545_v42  ;;  %v548_v55 = vsel %vm527_vm1, %v545_v42, %v547_v48  ;;  %v1249_v58 = vrot.slane %v10151_v13, 2  ;;  %v553_v60 = vrot.slane %v10253_v52, 1  ;;  %v10316_v11 = vld [vmem:[%s10142_s18 + $0x88] sm:$0xff]  ;;  %v10339_v22 = vld [vmem:[%s10142_s18 + $0x98] sm:$0xff] }
  0x1c   : > { %8978 = vmatprep.subr.mxu0 %v7586_v29  ;;  %9040 = vmatprep.subr.msk.mxu1 %vm672_vm0, %v7629_v30  ;;  %v550_v59 = vsel %vm527_vm1, %v547_v48, %v549_v50  ;;  %v1251_v62 = vrot.slane %v10154_v14, 2  ;;  %v1253_v63 = vrot.slane %v10160_v18, 2  ;;  %v552_v6 = vsel %vm527_vm1, %v549_v50, %v551_v56  ;;  %v10391_v50 = vld [vmem:[%s10142_s18 + $0xc8] sm:$0xff] }
  0x1d   : > { %8926 = vmatmul.mubr.msk.f32.gmra.mxu1 %vm599_vm2, %v10160_v18  ;;  %8979 = vmatpush3.msra.mxu0 %v7586_v29  ;;  %v10282_v1 = vsel %vm1247_vm3, %v1248_v57, %v1249_v58  ;;  %v555_v7 = vrot.slane %v10272_v61, 1  ;;  %v554_v8 = vsel %vm527_vm1, %v551_v56, %v553_v60  ;;  %v557_v9 = vrot.slane %v10279_v0, 1  ;;  %v10350_v29 = vld [vmem:[%s10142_s18 + $0xa0] sm:$0xff] }
  0x1e   : > { %8862 = vmatmul.mubr.msk.f32.gmra.mxu0 %vm599_vm2, %v536_v31  ;;  %8928 = vmatprep.mubr.msk.f32.mxu1 %vm599_vm2, %v10163_v19  ;;  %v10296_v4 = vsel %vm1247_vm3, %v1249_v58, %v1251_v62  ;;  %v10301_v5 = vsel %vm1247_vm3, %v1251_v62, %v1253_v63  ;;  %v559_v15 = vrot.slane %v10309_v10, 1  ;;  %v561_v17 = vrot.slane %v10316_v11, 1  ;;  %v10412_v58 = vld [vmem:[%s10142_s18 + $0xd0] sm:$0xff] }
  0x1f   : > { %8864 = vmatprep.mubr.msk.f32.mxu0 %vm599_vm2, %v538_v33  ;;  %9041 = vmatpush3.msk.msra.mxu1 %vm672_vm0, %v7629_v30  ;;  %v556_v13 = vsel %vm527_vm1, %v553_v60, %v555_v7  ;;  %v558_v16 = vsel %vm527_vm1, %v555_v7, %v557_v9  ;;  %v563_v24 = vrot.slane %v10332_v21, 1  ;;  %v565_v27 = vrot.slane %v10339_v22, 1  ;;  %v10355_v30 = vld [vmem:[%s10142_s18 + $0xa8] sm:$0xff]  ;;  %v10428_v7 = vld [vmem:[%s10142_s18 + $0xe0] sm:$0xff] }
  0x20   : > { %8980 = vmatprep.subr.mxu0 %v7585_v37  ;;  %9042 = vmatprep.subr.mxu1 %v7628_v38  ;;  %v560_v23 = vsel %vm527_vm1, %v557_v9, %v559_v15  ;;  %v562_v25 = vsel %vm527_vm1, %v559_v15, %v561_v17  ;;  %v567_v32 = vrot.slane %v10350_v29, 1  ;;  %v569_v34 = vrot.slane %v10355_v30, 1 }
  0x21   : > { %8929 = vmatmul.mubr.msk.f32.gmra.mxu1 %vm599_vm2, %v10166_v20  ;;  %8981 = vmatpush3.msra.mxu0 %v7585_v37  ;;  %v564_v31 = vsel %vm527_vm1, %v561_v17, %v563_v24  ;;  %v566_v33 = vsel %vm527_vm1, %v563_v24, %v565_v27  ;;  %v10366_v37 = vld [vmem:[%s10142_s18 + $0xb0] sm:$0xff]  ;;  %v1986_v42 = vrot.slane %v10160_v18, 3  ;;  %v2420_v48 = vrot.slane %v10154_v14, 4 }
  0x22   : > { %8865 = vmatmul.mubr.msk.f32.gmra.mxu0 %vm599_vm2, %v540_v39  ;;  %8931 = vmatprep.mubr.msk.f32.mxu1 %vm599_vm2, %v10176_v26  ;;  %v1985_v39 = vrot.slane %v10154_v14, 3  ;;  %v568_v40 = vsel %vm527_vm1, %v565_v27, %v567_v32  ;;  %v577_v57 = vrot.slane %v10391_v50, 1  ;;  %v579_v62 = vrot.slane %v10412_v58, 1  ;;  %v10444_v17 = vld [vmem:[%s10142_s18 + $0xf0] sm:$0xff] }
  0x23   : > { %8867 = vmatprep.mubr.msk.f32.mxu0 %vm599_vm2, %v542_v41  ;;  %9043 = vmatpush3.msra.mxu1 %v7628_v38  ;;  %v10371_v38 = vld [vmem:[%s10142_s18 + $0xb8] sm:$0xff]  ;;  %v571_v41 = vrot.slane %v10366_v37, 1 }
  0x24   : > { %8982 = vmatprep.subr.mxu0 %v7584_v45  ;;  %9044 = vmatprep.subr.mxu1 %v7627_v46  ;;  %v580_v9 = vsel %vm527_vm1, %v577_v57, %v579_v62 }
  0x25   : > { %8932 = vmatmul.mubr.msk.f32.gmra.mxu1 %vm599_vm2, %v10184_v28  ;;  %8983 = vmatpush3.msra.mxu0 %v7584_v45  ;;  %v570_v45 = vsel %vm527_vm1, %v567_v32, %v569_v34  ;;  %v10460_v32 = vld [vmem:[%s10142_s18 + $0x100] sm:$0xff] }
  0x26   : > { %8868 = vmatmul.mubr.msk.f32.gmra.mxu0 %vm599_vm2, %v544_v47  ;;  %8934 = vmatprep.mubr.msk.f32.mxu1 %vm599_vm2, %v10202_v35  ;;  %v10384_v47 = vld [vmem:[%s10142_s18 + $0xc0] sm:$0xff] }
  0x27   : > { %8870 = vmatprep.mubr.msk.f32.mxu0 %vm599_vm2, %v546_v49  ;;  %9045 = vmatpush3.msra.mxu1 %v7627_v46  ;;  %v573_v46 = vrot.slane %v10371_v38, 1  ;;  %v2421_v49 = vrot.slane %v10160_v18, 4 }
  0x28   : > { %8984 = vmatprep.subr.mxu0 %v7583_v53  ;;  %9046 = vmatprep.subr.mxu1 %v7626_v54 }
  0x29   : > { %8935 = vmatmul.mubr.msk.f32.gmra.mxu1 %vm599_vm2, %v10208_v36  ;;  %8985 = vmatpush3.msra.mxu0 %v7583_v53  ;;  %v10396_v53 = vsel %vm1984_vm4, %v1985_v39, %v1986_v42  ;;  %v10404_v14 = vsel %vm672_vm0, %v2420_v48, %v2421_v49  ;;  %v574_v56 = vsel %vm527_vm1, %v571_v41, %v573_v46  ;;  %v591_v39 = vrot.slane %v10460_v32, 1 }
  0x2a   : > { %8871 = vmatmul.mubr.msk.f32.gmra.mxu0 %vm599_vm2, %v548_v55  ;;  %8937 = vmatprep.mubr.msk.f32.mxu1 %vm599_vm2, %v10226_v43  ;;  %v575_v55 = vrot.slane %v10384_v47, 1 }
  0x2b   : > { %8873 = vmatprep.mubr.msk.f32.mxu0 %vm599_vm2, %v550_v59  ;;  %9047 = vmatpush3.msra.mxu1 %v7626_v54  ;;  %v572_v54 = vsel %vm527_vm1, %v569_v34, %v571_v41  ;;  %v10417_v59 = vld [vmem:[%s10142_s18 + $0xd8] sm:$0xff] }
  0x2c   : > { %9048 = vmatprep.subr.mxu1 %v7625_v2  ;;  %9104 = vmatprep.subr.msk.mxu0 %vm672_vm0, %v10290_v3  ;;  %v576_v60 = vsel %vm527_vm1, %v573_v46, %v575_v55  ;;  %v10481_v46 = vld [vmem:[%s10142_s18 + $0x118] sm:$0xff] }
  0x2d   : > { %8938 = vmatmul.mubr.msk.f32.gmra.mxu1 %vm599_vm2, %v10231_v44 }
  0x2e   : > { %8874 = vmatmul.mubr.msk.f32.gmra.mxu0 %vm599_vm2, %v552_v6  ;;  %8940 = vmatprep.mubr.msk.f32.mxu1 %vm599_vm2, %v10248_v51  ;;  %v581_v6 = vrot.slane %v10417_v59, 1 }
  0x2f   : > { %8876 = vmatprep.mubr.msk.f32.mxu0 %vm599_vm2, %v554_v8  ;;  %9049 = vmatpush3.msra.mxu1 %v7625_v2  ;;  %v578_v2 = vsel %vm527_vm1, %v575_v55, %v577_v57  ;;  %v10433_v8 = vld [vmem:[%s10142_s18 + $0xe8] sm:$0xff] }
  0x30   : > { %9168 = vmatprep.subr.msk.mxu1 %vm672_vm0, %v10321_v12  ;;  %v582_v15 = vsel %vm527_vm1, %v579_v62, %v581_v6  ;;  %v1255_v62 = vrot.slane %v10163_v19, 2 }
  0x31   : > { %8941 = vmatmul.mubr.msk.f32.gmra.mxu1 %vm599_vm2, %v10253_v52 }
  0x32   : > { %8877 = vmatmul.mubr.msk.f32.gmra.mxu0 %vm599_vm2, %v556_v13  ;;  %8943 = vmatprep.mubr.msk.f32.mxu1 %vm599_vm2, %v10272_v61  ;;  %v583_v13 = vrot.slane %v10428_v7, 1 }
  0x33   : > { %8879 = vmatprep.mubr.msk.f32.mxu0 %vm599_vm2, %v558_v16  ;;  %v585_v16 = vrot.slane %v10433_v8, 1 }
  0x34   : > { %v584_v24 = vsel %vm527_vm1, %v581_v6, %v583_v13  ;;  %v1256_v6 = vsel %vm1247_vm3, %v1253_v63, %v1255_v62 }
  0x35   : > { %8944 = vmatmul.mubr.msk.f32.gmra.mxu1 %vm599_vm2, %v10279_v0  ;;  %v586_v27 = vsel %vm527_vm1, %v583_v13, %v585_v16 }
  0x36   : > { %8880 = vmatmul.mubr.msk.f32.gmra.mxu0 %vm599_vm2, %v560_v23  ;;  %8946 = vmatprep.mubr.msk.f32.mxu1 %vm599_vm2, %v10309_v10  ;;  %v10449_v23 = vld [vmem:[%s10142_s18 + $0xf8] sm:$0xff] }
  0x37   : > { %8882 = vmatprep.mubr.msk.f32.mxu0 %vm599_vm2, %v562_v25  ;;  %v587_v25 = vrot.slane %v10444_v17, 1 }
  0x39   : > { %8947 = vmatmul.mubr.msk.f32.gmra.mxu1 %vm599_vm2, %v10316_v11  ;;  %v588_v34 = vsel %vm527_vm1, %v585_v16, %v587_v25  ;;  %v7670_v16 = vld [vmem:[%s13345_s1 + $0xb8] sm:$0xff] }
  0x3a   : > { %8883 = vmatmul.mubr.msk.f32.gmra.mxu0 %vm599_vm2, %v564_v31  ;;  %8949 = vmatprep.mubr.msk.f32.mxu1 %vm599_vm2, %v10332_v21  ;;  %v589_v31 = vrot.slane %v10449_v23, 1 }
  0x3b   : > { %8885 = vmatprep.mubr.msk.f32.mxu0 %vm599_vm2, %v566_v33  ;;  %v10465_v33 = vld [vmem:[%s10142_s18 + $0x108] sm:$0xff] }
  0x3c   : > { %v593_v41 = vrot.slane %v10465_v33, 1  ;;  %v592_v48 = vsel %vm527_vm1, %v589_v31, %v591_v39 }
  0x3d   : > { %8950 = vmatmul.mubr.msk.f32.gmra.mxu1 %vm599_vm2, %v10339_v22 }
  0x3e   : > { %8886 = vmatmul.mubr.msk.f32.gmra.mxu0 %vm599_vm2, %v568_v40  ;;  %8952 = vmatprep.mubr.msk.f32.mxu1 %vm599_vm2, %v10350_v29  ;;  %v590_v40 = vsel %vm527_vm1, %v587_v25, %v589_v31  ;;  %v594_v55 = vsel %vm527_vm1, %v591_v39, %v593_v41  ;;  %v1265_v25 = vrot.slane %v10208_v36, 2  ;;  %v7711_v39 = vld [vmem:[%s13345_s1 + $0xd8] sm:$0xff] }
  0x3f   : > { %8888 = vmatprep.mubr.msk.f32.mxu0 %vm599_vm2, %v570_v45  ;;  %v10476_v45 = vld [vmem:[%s10142_s18 + $0x110] sm:$0xff] }
  0x41   : > { %8953 = vmatmul.mubr.msk.f32.gmra.mxu1 %vm599_vm2, %v10355_v30 }
  0x42   : > { %8889 = vmatmul.mubr.msk.f32.gmra.mxu0 %vm599_vm2, %v572_v54  ;;  %8955 = vmatprep.mubr.msk.f32.mxu1 %vm599_vm2, %v10366_v37  ;;  %v595_v54 = vrot.slane %v10476_v45, 1 }
  0x43   : > { %8891 = vmatprep.mubr.msk.f32.mxu0 %vm599_vm2, %v574_v56  ;;  %v597_v56 = vrot.slane %v10481_v46, 1 }
  0x44   : > { %v596_v57 = vsel %vm527_vm1, %v593_v41, %v595_v54  ;;  %v1271_v41 = vrot.slane %v10248_v51, 2 }
  0x45   : > { %8956 = vmatmul.mubr.msk.f32.gmra.mxu1 %vm599_vm2, %v10371_v38 }
  0x46   : > { %8892 = vmatmul.mubr.msk.f32.gmra.mxu0 %vm599_vm2, %v576_v60  ;;  %8958 = vmatprep.mubr.msk.f32.mxu1 %vm599_vm2, %v10384_v47  ;;  %v598_v60 = vsel %vm527_vm1, %v595_v54, %v597_v56 }
  0x47   : > { %8894 = vmatprep.mubr.msk.f32.mxu0 %vm599_vm2, %v578_v2  ;;  %v1257_v2 = vrot.slane %v10166_v20, 2 }
  0x49   : > { %8959 = vmatmul.mubr.msk.f32.gmra.mxu1 %vm599_vm2, %v10391_v50  ;;  %v1258_v13 = vsel %vm1247_vm3, %v1255_v62, %v1257_v2  ;;  %v10579_v62 = vld [vmem:[%s13345_s1 + $0x110] sm:$0xf] }
  0x4a   : > { %8895 = vmatmul.mubr.msk.f32.gmra.mxu0 %vm599_vm2, %v580_v9  ;;  %8961 = vmatprep.mubr.msk.f32.mxu1 %vm599_vm2, %v10412_v58  ;;  %v1259_v9 = vrot.slane %v10176_v26, 2 }
  0x4b   : > { %8897 = vmatprep.mubr.msk.f32.mxu0 %vm599_vm2, %v582_v15  ;;  %v1261_v15 = vrot.slane %v10184_v28, 2 }
  0x4c   : > { %v1260_v63 = vsel %vm1247_vm3, %v1257_v2, %v1259_v9 }
  0x4d   : > { %8962 = vmatmul.mubr.msk.f32.gmra.mxu1 %vm599_vm2, %v10417_v59 }
  0x4e   : > { %8898 = vmatmul.mubr.msk.f32.gmra.mxu0 %vm599_vm2, %v584_v24  ;;  %8964 = vmatprep.mubr.msk.f32.mxu1 %vm599_vm2, %v10428_v7  ;;  %v1263_v24 = vrot.slane %v10202_v35, 2 }
  0x4f   : > { %8900 = vmatprep.mubr.msk.f32.mxu0 %vm599_vm2, %v586_v27  ;;  %v1267_v27 = vrot.slane %v10226_v43, 2 }
  0x50   : > { %v1266_v31 = vsel %vm1247_vm3, %v1263_v24, %v1265_v25 }
  0x51   : > { %8965 = vmatmul.mubr.msk.f32.gmra.mxu1 %vm599_vm2, %v10433_v8 }
  0x52   : > { %8901 = vmatmul.mubr.msk.f32.gmra.mxu0 %vm599_vm2, %v588_v34  ;;  %8967 = vmatprep.mubr.msk.f32.mxu1 %vm599_vm2, %v10444_v17  ;;  %v1269_v34 = vrot.slane %v10231_v44, 2 }
  0x53   : > { %8903 = vmatprep.mubr.msk.f32.mxu0 %vm599_vm2, %v590_v40  ;;  %v1268_v40 = vsel %vm1247_vm3, %v1265_v25, %v1267_v27  ;;  %v1283_v25 = vrot.slane %v10332_v21, 2 }
  0x54   : > { %v1270_v54 = vsel %vm1247_vm3, %v1267_v27, %v1269_v34  ;;  %v1287_v27 = vrot.slane %v10350_v29, 2 }
  0x55   : > { %8968 = vmatmul.mubr.msk.f32.gmra.mxu1 %vm599_vm2, %v10449_v23 }
  0x56   : > { %8904 = vmatmul.mubr.msk.f32.gmra.mxu0 %vm599_vm2, %v592_v48  ;;  %8970 = vmatprep.mubr.msk.f32.mxu1 %vm599_vm2, %v10460_v32  ;;  %v7667_v48 = vld [vmem:[%s13345_s1 + $0xa0] sm:$0xff] }
  0x57   : > { %8906 = vmatprep.mubr.msk.f32.mxu0 %vm599_vm2, %v594_v55  ;;  %v1273_v55 = vrot.slane %v10253_v52, 2 }
  0x59   : > { %8971 = vmatmul.mubr.msk.f32.gmra.mxu1 %vm599_vm2, %v10465_v33  ;;  %v1274_v2 = vsel %vm1247_vm3, %v1271_v41, %v1273_v55 }
  0x5a   : > { %8907 = vmatmul.mubr.msk.f32.gmra.mxu0 %vm599_vm2, %v596_v57  ;;  %8973 = vmatprep.mubr.msk.f32.mxu1 %vm599_vm2, %v10476_v45  ;;  %v1272_v57 = vsel %vm1247_vm3, %v1269_v34, %v1271_v41  ;;  %v1293_v41 = vrot.slane %v10371_v38, 2 }
  0x5b   : > { %8909 = vmatprep.mubr.msk.f32.mxu0 %vm599_vm2, %v598_v60  ;;  %v1275_v60 = vrot.slane %v10272_v61, 2 }
  0x5d   : > { %8974 = vmatmul.mubr.msk.f32.gmra.mxu1 %vm599_vm2, %v10481_v46 }
  0x5e   : > { %8910 = vmatmul.mubr.msk.f32.gmra.mxu0 %vm599_vm2, %v597_v56  ;;  %9050 = vmatprep.mubr.msk.f32.mxu1 %vm599_vm2, %v10301_v5  ;;  %v7710_v56 = vld [vmem:[%s13345_s1 + $0xd0] sm:$0xff] }
  0x5f   : > { %8986 = vmatprep.mubr.msk.f32.mxu0 %vm599_vm2, %v10282_v1  ;;  %v1262_v1 = vsel %vm1247_vm3, %v1259_v9, %v1261_v15  ;;  %v7709_v9 = vld [vmem:[%s13345_s1 + $0xc8] sm:$0xff] }
  0x61   : > { %9051 = vmatmul.mubr.msk.f32.vlgmr.msra.gmra.mxu1 %vm599_vm2, %v1256_v6 }
  0x62   : > { %8987 = vmatmul.mubr.msk.f32.vlgmr.msra.gmra.mxu0 %vm599_vm2, %v10296_v4  ;;  %9053 = vmatprep.mubr.msk.f32.mxu1 %vm599_vm2, %v1258_v13  ;;  %v7669_v4 = vld [vmem:[%s13345_s1 + $0xb0] sm:$0xff] }
  0x63   : > { %8989 = vmatprep.mubr.msk.f32.mxu0 %vm599_vm2, %v10301_v5  ;;  %9105 = vmatpush3.msk.msra.mxu0 %vm672_vm0, %v10290_v3  ;;  %v7712_v5 = vld [vmem:[%s13345_s1 + $0xe0] sm:$0xff]  ;;  %v1264_v3 = vsel %vm1247_vm3, %v1261_v15, %v1263_v24  ;;  %v1279_v15 = vrot.slane %v10309_v10, 2  ;;  %v10601_v24 = vld [vmem:[%s13345_s1 + $0x138] sm:$0xf] }
  0x64   : > { %9106 = vmatprep.subr.mxu0 %v7670_v16  ;;  %9169 = vmatpush3.msk.msra.mxu1 %vm672_vm0, %v10321_v12  ;;  %v7668_v12 = vld [vmem:[%s13345_s1 + $0xa8] sm:$0xff] }
  0x65   : > { %9054 = vmatmul.mubr.msk.f32.gmra.mxu1 %vm599_vm2, %v1260_v63  ;;  %9107 = vmatpush3.msra.mxu0 %v7670_v16 }
  0x66   : > { %8990 = vmatmul.mubr.msk.f32.gmra.mxu0 %vm599_vm2, %v1256_v6  ;;  %9056 = vmatprep.mubr.msk.f32.mxu1 %vm599_vm2, %v1262_v1  ;;  %v1277_v6 = vrot.slane %v10279_v0, 2 }
  0x67   : > { %8992 = vmatprep.mubr.msk.f32.mxu0 %vm599_vm2, %v1258_v13  ;;  %9108 = vmatprep.subr.mxu0 %v7669_v4  ;;  %v1276_v13 = vsel %vm1247_vm3, %v1273_v55, %v1275_v60 }
  0x68   : > { %9170 = vmatprep.subr.mxu1 %v7712_v5  ;;  %9109 = vmatpush3.msra.mxu0 %v7669_v4  ;;  %v1278_v16 = vsel %vm1247_vm3, %v1275_v60, %v1277_v6  ;;  %v1299_v60 = vrot.slane %v10412_v58, 2 }
  0x69   : > { %9057 = vmatmul.mubr.msk.f32.gmra.mxu1 %vm599_vm2, %v1264_v3  ;;  %9110 = vmatprep.subr.mxu0 %v7668_v12 }
  0x6a   : > { %8993 = vmatmul.mubr.msk.f32.gmra.mxu0 %vm599_vm2, %v1260_v63  ;;  %9059 = vmatprep.mubr.msk.f32.mxu1 %vm599_vm2, %v1266_v31  ;;  %v1281_v63 = vrot.slane %v10316_v11, 2 }
  0x6b   : > { %8995 = vmatprep.mubr.msk.f32.mxu0 %vm599_vm2, %v1262_v1  ;;  %9171 = vmatpush3.msra.mxu1 %v7712_v5  ;;  %v1280_v1 = vsel %vm1247_vm3, %v1277_v6, %v1279_v15  ;;  %v1285_v5 = vrot.slane %v10339_v22, 2  ;;  %v1301_v6 = vrot.slane %v10417_v59, 2 }
  0x6c   : > { %9172 = vmatprep.subr.mxu1 %v7711_v39  ;;  %9111 = vmatpush3.msra.mxu0 %v7668_v12  ;;  %v1282_v4 = vsel %vm1247_vm3, %v1279_v15, %v1281_v63 }
  0x6d   : > { %9060 = vmatmul.mubr.msk.f32.gmra.mxu1 %vm599_vm2, %v1268_v40  ;;  %9112 = vmatprep.subr.mxu0 %v7667_v48  ;;  %v1286_v12 = vsel %vm1247_vm3, %v1283_v25, %v1285_v5  ;;  %v1288_v34 = vsel %vm1247_vm3, %v1285_v5, %v1287_v27  ;;  %v1302_v15 = vsel %vm1247_vm3, %v1299_v60, %v1301_v6 }
  0x6e   : > { %8996 = vmatmul.mubr.msk.f32.gmra.mxu0 %vm599_vm2, %v1264_v3  ;;  %9062 = vmatprep.mubr.msk.f32.mxu1 %vm599_vm2, %v1270_v54  ;;  %v1284_v3 = vsel %vm1247_vm3, %v1281_v63, %v1283_v25 }
  0x6f   : > { %8998 = vmatprep.mubr.msk.f32.mxu0 %vm599_vm2, %v1266_v31  ;;  %9173 = vmatpush3.msra.mxu1 %v7711_v39  ;;  %v1289_v31 = vrot.slane %v10355_v30, 2  ;;  %v1291_v39 = vrot.slane %v10366_v37, 2 }
  0x70   : > { %9174 = vmatprep.subr.mxu1 %v7710_v56  ;;  %9113 = vmatpush3.msra.mxu0 %v7667_v48 }
  0x71   : > { %9063 = vmatmul.mubr.msk.f32.gmra.mxu1 %vm599_vm2, %v1272_v57  ;;  %9232 = vmatprep.subr.msk.mxu0 %vm672_vm0, %v10579_v62  ;;  %v1292_v48 = vsel %vm1247_vm3, %v1289_v31, %v1291_v39  ;;  %v1294_v55 = vsel %vm1247_vm3, %v1291_v39, %v1293_v41 }
  0x72   : > { %8999 = vmatmul.mubr.msk.f32.gmra.mxu0 %vm599_vm2, %v1268_v40  ;;  %9065 = vmatprep.mubr.msk.f32.mxu1 %vm599_vm2, %v1274_v2  ;;  %v1290_v40 = vsel %vm1247_vm3, %v1287_v27, %v1289_v31 }
  0x73   : > { %9001 = vmatprep.mubr.msk.f32.mxu0 %vm599_vm2, %v1270_v54  ;;  %9175 = vmatpush3.msra.mxu1 %v7710_v56  ;;  %v1295_v54 = vrot.slane %v10384_v47, 2  ;;  %v1297_v56 = vrot.slane %v10391_v50, 2 }
  0x74   : > { %9176 = vmatprep.subr.mxu1 %v7709_v9 }
  0x75   : > { %9066 = vmatmul.mubr.msk.f32.gmra.mxu1 %vm599_vm2, %v1276_v13 }
  0x76   : > { %9002 = vmatmul.mubr.msk.f32.gmra.mxu0 %vm599_vm2, %v1272_v57  ;;  %9068 = vmatprep.mubr.msk.f32.mxu1 %vm599_vm2, %v1278_v16  ;;  %v1296_v57 = vsel %vm1247_vm3, %v1293_v41, %v1295_v54  ;;  %v10677_v41 = vld [vmem:[%s10142_s18 + $0x120] sm:$0xff] }
  0x77   : > { %9004 = vmatprep.mubr.msk.f32.mxu0 %vm599_vm2, %v1274_v2  ;;  %9177 = vmatpush3.msra.mxu1 %v7709_v9  ;;  %v1298_v2 = vsel %vm1247_vm3, %v1295_v54, %v1297_v56  ;;  %v1300_v9 = vsel %vm1247_vm3, %v1297_v56, %v1299_v60 }
  0x78   : > { %9296 = vmatprep.subr.msk.mxu1 %vm672_vm0, %v10601_v24 }
  0x79   : > { %9069 = vmatmul.mubr.msk.f32.gmra.mxu1 %vm599_vm2, %v1280_v1 }
  0x7a   : > { %9005 = vmatmul.mubr.msk.f32.gmra.mxu0 %vm599_vm2, %v1276_v13  ;;  %9071 = vmatprep.mubr.msk.f32.mxu1 %vm599_vm2, %v1282_v4  ;;  %v1303_v13 = vrot.slane %v10428_v7, 2 }
  0x7b   : > { %9007 = vmatprep.mubr.msk.f32.mxu0 %vm599_vm2, %v1278_v16  ;;  %v1305_v16 = vrot.slane %v10433_v8, 2 }
  0x7c   : > { %v1304_v63 = vsel %vm1247_vm3, %v1301_v6, %v1303_v13  ;;  %v2423_v6 = vrot.slane %v10163_v19, 4 }
  0x7d   : > { %9072 = vmatmul.mubr.msk.f32.gmra.mxu1 %vm599_vm2, %v1284_v3  ;;  %v1306_v25 = vsel %vm1247_vm3, %v1303_v13, %v1305_v16  ;;  %v2425_v13 = vrot.slane %v10166_v20, 4 }
  0x7e   : > { %9008 = vmatmul.mubr.msk.f32.gmra.mxu0 %vm599_vm2, %v1280_v1  ;;  %9074 = vmatprep.mubr.msk.f32.mxu1 %vm599_vm2, %v1286_v12  ;;  %v1307_v1 = vrot.slane %v10444_v17, 2 }
  0x7f   : > { %9010 = vmatprep.mubr.msk.f32.mxu0 %vm599_vm2, %v1282_v4  ;;  %v1309_v4 = vrot.slane %v10449_v23, 2 }
  0x80   : > { %v1308_v5 = vsel %vm1247_vm3, %v1305_v16, %v1307_v1  ;;  %v2424_v16 = vsel %vm672_vm0, %v2421_v49, %v2423_v6  ;;  %v1994_v49 = vrot.slane %v10184_v28, 3 }
  0x81   : > { %9075 = vmatmul.mubr.msk.f32.gmra.mxu1 %vm599_vm2, %v1288_v34  ;;  %v1310_v27 = vsel %vm1247_vm3, %v1307_v1, %v1309_v4  ;;  %v10719_v1 = vsel %vm672_vm0, %v2423_v6, %v2425_v13 }
  0x82   : > { %9011 = vmatmul.mubr.msk.f32.gmra.mxu0 %vm599_vm2, %v1284_v3  ;;  %9077 = vmatprep.mubr.msk.f32.mxu1 %vm599_vm2, %v1290_v40  ;;  %v1311_v3 = vrot.slane %v10460_v32, 2 }
  0x83   : > { %9013 = vmatprep.mubr.msk.f32.mxu0 %vm599_vm2, %v1286_v12  ;;  %v1313_v12 = vrot.slane %v10465_v33, 2 }
  0x84   : > { %v1312_v31 = vsel %vm1247_vm3, %v1309_v4, %v1311_v3 }
  0x85   : > { %9078 = vmatmul.mubr.msk.f32.gmra.mxu1 %vm599_vm2, %v1292_v48  ;;  %v1314_v39 = vsel %vm1247_vm3, %v1311_v3, %v1313_v12 }
  0x86   : > { %9014 = vmatmul.mubr.msk.f32.gmra.mxu0 %vm599_vm2, %v1288_v34  ;;  %9080 = vmatprep.mubr.msk.f32.mxu1 %vm599_vm2, %v1294_v55  ;;  %v1315_v34 = vrot.slane %v10476_v45, 2 }
  0x87   : > { %9016 = vmatprep.mubr.msk.f32.mxu0 %vm599_vm2, %v1290_v40  ;;  %v1317_v40 = vrot.slane %v10481_v46, 2 }
  0x88   : > { %v1316_v54 = vsel %vm1247_vm3, %v1313_v12, %v1315_v34  ;;  %v7752_v12 = vld [vmem:[%s13345_s1 + $0xf8] sm:$0xff] }
  0x89   : > { %9081 = vmatmul.mubr.msk.f32.gmra.mxu1 %vm599_vm2, %v1296_v57  ;;  %v1318_v56 = vsel %vm1247_vm3, %v1315_v34, %v1317_v40  ;;  %v2000_v34 = vrot.slane %v10226_v43, 3 }
  0x8a   : > { %9017 = vmatmul.mubr.msk.f32.gmra.mxu0 %vm599_vm2, %v1292_v48  ;;  %9083 = vmatprep.mubr.msk.f32.mxu1 %vm599_vm2, %v1298_v2  ;;  %v10680_v48 = vld [vmem:[%s10142_s18 + $0x128] sm:$0xff] }
  0x8b   : > { %9019 = vmatprep.mubr.msk.f32.mxu0 %vm599_vm2, %v1294_v55  ;;  %v1683_v55 = vrot.slane %v10677_v41, 2 }
  0x8d   : > { %9084 = vmatmul.mubr.msk.f32.gmra.mxu1 %vm599_vm2, %v1300_v9  ;;  %v1684_v60 = vsel %vm1247_vm3, %v1317_v40, %v1683_v55 }
  0x8e   : > { %9020 = vmatmul.mubr.msk.f32.gmra.mxu0 %vm599_vm2, %v1296_v57  ;;  %9086 = vmatprep.mubr.msk.f32.mxu1 %vm599_vm2, %v1302_v15  ;;  %v1685_v57 = vrot.slane %v10680_v48, 2 }
  0x8f   : > { %9022 = vmatprep.mubr.msk.f32.mxu0 %vm599_vm2, %v1298_v2 }
  0x90   : > { %v1686_v2 = vsel %vm1247_vm3, %v1683_v55, %v1685_v57  ;;  %v2002_v55 = vrot.slane %v10231_v44, 3 }
  0x91   : > { %9087 = vmatmul.mubr.msk.f32.gmra.mxu1 %vm599_vm2, %v1304_v63 }
  0x92   : > { %9023 = vmatmul.mubr.msk.f32.gmra.mxu0 %vm599_vm2, %v1300_v9  ;;  %9089 = vmatprep.mubr.msk.f32.mxu1 %vm599_vm2, %v1306_v25  ;;  %v1988_v9 = vrot.slane %v10163_v19, 3 }
  0x93   : > { %9025 = vmatprep.mubr.msk.f32.mxu0 %vm599_vm2, %v1302_v15  ;;  %v1990_v15 = vrot.slane %v10166_v20, 3  ;;  %v1992_v20 = vrot.slane %v10176_v26, 3 }
  0x94   : > { %v1989_v19 = vsel %vm1984_vm4, %v1986_v42, %v1988_v9  ;;  %v1996_v42 = vrot.slane %v10202_v35, 3 }
  0x95   : > { %9090 = vmatmul.mubr.msk.f32.gmra.mxu1 %vm599_vm2, %v1308_v5  ;;  %v1995_v3 = vsel %vm1984_vm4, %v1992_v20, %v1994_v49 }
  0x96   : > { %9026 = vmatmul.mubr.msk.f32.gmra.mxu0 %vm599_vm2, %v1304_v63  ;;  %9092 = vmatprep.mubr.msk.f32.mxu1 %vm599_vm2, %v1310_v27  ;;  %v2427_v63 = vrot.slane %v10176_v26, 4  ;;  %v2431_v26 = vrot.slane %v10202_v35, 4  ;;  %v7753_v35 = vld [vmem:[%s13345_s1 + $0x100] sm:$0xff] }
  0x97   : > { %9028 = vmatprep.mubr.msk.f32.mxu0 %vm599_vm2, %v1306_v25  ;;  %v1991_v25 = vsel %vm1984_vm4, %v1988_v9, %v1990_v15  ;;  %v2441_v9 = vrot.slane %v10253_v52, 4 }
  0x98   : > { %v10732_v18 = vsel %vm672_vm0, %v2425_v13, %v2427_v63  ;;  %v2003_v13 = vsel %vm1984_vm4, %v2000_v34, %v2002_v55 }
  0x99   : > { %9093 = vmatmul.mubr.msk.f32.gmra.mxu1 %vm599_vm2, %v1312_v31 }
  0x9a   : > { %9029 = vmatmul.mubr.msk.f32.gmra.mxu0 %vm599_vm2, %v1308_v5  ;;  %9095 = vmatprep.mubr.msk.f32.mxu1 %vm599_vm2, %v1314_v39  ;;  %v2433_v5 = vrot.slane %v10208_v36, 4 }
  0x9b   : > { %9031 = vmatprep.mubr.msk.f32.mxu0 %vm599_vm2, %v1310_v27  ;;  %v1998_v27 = vrot.slane %v10208_v36, 3 }
  0x9d   : > { %9096 = vmatmul.mubr.msk.f32.gmra.mxu1 %vm599_vm2, %v1316_v54 }
  0x9e   : > { %9032 = vmatmul.mubr.msk.f32.gmra.mxu0 %vm599_vm2, %v1312_v31  ;;  %9098 = vmatprep.mubr.msk.f32.mxu1 %vm599_vm2, %v1318_v56  ;;  %v1997_v31 = vsel %vm1984_vm4, %v1994_v49, %v1996_v42 }
  0x9f   : > { %9034 = vmatprep.mubr.msk.f32.mxu0 %vm599_vm2, %v1314_v39  ;;  %v10770_v39 = vsel %vm672_vm0, %v2431_v26, %v2433_v5 }
  0xa1   : > { %9099 = vmatmul.mubr.msk.f32.gmra.mxu1 %vm599_vm2, %v1684_v60  ;;  %v2001_v60 = vsel %vm1984_vm4, %v1998_v27, %v2000_v34 }
  0xa2   : > { %9035 = vmatmul.mubr.msk.f32.gmra.mxu0 %vm599_vm2, %v1316_v54  ;;  %9101 = vmatprep.mubr.msk.f32.mxu1 %vm599_vm2, %v1686_v2  ;;  %v1999_v54 = vsel %vm1984_vm4, %v1996_v42, %v1998_v27  ;;  %v2004_v2 = vrot.slane %v10248_v51, 3  ;;  %v2012_v42 = vrot.slane %v10309_v10, 3 }
  0xa3   : > { %9037 = vmatprep.mubr.msk.f32.mxu0 %vm599_vm2, %v1318_v56 }
  0xa5   : > { %9102 = vmatmul.mubr.msk.f32.gmra.mxu1 %vm599_vm2, %v1685_v57  ;;  %v7751_v57 = vld [vmem:[%s13345_s1 + $0xf0] sm:$0xff] }
  0xa6   : > { %9038 = vmatmul.mubr.msk.f32.gmra.mxu0 %vm599_vm2, %v1317_v40  ;;  %9178 = vmatprep.mubr.msk.f32.mxu1 %vm599_vm2, %v10404_v14  ;;  %v2429_v14 = vrot.slane %v10184_v28, 4  ;;  %v1993_v28 = vsel %vm1984_vm4, %v1990_v15, %v1992_v20  ;;  %v2437_v40 = vrot.slane %v10231_v44, 4  ;;  %v2439_v44 = vrot.slane %v10248_v51, 4  ;;  %v7794_v51 = vld [vmem:[%s13345_s1 + $0x120] sm:$0xff] }
  0xa7   : > { %9114 = vmatprep.mubr.msk.f32.mxu0 %vm599_vm2, %v10396_v53  ;;  %v7754_v53 = vld [vmem:[%s13345_s1 + $0x108] sm:$0xff]  ;;  %v2006_v15 = vrot.slane %v10253_v52, 3  ;;  %v2443_v52 = vrot.slane %v10272_v61, 4  ;;  %v2008_v20 = vrot.slane %v10272_v61, 3 }
  0xa8   : > { %v10739_v4 = vsel %vm672_vm0, %v2427_v63, %v2429_v14  ;;  %v10760_v36 = vsel %vm672_vm0, %v2429_v14, %v2431_v26  ;;  %v10814_v63 = vld [vmem:[%s13345_s1 + $0x160] sm:$0xf]  ;;  %v10820_v14 = vsel %vm672_vm0, %v2439_v44, %v2441_v9  ;;  %v7793_v26 = vld [vmem:[%s13345_s1 + $0x118] sm:$0xff] }
  0xa9   : > { %9179 = vmatmul.mubr.msk.f32.vlgmr.msra.gmra.mxu1 %vm599_vm2, %v2424_v16  ;;  %v10808_v16 = vsel %vm672_vm0, %v2437_v40, %v2439_v44  ;;  %v2007_v49 = vsel %vm1984_vm4, %v2004_v2, %v2006_v15  ;;  %v10836_v61 = vsel %vm672_vm0, %v2441_v9, %v2443_v52  ;;  %v2457_v44 = vrot.slane %v10355_v30, 4 }
  0xaa   : > { %9115 = vmatmul.mubr.msk.f32.vlgmr.msra.gmra.mxu0 %vm599_vm2, %v1989_v19  ;;  %9181 = vmatprep.mubr.msk.f32.mxu1 %vm599_vm2, %v10719_v1  ;;  %v2005_v19 = vsel %vm1984_vm4, %v2002_v55, %v2004_v2 }
  0xab   : > { %9117 = vmatprep.mubr.msk.f32.mxu0 %vm599_vm2, %v1991_v25  ;;  %9233 = vmatpush3.msk.msra.mxu0 %vm672_vm0, %v10579_v62  ;;  %v7796_v62 = vld [vmem:[%s13345_s1 + $0x130] sm:$0xff]  ;;  %v2445_v25 = vrot.slane %v10279_v0, 4 }
  0xac   : > { %9234 = vmatprep.subr.mxu0 %v7754_v53  ;;  %9297 = vmatpush3.msk.msra.mxu1 %vm672_vm0, %v10601_v24  ;;  %v2435_v24 = vrot.slane %v10226_v43, 4  ;;  %v7795_v43 = vld [vmem:[%s13345_s1 + $0x128] sm:$0xff] }
  0xad   : > { %9182 = vmatmul.mubr.msk.f32.gmra.mxu1 %vm599_vm2, %v10732_v18  ;;  %9235 = vmatpush3.msra.mxu0 %v7754_v53  ;;  %v2010_v53 = vrot.slane %v10279_v0, 3  ;;  %v2447_v0 = vrot.slane %v10309_v10, 4 }
  0xae   : > { %9118 = vmatmul.mubr.msk.f32.gmra.mxu0 %vm599_vm2, %v1993_v28  ;;  %9184 = vmatprep.mubr.msk.f32.mxu1 %vm599_vm2, %v10739_v4  ;;  %v10784_v56 = vsel %vm672_vm0, %v2433_v5, %v2435_v24  ;;  %v10794_v6 = vsel %vm672_vm0, %v2435_v24, %v2437_v40  ;;  %v2009_v28 = vsel %vm1984_vm4, %v2006_v15, %v2008_v20  ;;  %v2018_v40 = vrot.slane %v10339_v22, 3 }
  0xaf   : > { %9120 = vmatprep.mubr.msk.f32.mxu0 %vm599_vm2, %v1995_v3  ;;  %9236 = vmatprep.subr.mxu0 %v7753_v35  ;;  %v10843_v5 = vsel %vm672_vm0, %v2443_v52, %v2445_v25  ;;  %v2449_v3 = vrot.slane %v10316_v11, 4  ;;  %v2011_v27 = vsel %vm1984_vm4, %v2008_v20, %v2010_v53  ;;  %v10854_v10 = vsel %vm672_vm0, %v2445_v25, %v2447_v0 }
  0xb0   : > { %9298 = vmatprep.subr.mxu1 %v7796_v62  ;;  %9237 = vmatpush3.msra.mxu0 %v7753_v35  ;;  %v2014_v35 = vrot.slane %v10316_v11, 3  ;;  %v2013_v24 = vsel %vm1984_vm4, %v2010_v53, %v2012_v42  ;;  %v2016_v11 = vrot.slane %v10332_v21, 3  ;;  %v2461_v15 = vrot.slane %v10371_v38, 4 }
  0xb1   : > { %9185 = vmatmul.mubr.msk.f32.gmra.mxu1 %vm599_vm2, %v10760_v36  ;;  %9238 = vmatprep.subr.mxu0 %v7752_v12  ;;  %v2026_v52 = vrot.slane %v10371_v38, 3  ;;  %v2028_v25 = vrot.slane %v10384_v47, 3 }
  0xb2   : > { %9121 = vmatmul.mubr.msk.f32.gmra.mxu0 %vm599_vm2, %v1997_v31  ;;  %9187 = vmatprep.mubr.msk.f32.mxu1 %vm599_vm2, %v10770_v39  ;;  %v2453_v31 = vrot.slane %v10339_v22, 4  ;;  %v2015_v34 = vsel %vm1984_vm4, %v2012_v42, %v2014_v35  ;;  %v2017_v55 = vsel %vm1984_vm4, %v2014_v35, %v2016_v11  ;;  %v2032_v42 = vrot.slane %v10412_v58, 3 }
  0xb3   : > { %9123 = vmatprep.mubr.msk.f32.mxu0 %vm599_vm2, %v1999_v54  ;;  %9299 = vmatpush3.msra.mxu1 %v7796_v62  ;;  %v2451_v62 = vrot.slane %v10332_v21, 4  ;;  %v2455_v54 = vrot.slane %v10350_v29, 4  ;;  %v2034_v35 = vrot.slane %v10417_v59, 3 }
  0xb4   : > { %9300 = vmatprep.subr.mxu1 %v7795_v43  ;;  %9239 = vmatpush3.msra.mxu0 %v7752_v12  ;;  %v10861_v12 = vsel %vm672_vm0, %v2447_v0, %v2449_v3 }
  0xb5   : > { %9188 = vmatmul.mubr.msk.f32.gmra.mxu1 %vm599_vm2, %v10784_v56  ;;  %9240 = vmatprep.subr.mxu0 %v7751_v57  ;;  %v10872_v21 = vsel %vm672_vm0, %v2449_v3, %v2451_v62  ;;  %v10879_v22 = vsel %vm672_vm0, %v2451_v62, %v2453_v31  ;;  %v10890_v2 = vsel %vm672_vm0, %v2453_v31, %v2455_v54  ;;  %v2469_v3 = vrot.slane %v10417_v59, 4 }
  0xb6   : > { %9124 = vmatmul.mubr.msk.f32.gmra.mxu0 %vm599_vm2, %v2001_v60  ;;  %9190 = vmatprep.mubr.msk.f32.mxu1 %vm599_vm2, %v10794_v6  ;;  %v2022_v60 = vrot.slane %v10355_v30, 3  ;;  %v10897_v30 = vsel %vm672_vm0, %v2455_v54, %v2457_v44  ;;  %v2473_v31 = vrot.slane %v10433_v8, 4 }
  0xb7   : > { %9126 = vmatprep.mubr.msk.f32.mxu0 %vm599_vm2, %v2003_v13  ;;  %9301 = vmatpush3.msra.mxu1 %v7795_v43  ;;  %v2020_v43 = vrot.slane %v10350_v29, 3  ;;  %v2459_v29 = vrot.slane %v10366_v37, 4  ;;  %v2024_v13 = vrot.slane %v10366_v37, 3  ;;  %v2463_v37 = vrot.slane %v10384_v47, 4 }
  0xb8   : > { %9302 = vmatprep.subr.mxu1 %v7794_v51  ;;  %9241 = vmatpush3.msra.mxu0 %v7751_v57  ;;  %v2019_v57 = vsel %vm1984_vm4, %v2016_v11, %v2018_v40  ;;  %v2467_v47 = vrot.slane %v10412_v58, 4  ;;  %v2471_v58 = vrot.slane %v10428_v7, 4  ;;  %v2036_v11 = vrot.slane %v10428_v7, 3 }
  0xb9   : > { %9191 = vmatmul.mubr.msk.f32.gmra.mxu1 %vm599_vm2, %v10808_v16  ;;  %9360 = vmatprep.subr.msk.mxu0 %vm672_vm0, %v10814_v63  ;;  %v2021_v9 = vsel %vm1984_vm4, %v2018_v40, %v2020_v43  ;;  %v2025_v20 = vsel %vm1984_vm4, %v2022_v60, %v2024_v13  ;;  %v10915_v38 = vsel %vm672_vm0, %v2459_v29, %v2461_v15  ;;  %v2038_v40 = vrot.slane %v10433_v8, 3 }
  0xba   : > { %9127 = vmatmul.mubr.msk.f32.gmra.mxu0 %vm599_vm2, %v2005_v19  ;;  %9193 = vmatprep.mubr.msk.f32.mxu1 %vm599_vm2, %v10820_v14  ;;  %v10908_v19 = vsel %vm672_vm0, %v2457_v44, %v2459_v29  ;;  %v2027_v53 = vsel %vm1984_vm4, %v2024_v13, %v2026_v52  ;;  %v10926_v0 = vsel %vm672_vm0, %v2461_v15, %v2463_v37  ;;  %v2475_v7 = vrot.slane %v10444_v17, 4 }
  0xbb   : > { %9129 = vmatprep.mubr.msk.f32.mxu0 %vm599_vm2, %v2007_v49  ;;  %9303 = vmatpush3.msra.mxu1 %v7794_v51  ;;  %v2023_v51 = vsel %vm1984_vm4, %v2020_v43, %v2022_v60  ;;  %v2465_v49 = vrot.slane %v10391_v50, 4  ;;  %v10951_v59 = vsel %vm672_vm0, %v2467_v47, %v2469_v3  ;;  %v10962_v54 = vsel %vm672_vm0, %v2469_v3, %v2471_v58 }
  0xbc   : > { %9304 = vmatprep.subr.mxu1 %v7793_v26  ;;  %v2040_v43 = vrot.slane %v10444_v17, 3  ;;  %v10969_v8 = vsel %vm672_vm0, %v2471_v58, %v2473_v31  ;;  %v2477_v44 = vrot.slane %v10449_v23, 4  ;;  %v2042_v60 = vrot.slane %v10449_v23, 3 }
  0xbd   : > { %9194 = vmatmul.mubr.msk.f32.gmra.mxu1 %vm599_vm2, %v10836_v61  ;;  %v10944_v62 = vsel %vm672_vm0, %v2465_v49, %v2467_v47  ;;  %v10980_v17 = vsel %vm672_vm0, %v2473_v31, %v2475_v7  ;;  %v2044_v13 = vrot.slane %v10460_v32, 3  ;;  %v2479_v15 = vrot.slane %v10460_v32, 4 }
  0xbe   : > { %9130 = vmatmul.mubr.msk.f32.gmra.mxu0 %vm599_vm2, %v2009_v28  ;;  %9196 = vmatprep.mubr.msk.f32.mxu1 %vm599_vm2, %v10843_v5  ;;  %v2029_v28 = vsel %vm1984_vm4, %v2026_v52, %v2028_v25  ;;  %v2041_v52 = vsel %vm1984_vm4, %v2038_v40, %v2040_v43  ;;  %v2483_v3 = vrot.slane %v10476_v45, 4 }
  0xbf   : > { %9132 = vmatprep.mubr.msk.f32.mxu0 %vm599_vm2, %v2011_v27  ;;  %9305 = vmatpush3.msra.mxu1 %v7793_v26  ;;  %v2030_v26 = vrot.slane %v10391_v50, 3  ;;  %v10933_v50 = vsel %vm672_vm0, %v2463_v37, %v2465_v49  ;;  %v10989_v37 = vsel %vm672_vm0, %v2475_v7, %v2477_v44  ;;  %v2043_v49 = vsel %vm1984_vm4, %v2040_v43, %v2042_v60 }
  0xc0   : > { %v2052_v43 = vrot.slane %v10677_v41, 3 }
  0xc1   : > { %9197 = vmatmul.mubr.msk.f32.gmra.mxu1 %vm599_vm2, %v10854_v10  ;;  %v2031_v27 = vsel %vm1984_vm4, %v2028_v25, %v2030_v26 }
  0xc2   : > { %9133 = vmatmul.mubr.msk.f32.gmra.mxu0 %vm599_vm2, %v2013_v24  ;;  %9199 = vmatprep.mubr.msk.f32.mxu1 %vm599_vm2, %v10861_v12  ;;  %v2033_v24 = vsel %vm1984_vm4, %v2030_v26, %v2032_v42 }
  0xc3   : > { %9135 = vmatprep.mubr.msk.f32.mxu0 %vm599_vm2, %v2015_v34  ;;  %v2035_v34 = vsel %vm1984_vm4, %v2032_v42, %v2034_v35  ;;  %v11003_v42 = vsel %vm672_vm0, %v2477_v44, %v2479_v15  ;;  %v2487_v44 = vrot.slane %v10677_v41, 4 }
  0xc5   : > { %9200 = vmatmul.mubr.msk.f32.gmra.mxu1 %vm599_vm2, %v10872_v21 }
  0xc6   : > { %9136 = vmatmul.mubr.msk.f32.gmra.mxu0 %vm599_vm2, %v2017_v55  ;;  %9202 = vmatprep.mubr.msk.f32.mxu1 %vm599_vm2, %v10879_v22  ;;  %v2037_v55 = vsel %vm1984_vm4, %v2034_v35, %v2036_v11  ;;  %v2048_v35 = vrot.slane %v10476_v45, 3 }
  0xc7   : > { %9138 = vmatprep.mubr.msk.f32.mxu0 %vm599_vm2, %v2019_v57  ;;  %v2039_v57 = vsel %vm1984_vm4, %v2036_v11, %v2038_v40 }
  0xc9   : > { %9203 = vmatmul.mubr.msk.f32.gmra.mxu1 %vm599_vm2, %v10890_v2 }
  0xca   : > { %9139 = vmatmul.mubr.msk.f32.gmra.mxu0 %vm599_vm2, %v2021_v9  ;;  %9205 = vmatprep.mubr.msk.f32.mxu1 %vm599_vm2, %v10897_v30 }
  0xcb   : > { %9141 = vmatprep.mubr.msk.f32.mxu0 %vm599_vm2, %v2023_v51 }
  0xcd   : > { %9206 = vmatmul.mubr.msk.f32.gmra.mxu1 %vm599_vm2, %v10908_v19 }
  0xce   : > { %9142 = vmatmul.mubr.msk.f32.gmra.mxu0 %vm599_vm2, %v2025_v20  ;;  %9208 = vmatprep.mubr.msk.f32.mxu1 %vm599_vm2, %v10915_v38  ;;  %v2481_v20 = vrot.slane %v10465_v33, 4 }
  0xcf   : > { %9144 = vmatprep.mubr.msk.f32.mxu0 %vm599_vm2, %v2027_v53  ;;  %v2046_v53 = vrot.slane %v10465_v33, 3 }
  0xd0   : > { %v11011_v58 = vsel %vm672_vm0, %v2479_v15, %v2481_v20  ;;  %v11024_v45 = vsel %vm672_vm0, %v2481_v20, %v2483_v3 }
  0xd1   : > { %9209 = vmatmul.mubr.msk.f32.gmra.mxu1 %vm599_vm2, %v10926_v0  ;;  %v2047_v31 = vsel %vm1984_vm4, %v2044_v13, %v2046_v53 }
  0xd2   : > { %9145 = vmatmul.mubr.msk.f32.gmra.mxu0 %vm599_vm2, %v2029_v28  ;;  %9211 = vmatprep.mubr.msk.f32.mxu1 %vm599_vm2, %v10933_v50  ;;  %v2045_v28 = vsel %vm1984_vm4, %v2042_v60, %v2044_v13  ;;  %v2049_v60 = vsel %vm1984_vm4, %v2046_v53, %v2048_v35  ;;  %v2489_v13 = vrot.slane %v10680_v48, 4 }
  0xd3   : > { %9147 = vmatprep.mubr.msk.f32.mxu0 %vm599_vm2, %v2031_v27 }
  0xd5   : > { %9212 = vmatmul.mubr.msk.f32.gmra.mxu1 %vm599_vm2, %v10944_v62 }
  0xd6   : > { %9148 = vmatmul.mubr.msk.f32.gmra.mxu0 %vm599_vm2, %v2033_v24  ;;  %9214 = vmatprep.mubr.msk.f32.mxu1 %vm599_vm2, %v10951_v59  ;;  %v2485_v24 = vrot.slane %v10481_v46, 4 }
  0xd7   : > { %9150 = vmatprep.mubr.msk.f32.mxu0 %vm599_vm2, %v2035_v34  ;;  %v2050_v34 = vrot.slane %v10481_v46, 3 }
  0xd9   : > { %v8924_v29 = vpop.f32.mrf.mxu1  ;;  %9215 = vmatmul.mubr.msk.f32.gmra.mxu1 %vm599_vm2, %v10962_v54  ;;  %v2053_v53 = vsel %vm1984_vm4, %v2050_v34, %v2052_v43 }
  0xda   : > { %v8860_v9 = vpop.f32.mrf.mxu0  ;;  %9151 = vmatmul.mubr.msk.f32.gmra.mxu0 %vm599_vm2, %v2037_v55  ;;  %9217 = vmatprep.mubr.msk.f32.mxu1 %vm599_vm2, %v10969_v8 }
  0xdb   : > { %v10984_v51 = vadd.f32 %v8924_v29, %v8860_v9  ;;  %v1062_v23 = vpop.f32.mrf.mxu1  ;;  %9153 = vmatprep.mubr.msk.f32.mxu0 %vm599_vm2, %v2039_v57  ;;  %v11033_v29 = vsel %vm672_vm0, %v2483_v3, %v2485_v24  ;;  %v11036_v9 = vld [vmem:[%s10142_s18 + $0x130] sm:$0xff] }
  0xdc   : > { %v742_v25 = vpop.f32.mrf.mxu0 }
  0xdd   : > { %v10994_v26 = vadd.f32 %v1062_v23, %v742_v25  ;;  %v8927_v32 = vpop.f32.mrf.mxu1  ;;  %9218 = vmatmul.mubr.msk.f32.gmra.mxu1 %vm599_vm2, %v10980_v17  ;;  %v2051_v23 = vsel %vm1984_vm4, %v2048_v35, %v2050_v34  ;;  %v11061_v35 = vld [vmem:[%s10142_s18 + $0x20] sm:$0xff] }
  0xde   : > { %v8863_v47 = vpop.f32.mrf.mxu0  ;;  %9154 = vmatmul.mubr.msk.f32.gmra.mxu0 %vm599_vm2, %v2041_v52  ;;  %9220 = vmatprep.mubr.msk.f32.mxu1 %vm599_vm2, %v10989_v37  ;;  %v2054_v52 = vrot.slane %v10680_v48, 3  ;;  %v2056_v48 = vrot.slane %v11036_v9, 3 }
  0xdf   : > { %v11006_v33 = vadd.f32 %v8927_v32, %v8863_v47  ;;  %v1072_v27 = vpop.f32.mrf.mxu1  ;;  %9156 = vmatprep.mubr.msk.f32.mxu0 %vm599_vm2, %v2043_v49  ;;  %v11050_v32 = vsel %vm672_vm0, %v2485_v24, %v2487_v44  ;;  %v13358_v47 = vrot.slane %v11036_v9, 4 }
  0xe0   : > { %v752_v11 = vpop.f32.mrf.mxu0 }
  0xe1   : > { %v11016_v40 = vadd.f32 %v1072_v27, %v752_v11  ;;  %v8930_v7 = vpop.f32.mrf.mxu1  ;;  %9221 = vmatmul.mubr.msk.f32.gmra.mxu1 %vm599_vm2, %v11003_v42  ;;  %v11058_v27 = vsel %vm672_vm0, %v2487_v44, %v2489_v13  ;;  %v3156_v11 = vrot.slane %v11061_v35, 5 }
  0xe2   : > { %v8866_v55 = vpop.f32.mrf.mxu0  ;;  %9157 = vmatmul.mubr.msk.f32.gmra.mxu0 %vm599_vm2, %v2045_v28  ;;  %9223 = vmatprep.mubr.msk.f32.mxu1 %vm599_vm2, %v11011_v58 }
  0xe3   : > { %v11028_v46 = vadd.f32 %v8930_v7, %v8866_v55  ;;  %v1082_v57 = vpop.f32.mrf.mxu1  ;;  %9159 = vmatprep.mubr.msk.f32.mxu0 %vm599_vm2, %v2047_v31  ;;  %v11065_v31 = vld [vmem:[%s10142_s18 + $0x28] sm:$0xff]  ;;  %v2055_v7 = vsel %vm1984_vm4, %v2052_v43, %v2054_v52  ;;  %v11082_v43 = vld [vmem:[%s10142_s18 + $0x30] sm:$0xff] }
  0xe4   : > { %v762_v15 = vpop.f32.mrf.mxu0  ;;  %v3157_v24 = vrot.slane %v11065_v31, 5 }
  0xe5   : > { %v11041_v20 = vadd.f32 %v1082_v57, %v762_v15  ;;  %v8933_v25 = vpop.f32.mrf.mxu1  ;;  %9224 = vmatmul.mubr.msk.f32.gmra.mxu1 %vm599_vm2, %v11024_v45  ;;  %v3159_v15 = vrot.slane %v11082_v43, 5 }
  0xe6   : > { %v8869_v49 = vpop.f32.mrf.mxu0  ;;  %9160 = vmatmul.mubr.msk.f32.gmra.mxu0 %vm599_vm2, %v2049_v60  ;;  %9226 = vmatprep.mubr.msk.f32.mxu1 %vm599_vm2, %v11033_v29  ;;  %v11079_v60 = vsel %vm672_vm0, %v2489_v13, %v13358_v47 }
  0xe7   : > { %v11054_v28 = vadd.f32 %v8933_v25, %v8869_v49  ;;  %v1092_v3 = vpop.f32.mrf.mxu1  ;;  %9162 = vmatprep.mubr.msk.f32.mxu0 %vm599_vm2, %v2051_v23  ;;  %v2057_v49 = vsel %vm1984_vm4, %v2054_v52, %v2056_v48  ;;  %v3160_v52 = vsel %vm3155_vm5, %v3157_v24, %v3159_v15  ;;  %v11102_v48 = vld [vmem:[%s10142_s18 + $0x40] sm:$0xff] }
  0xe8   : > { %v772_v34 = vpop.f32.mrf.mxu0 }
  0xe9   : > { %v11069_v55 = vadd.f32 %v1092_v3, %v772_v34  ;;  %v8936_v57 = vpop.f32.mrf.mxu1  ;;  %9227 = vmatmul.mubr.msk.f32.gmra.mxu1 %vm599_vm2, %v11050_v32  ;;  %v11091_v3 = vld [vmem:[%s10142_s18 + $0x38] sm:$0xff] }
  0xea   : > { %v8872_v44 = vpop.f32.mrf.mxu0  ;;  %9163 = vmatmul.mubr.msk.f32.gmra.mxu0 %vm599_vm2, %v2053_v53  ;;  %9229 = vmatprep.mubr.msk.f32.mxu1 %vm599_vm2, %v11058_v27  ;;  %v3158_v53 = vsel %vm3155_vm5, %v3156_v11, %v3157_v24  ;;  %v3161_v13 = vrot.slane %v11091_v3, 5  ;;  %v3163_v11 = vrot.slane %v11102_v48, 5 }
  0xeb   : > { %13376 = vst [vmem:[#allocation3_spill] sm:$0xff] %v11069_v55  ;;  %v11085_v23 = vadd.f32 %v8936_v57, %v8872_v44  ;;  %v1102_v25 = vpop.f32.mrf.mxu1  ;;  %9165 = vmatprep.mubr.msk.f32.mxu0 %vm599_vm2, %v2055_v7 }
  0xec   : > { %v782_v34 = vpop.f32.mrf.mxu0 }
  0xed   : > { %v11094_v47 = vadd.f32 %v1102_v25, %v782_v34  ;;  %v8939_v55 = vpop.f32.mrf.mxu1  ;;  %9230 = vmatmul.mubr.msk.f32.gmra.mxu1 %vm599_vm2, %v11079_v60  ;;  %v3162_v25 = vsel %vm3155_vm5, %v3159_v15, %v3161_v13  ;;  %v11111_v34 = vld [vmem:[%s10142_s18 + $0x48] sm:$0xff]  ;;  %v11125_v15 = vld [vmem:[%s10142_s18 + $0x50] sm:$0xff] }
  0xee   : > { %v8875_v57 = vpop.f32.mrf.mxu0  ;;  %9166 = vmatmul.mubr.msk.f32.gmra.mxu0 %vm599_vm2, %v2057_v49  ;;  %9306 = vmatprep.mubr.msk.f32.mxu1 %vm599_vm2, %v3158_v53  ;;  %13378 = vst [vmem:[#allocation5_spill] sm:$0xff] %v11111_v34  ;;  %v3165_v49 = vrot.slane %v11111_v34, 5  ;;  %v11134_v34 = vld [vmem:[%s10142_s18 + $0x58] sm:$0xff] }
  0xef   : > { %13377 = vst [vmem:[#allocation4_spill] sm:$0xff] %v11094_v47  ;;  %v11105_v7 = vadd.f32 %v8939_v55, %v8875_v57  ;;  %v1112_v44 = vpop.f32.mrf.mxu1  ;;  %9242 = vmatprep.mubr.msk.f32.mxu0 %vm599_vm2, %v10719_v1  ;;  %v7838_v55 = vld [vmem:[%s13345_s1 + $0x158] sm:$0xff]  ;;  %v3164_v1 = vsel %vm3155_vm5, %v3161_v13, %v3163_v11  ;;  %13380 = vst [vmem:[#allocation7_spill] sm:$0xff] %v11134_v34 }
  0xf0   : > { %v792_v53 = vpop.f32.mrf.mxu0 }
  0xf1   : > { %v11114_v24 = vadd.f32 %v1112_v44, %v792_v53  ;;  %v8942_v47 = vpop.f32.mrf.mxu1  ;;  %9307 = vmatmul.mubr.msk.f32.vlgmr.msra.gmra.mxu1 %vm599_vm2, %v3160_v52  ;;  %v3167_v44 = vrot.slane %v11125_v15, 5  ;;  %v3166_v52 = vsel %vm3155_vm5, %v3163_v11, %v3165_v49 }
  0xf2   : > { %v8878_v57 = vpop.f32.mrf.mxu0  ;;  %9243 = vmatmul.mubr.msk.f32.vlgmr.msra.gmra.mxu0 %vm599_vm2, %v10732_v18  ;;  %9309 = vmatprep.mubr.msk.f32.mxu1 %vm599_vm2, %v3162_v25  ;;  %v3169_v18 = vrot.slane %v11134_v34, 5 }
  0xf3   : > { %13379 = vst [vmem:[#allocation6_spill] sm:$0xff] %v11114_v24  ;;  %v11128_v53 = vadd.f32 %v8942_v47, %v8878_v57  ;;  %v1122_v24 = vpop.f32.mrf.mxu1  ;;  %9245 = vmatprep.mubr.msk.f32.mxu0 %vm599_vm2, %v10739_v4  ;;  %9361 = vmatpush3.msk.msra.mxu0 %vm672_vm0, %v10814_v63  ;;  %v7837_v47 = vld [vmem:[%s13345_s1 + $0x150] sm:$0xff]  ;;  %v3168_v63 = vsel %vm3155_vm5, %v3165_v49, %v3167_v44  ;;  %v11150_v57 = vld [vmem:[%s10142_s18 + $0x60] sm:$0xff] }
  0xf4   : > { %v802_v13 = vpop.f32.mrf.mxu0  ;;  %9362 = vmatprep.subr.mxu0 %v7838_v55  ;;  %13382 = vst [vmem:[#allocation9_spill] sm:$0xff] %v11150_v57  ;;  %v3171_v34 = vrot.slane %v11150_v57, 5 }
  0xf5   : > { %v11142_v25 = vadd.f32 %v1122_v24, %v802_v13  ;;  %v8945_v4 = vpop.f32.mrf.mxu1  ;;  %9310 = vmatmul.mubr.msk.f32.gmra.mxu1 %vm599_vm2, %v3164_v1  ;;  %9363 = vmatpush3.msra.mxu0 %v7838_v55  ;;  %v7836_v24 = vld [vmem:[%s13345_s1 + $0x148] sm:$0xff] }
  0xf6   : > { %v8881_v11 = vpop.f32.mrf.mxu0  ;;  %9246 = vmatmul.mubr.msk.f32.gmra.mxu0 %vm599_vm2, %v10760_v36  ;;  %9312 = vmatprep.mubr.msk.f32.mxu1 %vm599_vm2, %v3166_v52  ;;  %v3170_v36 = vsel %vm3155_vm5, %v3167_v44, %v3169_v18  ;;  %v11162_v55 = vld [vmem:[%s10142_s18 + $0x68] sm:$0xff]  ;;  %v3172_v44 = vsel %vm3155_vm5, %v3169_v18, %v3171_v34 }
  0xf7   : > { %13381 = vst [vmem:[#allocation8_spill] sm:$0xff] %v11142_v25  ;;  %v11156_v13 = vadd.f32 %v8945_v4, %v8881_v11  ;;  %v1132_v1 = vpop.f32.mrf.mxu1  ;;  %9248 = vmatprep.mubr.msk.f32.mxu0 %vm599_vm2, %v10770_v39  ;;  %v3173_v49 = vrot.slane %v11162_v55, 5  ;;  %9364 = vmatprep.subr.mxu0 %v7837_v47  ;;  %v7835_v39 = vld [vmem:[%s13345_s1 + $0x140] sm:$0xff] }
  0xf8   : > { %v812_v52 = vpop.f32.mrf.mxu0  ;;  %9365 = vmatpush3.msra.mxu0 %v7837_v47  ;;  %v11176_v47 = vld [vmem:[%s10142_s18 + $0x70] sm:$0xff] }
  0xf9   : > { %v11165_v57 = vadd.f32 %v1132_v1, %v812_v52  ;;  %v8948_v25 = vpop.f32.mrf.mxu1  ;;  %9313 = vmatmul.mubr.msk.f32.gmra.mxu1 %vm599_vm2, %v3168_v63  ;;  %9366 = vmatprep.subr.mxu0 %v7836_v24  ;;  %13384 = vst [vmem:[#allocation11_spill] sm:$0xff] %v11176_v47  ;;  %v3175_v11 = vrot.slane %v11176_v47, 5  ;;  %v3174_v52 = vsel %vm3155_vm5, %v3171_v34, %v3173_v49  ;;  %v11196_v34 = vld [vmem:[%s10142_s18 + $0x80] sm:$0xff] }
  0xfa   : > { %v8884_v4 = vpop.f32.mrf.mxu0  ;;  %9249 = vmatmul.mubr.msk.f32.gmra.mxu0 %vm599_vm2, %v10784_v56  ;;  %9315 = vmatprep.mubr.msk.f32.mxu1 %vm599_vm2, %v3170_v36  ;;  %13385 = vst [vmem:[#allocation12_spill] sm:$0xff] %v11196_v34 }
  0xfb   : > { %13383 = vst [vmem:[#allocation10_spill] sm:$0xff] %v11165_v57  ;;  %v11179_v1 = vadd.f32 %v8948_v25, %v8884_v4  ;;  %v1142_v63 = vpop.f32.mrf.mxu1  ;;  %9251 = vmatprep.mubr.msk.f32.mxu0 %vm599_vm2, %v10794_v6  ;;  %v11185_v57 = vld [vmem:[%s10142_s18 + $0x78] sm:$0xff]  ;;  %9367 = vmatpush3.msra.mxu0 %v7836_v24  ;;  %v3176_v6 = vsel %vm3155_vm5, %v3173_v49, %v3175_v11  ;;  %v3179_v24 = vrot.slane %v11196_v34, 5 }
  0xfc   : > { %v3177_v56 = vrot.slane %v11185_v57, 5  ;;  %v822_v36 = vpop.f32.mrf.mxu0  ;;  %9368 = vmatprep.subr.mxu0 %v7835_v39 }
  0xfd   : > { %v11188_v18 = vadd.f32 %v1142_v63, %v822_v36  ;;  %v8951_v47 = vpop.f32.mrf.mxu1  ;;  %9316 = vmatmul.mubr.msk.f32.gmra.mxu1 %vm599_vm2, %v3172_v44  ;;  %9369 = vmatpush3.msra.mxu0 %v7835_v39  ;;  %v11205_v44 = vld [vmem:[%s10142_s18 + $0x88] sm:$0xff] }
  0xfe   : > { %v8887_v25 = vpop.f32.mrf.mxu0  ;;  %9252 = vmatmul.mubr.msk.f32.gmra.mxu0 %vm599_vm2, %v10808_v16  ;;  %9318 = vmatprep.mubr.msk.f32.mxu1 %vm599_vm2, %v3174_v52  ;;  %v3178_v39 = vsel %vm3155_vm5, %v3175_v11, %v3177_v56  ;;  %v3181_v16 = vrot.slane %v11205_v44, 5 }
  0xff   : > { %v11199_v4 = vadd.f32 %v8951_v47, %v8887_v25  ;;  %v1152_v63 = vpop.f32.mrf.mxu1  ;;  %9254 = vmatprep.mubr.msk.f32.mxu0 %vm599_vm2, %v10820_v14  ;;  %v3180_v14 = vsel %vm3155_vm5, %v3177_v56, %v3179_v24  ;;  %v11216_v47 = vld [vmem:[%s10142_s18 + $0x90] sm:$0xff] }
 0x100   : > { %v832_v52 = vpop.f32.mrf.mxu0  ;;  %13387 = vst [vmem:[#allocation14_spill] sm:$0xff] %v11216_v47  ;;  %v3183_v11 = vrot.slane %v11216_v47, 5 }
 0x101   : > { %v11208_v49 = vadd.f32 %v1152_v63, %v832_v52  ;;  %v8954_v36 = vpop.f32.mrf.mxu1  ;;  %9319 = vmatmul.mubr.msk.f32.gmra.mxu1 %vm599_vm2, %v3176_v6  ;;  %v3182_v6 = vsel %vm3155_vm5, %v3179_v24, %v3181_v16  ;;  %v11225_v52 = vld [vmem:[%s10142_s18 + $0x98] sm:$0xff] }
 0x102   : > { %v8890_v34 = vpop.f32.mrf.mxu0  ;;  %9255 = vmatmul.mubr.msk.f32.gmra.mxu0 %vm599_vm2, %v10836_v61  ;;  %9321 = vmatprep.mubr.msk.f32.mxu1 %vm599_vm2, %v3178_v39  ;;  %v3185_v61 = vrot.slane %v11225_v52, 5 }
 0x103   : > { %13386 = vst [vmem:[#allocation13_spill] sm:$0xff] %v11208_v49  ;;  %v11219_v25 = vadd.f32 %v8954_v36, %v8890_v34  ;;  %v1162_v63 = vpop.f32.mrf.mxu1  ;;  %9257 = vmatprep.mubr.msk.f32.mxu0 %vm599_vm2, %v10843_v5  ;;  %v3184_v5 = vsel %vm3155_vm5, %v3181_v16, %v3183_v11  ;;  %v11236_v34 = vld [vmem:[%s10142_s18 + $0xa0] sm:$0xff] }
 0x104   : > { %v842_v39 = vpop.f32.mrf.mxu0  ;;  %13389 = vst [vmem:[#allocation16_spill] sm:$0xff] %v11236_v34  ;;  %v3187_v24 = vrot.slane %v11236_v34, 5 }
 0x105   : > { %v11228_v56 = vadd.f32 %v1162_v63, %v842_v39  ;;  %v8957_v49 = vpop.f32.mrf.mxu1  ;;  %9322 = vmatmul.mubr.msk.f32.gmra.mxu1 %vm599_vm2, %v3180_v14  ;;  %v3186_v14 = vsel %vm3155_vm5, %v3183_v11, %v3185_v61  ;;  %v11245_v39 = vld [vmem:[%s10142_s18 + $0xa8] sm:$0xff] }
 0x106   : > { %v8893_v47 = vpop.f32.mrf.mxu0  ;;  %9258 = vmatmul.mubr.msk.f32.gmra.mxu0 %vm599_vm2, %v10854_v10  ;;  %9324 = vmatprep.mubr.msk.f32.mxu1 %vm599_vm2, %v3182_v6  ;;  %v3189_v10 = vrot.slane %v11245_v39, 5 }
 0x107   : > { %13388 = vst [vmem:[#allocation15_spill] sm:$0xff] %v11228_v56  ;;  %v11239_v36 = vadd.f32 %v8957_v49, %v8893_v47  ;;  %v1172_v63 = vpop.f32.mrf.mxu1  ;;  %9260 = vmatprep.mubr.msk.f32.mxu0 %vm599_vm2, %v10861_v12  ;;  %v3188_v12 = vsel %vm3155_vm5, %v3185_v61, %v3187_v24  ;;  %v11256_v49 = vld [vmem:[%s10142_s18 + $0xb0] sm:$0xff] }
 0x108   : > { %v852_v6 = vpop.f32.mrf.mxu0  ;;  %13391 = vst [vmem:[#allocation18_spill] sm:$0xff] %v11256_v49  ;;  %v3191_v47 = vrot.slane %v11256_v49, 5 }
 0x109   : > { %v11248_v16 = vadd.f32 %v1172_v63, %v852_v6  ;;  %v8960_v56 = vpop.f32.mrf.mxu1  ;;  %9325 = vmatmul.mubr.msk.f32.gmra.mxu1 %vm599_vm2, %v3184_v5  ;;  %v3190_v5 = vsel %vm3155_vm5, %v3187_v24, %v3189_v10  ;;  %v11265_v6 = vld [vmem:[%s10142_s18 + $0xb8] sm:$0xff] }
 0x10a   : > { %v8896_v34 = vpop.f32.mrf.mxu0  ;;  %9261 = vmatmul.mubr.msk.f32.gmra.mxu0 %vm599_vm2, %v10872_v21  ;;  %9327 = vmatprep.mubr.msk.f32.mxu1 %vm599_vm2, %v3186_v14  ;;  %v3193_v21 = vrot.slane %v11265_v6, 5 }
 0x10b   : > { %13390 = vst [vmem:[#allocation17_spill] sm:$0xff] %v11248_v16  ;;  %v11259_v11 = vadd.f32 %v8960_v56, %v8896_v34  ;;  %v1182_v63 = vpop.f32.mrf.mxu1  ;;  %9263 = vmatprep.mubr.msk.f32.mxu0 %vm599_vm2, %v10879_v22  ;;  %v3192_v22 = vsel %vm3155_vm5, %v3189_v10, %v3191_v47  ;;  %v11276_v56 = vld [vmem:[%s10142_s18 + $0xc0] sm:$0xff] }
 0x10c   : > { %v862_v14 = vpop.f32.mrf.mxu0  ;;  %13393 = vst [vmem:[#allocation20_spill] sm:$0xff] %v11276_v56  ;;  %v3195_v34 = vrot.slane %v11276_v56, 5 }
 0x10d   : > { %v11268_v61 = vadd.f32 %v1182_v63, %v862_v14  ;;  %v8963_v16 = vpop.f32.mrf.mxu1  ;;  %9328 = vmatmul.mubr.msk.f32.gmra.mxu1 %vm599_vm2, %v3188_v12  ;;  %v3194_v12 = vsel %vm3155_vm5, %v3191_v47, %v3193_v21  ;;  %v11285_v14 = vld [vmem:[%s10142_s18 + $0xc8] sm:$0xff] }
 0x10e   : > { %v8899_v49 = vpop.f32.mrf.mxu0  ;;  %9264 = vmatmul.mubr.msk.f32.gmra.mxu0 %vm599_vm2, %v10890_v2  ;;  %9330 = vmatprep.mubr.msk.f32.mxu1 %vm599_vm2, %v3190_v5  ;;  %v3197_v2 = vrot.slane %v11285_v14, 5 }
 0x10f   : > { %13392 = vst [vmem:[#allocation19_spill] sm:$0xff] %v11268_v61  ;;  %v11279_v24 = vadd.f32 %v8963_v16, %v8899_v49  ;;  %v1192_v63 = vpop.f32.mrf.mxu1  ;;  %9266 = vmatprep.mubr.msk.f32.mxu0 %vm599_vm2, %v10897_v30  ;;  %v3196_v30 = vsel %vm3155_vm5, %v3193_v21, %v3195_v34  ;;  %v11296_v16 = vld [vmem:[%s10142_s18 + $0xd0] sm:$0xff] }
 0x110   : > { %v872_v5 = vpop.f32.mrf.mxu0  ;;  %13395 = vst [vmem:[#allocation22_spill] sm:$0xff] %v11296_v16  ;;  %v3199_v49 = vrot.slane %v11296_v16, 5 }
 0x111   : > { %v11288_v10 = vadd.f32 %v1192_v63, %v872_v5  ;;  %v8966_v61 = vpop.f32.mrf.mxu1  ;;  %9331 = vmatmul.mubr.msk.f32.gmra.mxu1 %vm599_vm2, %v3192_v22  ;;  %v3198_v22 = vsel %vm3155_vm5, %v3195_v34, %v3197_v2  ;;  %v11305_v5 = vld [vmem:[%s10142_s18 + $0xd8] sm:$0xff] }
 0x112   : > { %v8902_v56 = vpop.f32.mrf.mxu0  ;;  %9267 = vmatmul.mubr.msk.f32.gmra.mxu0 %vm599_vm2, %v10908_v19  ;;  %9333 = vmatprep.mubr.msk.f32.mxu1 %vm599_vm2, %v3194_v12  ;;  %v3201_v19 = vrot.slane %v11305_v5, 5 }
 0x113   : > { %13394 = vst [vmem:[#allocation21_spill] sm:$0xff] %v11288_v10  ;;  %v11299_v47 = vadd.f32 %v8966_v61, %v8902_v56  ;;  %v1202_v63 = vpop.f32.mrf.mxu1  ;;  %9269 = vmatprep.mubr.msk.f32.mxu0 %vm599_vm2, %v10915_v38  ;;  %v3200_v38 = vsel %vm3155_vm5, %v3197_v2, %v3199_v49  ;;  %v11316_v61 = vld [vmem:[%s10142_s18 + $0xe0] sm:$0xff] }
 0x114   : > { %v882_v12 = vpop.f32.mrf.mxu0  ;;  %13397 = vst [vmem:[#allocation24_spill] sm:$0xff] %v11316_v61  ;;  %v3203_v56 = vrot.slane %v11316_v61, 5 }
 0x115   : > { %v11308_v21 = vadd.f32 %v1202_v63, %v882_v12  ;;  %v8969_v10 = vpop.f32.mrf.mxu1  ;;  %9334 = vmatmul.mubr.msk.f32.gmra.mxu1 %vm599_vm2, %v3196_v30  ;;  %v3202_v30 = vsel %vm3155_vm5, %v3199_v49, %v3201_v19  ;;  %v11325_v12 = vld [vmem:[%s10142_s18 + $0xe8] sm:$0xff] }
 0x116   : > { %v8905_v16 = vpop.f32.mrf.mxu0  ;;  %9270 = vmatmul.mubr.msk.f32.gmra.mxu0 %vm599_vm2, %v10926_v0  ;;  %9336 = vmatprep.mubr.msk.f32.mxu1 %vm599_vm2, %v3198_v22  ;;  %v3205_v0 = vrot.slane %v11325_v12, 5 }
 0x117   : > { %13396 = vst [vmem:[#allocation23_spill] sm:$0xff] %v11308_v21  ;;  %v11319_v34 = vadd.f32 %v8969_v10, %v8905_v16  ;;  %v1212_v63 = vpop.f32.mrf.mxu1  ;;  %9272 = vmatprep.mubr.msk.f32.mxu0 %vm599_vm2, %v10933_v50  ;;  %v3204_v50 = vsel %vm3155_vm5, %v3201_v19, %v3203_v56  ;;  %v11336_v10 = vld [vmem:[%s10142_s18 + $0xf0] sm:$0xff] }
 0x118   : > { %v892_v22 = vpop.f32.mrf.mxu0  ;;  %13398 = vst [vmem:[#allocation25_spill] sm:$0xff] %v11336_v10  ;;  %v3207_v16 = vrot.slane %v11336_v10, 5 }
 0x119   : > { %v11328_v2 = vadd.f32 %v1212_v63, %v892_v22  ;;  %v8972_v21 = vpop.f32.mrf.mxu1  ;;  %9337 = vmatmul.mubr.msk.f32.gmra.mxu1 %vm599_vm2, %v3200_v38  ;;  %v3206_v38 = vsel %vm3155_vm5, %v3203_v56, %v3205_v0 }
 0x11a   : > { %v8908_v61 = vpop.f32.mrf.mxu0  ;;  %9273 = vmatmul.mubr.msk.f32.gmra.mxu0 %vm599_vm2, %v10944_v62  ;;  %9339 = vmatprep.mubr.msk.f32.mxu1 %vm599_vm2, %v3202_v30  ;;  %v11347_v62 = vld [vmem:[%s10142_s18 + $0xf8] sm:$0xff] }
 0x11b   : > { %v11339_v49 = vadd.f32 %v8972_v21, %v8908_v61  ;;  %v11341_v63 = vpop.f32.mrf.mxu1  ;;  %9275 = vmatprep.mubr.msk.f32.mxu0 %vm599_vm2, %v10951_v59  ;;  %v3209_v30 = vrot.slane %v11347_v62, 5  ;;  %v3208_v59 = vsel %vm3155_vm5, %v3205_v0, %v3207_v16  ;;  %v11358_v21 = vld [vmem:[%s10142_s18 + $0x100] sm:$0xff] }
 0x11c   : > { %13399 = vst [vmem:[#allocation26_spill] sm:$0xff] %v11341_v63  ;;  %v11350_v19 = vpop.f32.mrf.mxu0  ;;  %13401 = vst [vmem:[#allocation28_spill] sm:$0xff] %v11358_v21  ;;  %v3211_v61 = vrot.slane %v11358_v21, 5 }
 0x11d   : > { %13400 = vst [vmem:[#allocation27_spill] sm:$0xff] %v11350_v19  ;;  %v8975_v22 = vpop.f32.mrf.mxu1  ;;  %9340 = vmatmul.mubr.msk.f32.gmra.mxu1 %vm599_vm2, %v3204_v50  ;;  %v3210_v50 = vsel %vm3155_vm5, %v3207_v16, %v3209_v30 }
 0x11e   : > { %v8911_v10 = vpop.f32.mrf.mxu0  ;;  %9276 = vmatmul.mubr.msk.f32.gmra.mxu0 %vm599_vm2, %v10962_v54  ;;  %9342 = vmatprep.mubr.msk.f32.mxu1 %vm599_vm2, %v3206_v38  ;;  %v11369_v54 = vld [vmem:[%s10142_s18 + $0x108] sm:$0xff] }
 0x11f   : > { %v11361_v56 = vadd.f32 %v8975_v22, %v8911_v10  ;;  %v11363_v63 = vpop.f32.mrf.mxu1  ;;  %9278 = vmatprep.mubr.msk.f32.mxu0 %vm599_vm2, %v10969_v8  ;;  %13403 = vst [vmem:[#allocation30_spill] sm:$0xff] %v11369_v54  ;;  %v3213_v38 = vrot.slane %v11369_v54, 5  ;;  %v3212_v8 = vsel %vm3155_vm5, %v3209_v30, %v3211_v61  ;;  %v11380_v10 = vld [vmem:[%s10142_s18 + $0x110] sm:$0xff] }
 0x120   : > { %13402 = vst [vmem:[#allocation29_spill] sm:$0xff] %v11363_v63  ;;  %v11372_v0 = vpop.f32.mrf.mxu0  ;;  %13405 = vst [vmem:[#allocation32_spill] sm:$0xff] %v11380_v10  ;;  %v3215_v16 = vrot.slane %v11380_v10, 5 }
 0x121   : > { %13404 = vst [vmem:[#allocation31_spill] sm:$0xff] %v11372_v0  ;;  %v9052_v19 = vpop.f32.mrf.mxu1  ;;  %9343 = vmatmul.mubr.msk.f32.gmra.mxu1 %vm599_vm2, %v3208_v59  ;;  %v3214_v59 = vsel %vm3155_vm5, %v3211_v61, %v3213_v38  ;;  %v11390_v0 = vld [vmem:[%s10142_s18 + $0x118] sm:$0xff] }
 0x122   : > { %v8988_v21 = vpop.f32.mrf.mxu0  ;;  %9279 = vmatmul.mubr.msk.f32.gmra.mxu0 %vm599_vm2, %v10980_v17  ;;  %9345 = vmatprep.mubr.msk.f32.mxu1 %vm599_vm2, %v3210_v50  ;;  %v3217_v17 = vrot.slane %v11390_v0, 5 }
 0x123   : > { %v1640_v22 = vadd.f32 %v8988_v21, %v10984_v51  ;;  %9281 = vmatprep.mubr.msk.f32.mxu0 %vm599_vm2, %v10989_v37  ;;  %v11386_v63 = vpop.f32.mrf.mxu1  ;;  %v3216_v37 = vsel %vm3155_vm5, %v3213_v38, %v3215_v16  ;;  %v3219_v21 = vrot.slane %v10677_v41, 5 }
 0x124   : > { %v1460_v50 = vpop.f32.mrf.mxu0 }
 0x125   : > { %v11394_v30 = vadd.f32 %v1460_v50, %v10994_v26  ;;  %v11396_v54 = vadd.f32 %v9052_v19, %v1640_v22  ;;  %v9055_v10 = vpop.f32.mrf.mxu1  ;;  %9346 = vmatmul.mubr.msk.f32.gmra.mxu1 %vm599_vm2, %v3212_v8  ;;  %v3218_v19 = vsel %vm3155_vm5, %v3215_v16, %v3217_v17  ;;  %v11411_v8 = vld [vmem:[%s10142_s18 + $0x128] sm:$0xff]  ;;  %v3220_v16 = vsel %vm3155_vm5, %v3217_v17, %v3219_v21 }
 0x126   : > { %v8991_v51 = vpop.f32.mrf.mxu0  ;;  %9282 = vmatmul.mubr.msk.f32.gmra.mxu0 %vm599_vm2, %v11003_v42  ;;  %9348 = vmatprep.mubr.msk.f32.mxu1 %vm599_vm2, %v3214_v59  ;;  %v3221_v22 = vrot.slane %v11411_v8, 5  ;;  %v3223_v50 = vrot.slane %v11036_v9, 5 }
 0x127   : > { %v1642_v61 = vadd.f32 %v8991_v51, %v11006_v33  ;;  %9284 = vmatprep.mubr.msk.f32.mxu0 %vm599_vm2, %v11011_v58  ;;  %v11407_v26 = vpop.f32.mrf.mxu1  ;;  %v11421_v33 = vld [vmem:[%s10142_s18 + $0x138] sm:$0xff] }
 0x128   : > { %v1470_v42 = vpop.f32.mrf.mxu0  ;;  %v3222_v51 = vsel %vm3155_vm5, %v3219_v21, %v3221_v22  ;;  %v3224_v21 = vsel %vm3155_vm5, %v3221_v22, %v3223_v50  ;;  %v3592_v22 = vrot.slane %v11061_v35, 6 }
 0x129   : > { %v11415_v59 = vadd.f32 %v1470_v42, %v11016_v40  ;;  %v11417_v38 = vadd.f32 %v9055_v10, %v1642_v61  ;;  %v9058_v41 = vpop.f32.mrf.mxu1  ;;  %9349 = vmatmul.mubr.msk.f32.gmra.mxu1 %vm599_vm2, %v3216_v37  ;;  %v3225_v37 = vrot.slane %v11421_v33, 5  ;;  %v11437_v42 = vld [vmem:[%s10142_s18 + $0x140] sm:$0xf] }
 0x12a   : > { %v8994_v58 = vpop.f32.mrf.mxu0  ;;  %9285 = vmatmul.mubr.msk.f32.gmra.mxu0 %vm599_vm2, %v11024_v45  ;;  %9351 = vmatprep.mubr.msk.f32.mxu1 %vm599_vm2, %v3218_v19  ;;  %v2857_v45 = vrot.slane %v11421_v33, 4 }
 0x12b   : > { %v1644_v40 = vadd.f32 %v8994_v58, %v11028_v46  ;;  %9287 = vmatprep.mubr.msk.f32.mxu0 %vm599_vm2, %v11033_v29  ;;  %v11431_v10 = vpop.f32.mrf.mxu1  ;;  %v3227_v58 = vrot.slane %v11437_v42, 5 }
 0x12c   : > { %13406 = vst [vmem:[#allocation33_spill] sm:$0xff] %v11431_v10  ;;  %v1480_v61 = vpop.f32.mrf.mxu0 }
 0x12d   : > { %v11440_v17 = vadd.f32 %v1480_v61, %v11041_v20  ;;  %v11442_v19 = vadd.f32 %v9058_v41, %v1644_v40  ;;  %v9061_v46 = vpop.f32.mrf.mxu1  ;;  %9352 = vmatmul.mubr.msk.f32.gmra.mxu1 %vm599_vm2, %v3220_v16  ;;  %v2859_v41 = vrot.slane %v11437_v42, 4  ;;  %v3226_v16 = vsel %vm3155_vm5, %v3223_v50, %v3225_v37 }
 0x12e   : > { %v8997_v29 = vpop.f32.mrf.mxu0  ;;  %9288 = vmatmul.mubr.msk.f32.gmra.mxu0 %vm599_vm2, %v11050_v32  ;;  %9354 = vmatprep.mubr.msk.f32.mxu1 %vm599_vm2, %v3222_v51  ;;  %v13409_v32 = vrot.slane %v11036_v9, 4  ;;  %v3593_v61 = vrot.slane %v11065_v31, 6  ;;  %v3228_v9 = vsel %vm3155_vm5, %v3225_v37, %v3227_v58 }
 0x12f   : > { %13407 = vst [vmem:[#allocation34_spill] sm:$0xff] %v11440_v17  ;;  %v1646_v10 = vadd.f32 %v8997_v29, %v11054_v28  ;;  %9290 = vmatprep.mubr.msk.f32.mxu0 %vm599_vm2, %v11058_v27  ;;  %v11453_v20 = vpop.f32.mrf.mxu1  ;;  %v13410_v17 = vld [vmem:[#allocation3_spill] sm:$0xff]  ;;  %v2860_v50 = vsel %vm672_vm0, %v2857_v45, %v2859_v41 }
 0x130   : > { %13408 = vst [vmem:[#allocation35_spill] sm:$0xff] %v11453_v20  ;;  %v1490_v40 = vpop.f32.mrf.mxu0  ;;  %v2858_v51 = vsel %vm672_vm0, %v13409_v32, %v2857_v45  ;;  %v13412_v32 = vld [vmem:[#allocation5_spill] sm:$0xff] }
 0x131   : > { %v11463_v28 = vadd.f32 %v1490_v40, %v13410_v17  ;;  %v11465_v29 = vadd.f32 %v9061_v46, %v1646_v10  ;;  %v9064_v27 = vpop.f32.mrf.mxu1  ;;  %9355 = vmatmul.mubr.msk.f32.gmra.mxu1 %vm599_vm2, %v3224_v21  ;;  %v3595_v10 = vrot.slane %v11082_v43, 6  ;;  %v3594_v46 = vsel %vm3591_vm6, %v3592_v22, %v3593_v61  ;;  %v13413_v22 = vld [vmem:[#allocation6_spill] sm:$0xff] }
 0x132   : > { %v9000_v20 = vpop.f32.mrf.mxu0  ;;  %9291 = vmatmul.mubr.msk.f32.gmra.mxu0 %vm599_vm2, %v11079_v60  ;;  %9357 = vmatprep.mubr.msk.f32.mxu1 %vm599_vm2, %v3226_v16  ;;  %v3597_v21 = vrot.slane %v11091_v3, 6  ;;  %v13411_v60 = vld [vmem:[#allocation4_spill] sm:$0xff]  ;;  %v3599_v3 = vrot.slane %v11102_v48, 6 }
 0x133   : > { %v1648_v35 = vadd.f32 %v9000_v20, %v11085_v23  ;;  %9293 = vmatprep.mubr.msk.f32.mxu0 %vm599_vm2, %v2858_v51  ;;  %v11474_v31 = vpop.f32.mrf.mxu1  ;;  %v3596_v58 = vsel %vm3591_vm6, %v3593_v61, %v3595_v10  ;;  %v3601_v51 = vrot.slane %v13412_v32, 6 }
 0x134   : > { %v1500_v17 = vpop.f32.mrf.mxu0  ;;  %v3598_v41 = vsel %vm3591_vm6, %v3595_v10, %v3597_v21  ;;  %v3600_v48 = vsel %vm3591_vm6, %v3597_v21, %v3599_v3  ;;  %v3603_v10 = vrot.slane %v11125_v15, 6 }
 0x135   : > { %v11481_v40 = vadd.f32 %v1500_v17, %v13411_v60  ;;  %v11483_v16 = vadd.f32 %v9064_v27, %v1648_v35  ;;  %v9067_v37 = vpop.f32.mrf.mxu1  ;;  %9358 = vmatmul.mubr.msk.f32.gmra.mxu1 %vm599_vm2, %v3228_v9  ;;  %v13414_v60 = vld [vmem:[#allocation7_spill] sm:$0xff] }
 0x136   : > { %v9003_v23 = vpop.f32.mrf.mxu0  ;;  %9294 = vmatmul.mubr.msk.f32.gmra.mxu0 %vm599_vm2, %v2860_v50  ;;  %v3604_v15 = vsel %vm3591_vm6, %v3601_v51, %v3603_v10 }
 0x137   : > { %v1650_v45 = vadd.f32 %v9003_v23, %v11105_v7  ;;  %9370 = vmatprep.mubr.msk.f32.mxu0 %vm599_vm2, %v3594_v46  ;;  %v11489_v43 = vpop.f32.mrf.mxu1  ;;  %v3602_v46 = vsel %vm3591_vm6, %v3599_v3, %v3601_v51  ;;  %v13415_v23 = vld [vmem:[#allocation8_spill] sm:$0xff]  ;;  %v13417_v3 = vld [vmem:[#allocation9_spill] sm:$0xff] }
 0x138   : > { %v1510_v20 = vpop.f32.mrf.mxu0  ;;  %v3607_v32 = vrot.slane %v13417_v3, 6 }
 0x139   : > { %v11496_v27 = vadd.f32 %v1510_v20, %v13413_v22  ;;  %v11498_v9 = vadd.f32 %v9067_v37, %v1650_v45  ;;  %v9070_v35 = vpop.f32.mrf.mxu1  ;;  %v3605_v37 = vrot.slane %v13414_v60, 6 }
 0x13a   : > { %v9006_v7 = vpop.f32.mrf.mxu0  ;;  %9371 = vmatmul.mubr.msk.f32.vlgmr.msra.gmra.mxu0 %vm599_vm2, %v3596_v58 }
 0x13b   : > { %v1652_v50 = vadd.f32 %v9006_v7, %v11128_v53  ;;  %9373 = vmatprep.mubr.msk.f32.mxu0 %vm599_vm2, %v3598_v41  ;;  %v11503_v61 = vpop.f32.mrf.mxu1  ;;  %v3606_v7 = vsel %vm3591_vm6, %v3603_v10, %v3605_v37  ;;  %v13421_v10 = vld [vmem:[#allocation11_spill] sm:$0xff] }
 0x13c   : > { %v1520_v17 = vpop.f32.mrf.mxu0 }
 0x13d   : > { %v11510_v45 = vadd.f32 %v1520_v17, %v13415_v23  ;;  %v11512_v20 = vadd.f32 %v9070_v35, %v1652_v50  ;;  %v9073_v58 = vpop.f32.mrf.mxu1  ;;  %v3609_v35 = vrot.slane %v11162_v55, 6  ;;  %v13418_v50 = vld [vmem:[#allocation10_spill] sm:$0xff]  ;;  %v3608_v23 = vsel %vm3591_vm6, %v3605_v37, %v3607_v32 }
 0x13e   : > { %v9009_v53 = vpop.f32.mrf.mxu0  ;;  %9374 = vmatmul.mubr.msk.f32.gmra.mxu0 %vm599_vm2, %v3600_v48 }
 0x13f   : > { %v1654_v41 = vadd.f32 %v9009_v53, %v11156_v13  ;;  %9376 = vmatprep.mubr.msk.f32.mxu0 %vm599_vm2, %v3602_v46  ;;  %v11517_v21 = vpop.f32.mrf.mxu1  ;;  %v3611_v53 = vrot.slane %v13421_v10, 6  ;;  %v3610_v3 = vsel %vm3591_vm6, %v3607_v32, %v3609_v35  ;;  %v13424_v32 = vld [vmem:[#allocation12_spill] sm:$0xff] }
 0x140   : > { %13416 = vst [vmem:[#allocation3_spill] sm:$0xff] %v11517_v21  ;;  %v1530_v22 = vpop.f32.mrf.mxu0 }
 0x141   : > { %v11524_v17 = vadd.f32 %v1530_v22, %v13418_v50  ;;  %v11526_v60 = vadd.f32 %v9073_v58, %v1654_v41  ;;  %v9076_v48 = vpop.f32.mrf.mxu1  ;;  %v3613_v58 = vrot.slane %v11185_v57, 6  ;;  %v3612_v50 = vsel %vm3591_vm6, %v3609_v35, %v3611_v53 }
 0x142   : > { %v9012_v13 = vpop.f32.mrf.mxu0  ;;  %9377 = vmatmul.mubr.msk.f32.gmra.mxu0 %vm599_vm2, %v3604_v15 }
 0x143   : > { %13419 = vst [vmem:[#allocation4_spill] sm:$0xff] %v11524_v17  ;;  %v1656_v46 = vadd.f32 %v9012_v13, %v11179_v1  ;;  %9379 = vmatprep.mubr.msk.f32.mxu0 %vm599_vm2, %v3606_v7  ;;  %v11531_v51 = vpop.f32.mrf.mxu1  ;;  %v3615_v13 = vrot.slane %v13424_v32, 6 }
 0x144   : > { %13420 = vst [vmem:[#allocation5_spill] sm:$0xff] %v11531_v51  ;;  %v1540_v55 = vpop.f32.mrf.mxu0 }
 0x145   : > { %v11538_v41 = vadd.f32 %v1540_v55, %v11188_v18  ;;  %v11540_v22 = vadd.f32 %v9076_v48, %v1656_v46  ;;  %v9079_v15 = vpop.f32.mrf.mxu1  ;;  %v3614_v18 = vsel %vm3591_vm6, %v3611_v53, %v3613_v58  ;;  %v3617_v48 = vrot.slane %v11205_v44, 6  ;;  %v13425_v46 = vld [vmem:[#allocation13_spill] sm:$0xff]  ;;  %v13428_v53 = vld [vmem:[#allocation14_spill] sm:$0xff] }
 0x146   : > { %v9015_v1 = vpop.f32.mrf.mxu0  ;;  %9380 = vmatmul.mubr.msk.f32.gmra.mxu0 %vm599_vm2, %v3608_v23  ;;  %v3619_v32 = vrot.slane %v13428_v53, 6 }
 0x147   : > { %13422 = vst [vmem:[#allocation6_spill] sm:$0xff] %v11538_v41  ;;  %v1658_v7 = vadd.f32 %v9015_v1, %v11199_v4  ;;  %9382 = vmatprep.mubr.msk.f32.mxu0 %vm599_vm2, %v3610_v3  ;;  %v11545_v37 = vpop.f32.mrf.mxu1  ;;  %v3616_v1 = vsel %vm3591_vm6, %v3613_v58, %v3615_v13 }
 0x148   : > { %13423 = vst [vmem:[#allocation7_spill] sm:$0xff] %v11545_v37  ;;  %v1550_v57 = vpop.f32.mrf.mxu0 }
 0x149   : > { %v11552_v10 = vadd.f32 %v1550_v57, %v13425_v46  ;;  %v11554_v55 = vadd.f32 %v9079_v15, %v1658_v7  ;;  %v9082_v23 = vpop.f32.mrf.mxu1  ;;  %v3618_v57 = vsel %vm3591_vm6, %v3615_v13, %v3617_v48  ;;  %v3621_v15 = vrot.slane %v11225_v52, 6  ;;  %v13429_v7 = vld [vmem:[#allocation15_spill] sm:$0xff]  ;;  %v13432_v13 = vld [vmem:[#allocation16_spill] sm:$0xff] }
 0x14a   : > { %v9018_v4 = vpop.f32.mrf.mxu0  ;;  %9383 = vmatmul.mubr.msk.f32.gmra.mxu0 %vm599_vm2, %v3612_v50  ;;  %v3623_v53 = vrot.slane %v13432_v13, 6 }
 0x14b   : > { %13426 = vst [vmem:[#allocation8_spill] sm:$0xff] %v11552_v10  ;;  %v1660_v3 = vadd.f32 %v9018_v4, %v11219_v25  ;;  %9385 = vmatprep.mubr.msk.f32.mxu0 %vm599_vm2, %v3614_v18  ;;  %v11559_v35 = vpop.f32.mrf.mxu1  ;;  %v3620_v4 = vsel %vm3591_vm6, %v3617_v48, %v3619_v32 }
 0x14c   : > { %13427 = vst [vmem:[#allocation9_spill] sm:$0xff] %v11559_v35  ;;  %v1560_v44 = vpop.f32.mrf.mxu0 }
 0x14d   : > { %v11566_v46 = vadd.f32 %v1560_v44, %v13429_v7  ;;  %v11568_v37 = vadd.f32 %v9082_v23, %v1660_v3  ;;  %v9085_v50 = vpop.f32.mrf.mxu1  ;;  %v3622_v44 = vsel %vm3591_vm6, %v3619_v32, %v3621_v15  ;;  %v3625_v23 = vrot.slane %v11245_v39, 6  ;;  %v13433_v3 = vld [vmem:[#allocation17_spill] sm:$0xff]  ;;  %v13436_v32 = vld [vmem:[#allocation18_spill] sm:$0xff] }
 0x14e   : > { %v9021_v25 = vpop.f32.mrf.mxu0  ;;  %9386 = vmatmul.mubr.msk.f32.gmra.mxu0 %vm599_vm2, %v3616_v1  ;;  %v3627_v13 = vrot.slane %v13436_v32, 6 }
 0x14f   : > { %13430 = vst [vmem:[#allocation10_spill] sm:$0xff] %v11566_v46  ;;  %v1662_v18 = vadd.f32 %v9021_v25, %v11239_v36  ;;  %9388 = vmatprep.mubr.msk.f32.mxu0 %vm599_vm2, %v3618_v57  ;;  %v11573_v58 = vpop.f32.mrf.mxu1  ;;  %v3624_v25 = vsel %vm3591_vm6, %v3621_v15, %v3623_v53 }
 0x150   : > { %13431 = vst [vmem:[#allocation11_spill] sm:$0xff] %v11573_v58  ;;  %v1570_v52 = vpop.f32.mrf.mxu0 }
 0x151   : > { %v11580_v7 = vadd.f32 %v1570_v52, %v13433_v3  ;;  %v11582_v35 = vadd.f32 %v9085_v50, %v1662_v18  ;;  %v9088_v1 = vpop.f32.mrf.mxu1  ;;  %v3626_v52 = vsel %vm3591_vm6, %v3623_v53, %v3625_v23  ;;  %v3629_v50 = vrot.slane %v11265_v6, 6  ;;  %v13437_v18 = vld [vmem:[#allocation19_spill] sm:$0xff]  ;;  %v13440_v53 = vld [vmem:[#allocation20_spill] sm:$0xff] }
 0x152   : > { %v9024_v36 = vpop.f32.mrf.mxu0  ;;  %9389 = vmatmul.mubr.msk.f32.gmra.mxu0 %vm599_vm2, %v3620_v4  ;;  %v3631_v32 = vrot.slane %v13440_v53, 6 }
 0x153   : > { %13434 = vst [vmem:[#allocation12_spill] sm:$0xff] %v11580_v7  ;;  %v1664_v57 = vadd.f32 %v9024_v36, %v11259_v11  ;;  %9391 = vmatprep.mubr.msk.f32.mxu0 %vm599_vm2, %v3622_v44  ;;  %v11587_v48 = vpop.f32.mrf.mxu1  ;;  %v3628_v36 = vsel %vm3591_vm6, %v3625_v23, %v3627_v13 }
 0x154   : > { %13435 = vst [vmem:[#allocation13_spill] sm:$0xff] %v11587_v48  ;;  %v1580_v39 = vpop.f32.mrf.mxu0 }
 0x155   : > { %v11594_v3 = vadd.f32 %v1580_v39, %v13437_v18  ;;  %v11596_v58 = vadd.f32 %v9088_v1, %v1664_v57  ;;  %v9091_v4 = vpop.f32.mrf.mxu1  ;;  %v3630_v39 = vsel %vm3591_vm6, %v3627_v13, %v3629_v50  ;;  %v3633_v1 = vrot.slane %v11285_v14, 6  ;;  %v13441_v57 = vld [vmem:[#allocation21_spill] sm:$0xff]  ;;  %v13444_v13 = vld [vmem:[#allocation22_spill] sm:$0xff] }
 0x156   : > { %v9027_v11 = vpop.f32.mrf.mxu0  ;;  %9392 = vmatmul.mubr.msk.f32.gmra.mxu0 %vm599_vm2, %v3624_v25  ;;  %v3635_v53 = vrot.slane %v13444_v13, 6 }
 0x157   : > { %13438 = vst [vmem:[#allocation14_spill] sm:$0xff] %v11594_v3  ;;  %v1666_v44 = vadd.f32 %v9027_v11, %v11279_v24  ;;  %9394 = vmatprep.mubr.msk.f32.mxu0 %vm599_vm2, %v3626_v52  ;;  %v11601_v15 = vpop.f32.mrf.mxu1  ;;  %v3632_v11 = vsel %vm3591_vm6, %v3629_v50, %v3631_v32 }
 0x158   : > { %13439 = vst [vmem:[#allocation15_spill] sm:$0xff] %v11601_v15  ;;  %v1590_v6 = vpop.f32.mrf.mxu0 }
 0x159   : > { %v11608_v18 = vadd.f32 %v1590_v6, %v13441_v57  ;;  %v11610_v48 = vadd.f32 %v9091_v4, %v1666_v44  ;;  %v9094_v25 = vpop.f32.mrf.mxu1  ;;  %v3634_v6 = vsel %vm3591_vm6, %v3631_v32, %v3633_v1  ;;  %v3637_v4 = vrot.slane %v11305_v5, 6  ;;  %v13445_v44 = vld [vmem:[#allocation23_spill] sm:$0xff]  ;;  %v13448_v32 = vld [vmem:[#allocation24_spill] sm:$0xff] }
 0x15a   : > { %v9030_v24 = vpop.f32.mrf.mxu0  ;;  %9395 = vmatmul.mubr.msk.f32.gmra.mxu0 %vm599_vm2, %v3628_v36  ;;  %v3639_v13 = vrot.slane %v13448_v32, 6 }
 0x15b   : > { %13442 = vst [vmem:[#allocation16_spill] sm:$0xff] %v11608_v18  ;;  %v1668_v52 = vadd.f32 %v9030_v24, %v11299_v47  ;;  %9397 = vmatprep.mubr.msk.f32.mxu0 %vm599_vm2, %v3630_v39  ;;  %v11615_v23 = vpop.f32.mrf.mxu1  ;;  %v3636_v24 = vsel %vm3591_vm6, %v3633_v1, %v3635_v53 }
 0x15c   : > { %13443 = vst [vmem:[#allocation17_spill] sm:$0xff] %v11615_v23  ;;  %v1600_v14 = vpop.f32.mrf.mxu0 }
 0x15d   : > { %v11622_v57 = vadd.f32 %v1600_v14, %v13445_v44  ;;  %v11624_v15 = vadd.f32 %v9094_v25, %v1668_v52  ;;  %v9097_v36 = vpop.f32.mrf.mxu1  ;;  %v3638_v14 = vsel %vm3591_vm6, %v3635_v53, %v3637_v4  ;;  %v3641_v25 = vrot.slane %v11325_v12, 6  ;;  %v13451_v53 = vld [vmem:[#allocation25_spill] sm:$0xff] }
 0x15e   : > { %v9033_v47 = vpop.f32.mrf.mxu0  ;;  %9398 = vmatmul.mubr.msk.f32.gmra.mxu0 %vm599_vm2, %v3632_v11  ;;  %v3643_v32 = vrot.slane %v13451_v53, 6 }
 0x15f   : > { %13446 = vst [vmem:[#allocation18_spill] sm:$0xff] %v11622_v57  ;;  %v1670_v39 = vadd.f32 %v9033_v47, %v11319_v34  ;;  %9400 = vmatprep.mubr.msk.f32.mxu0 %vm599_vm2, %v3634_v6  ;;  %v11629_v50 = vpop.f32.mrf.mxu1  ;;  %v3640_v47 = vsel %vm3591_vm6, %v3637_v4, %v3639_v13 }
 0x160   : > { %13447 = vst [vmem:[#allocation19_spill] sm:$0xff] %v11629_v50  ;;  %v1610_v5 = vpop.f32.mrf.mxu0  ;;  %v3644_v4 = vsel %vm3591_vm6, %v3641_v25, %v3643_v32 }
 0x161   : > { %v11636_v52 = vadd.f32 %v1610_v5, %v11328_v2  ;;  %v11638_v44 = vadd.f32 %v9097_v36, %v1670_v39  ;;  %v9100_v11 = vpop.f32.mrf.mxu1  ;;  %v3642_v2 = vsel %vm3591_vm6, %v3639_v13, %v3641_v25  ;;  %v3645_v36 = vrot.slane %v11347_v62, 6  ;;  %v4146_v62 = vld [vmem:[%s13348_s4 + $0x38] sm:$0xff] }
 0x162   : > { %v9036_v34 = vpop.f32.mrf.mxu0  ;;  %9401 = vmatmul.mubr.msk.f32.gmra.mxu0 %vm599_vm2, %v3636_v24  ;;  %9424 = vmatprep.subr.mxu1 %v4146_v62 }
 0x163   : > { %13449 = vst [vmem:[#allocation20_spill] sm:$0xff] %v11636_v52  ;;  %v1672_v6 = vadd.f32 %v9036_v34, %v11339_v49  ;;  %9403 = vmatprep.mubr.msk.f32.mxu0 %vm599_vm2, %v3638_v14  ;;  %v11643_v1 = vpop.f32.mrf.mxu1  ;;  %v13454_v34 = vld [vmem:[#allocation28_spill] sm:$0xff]  ;;  %9425 = vmatpush3.msra.mxu1 %v4146_v62 }
 0x164   : > { %13450 = vst [vmem:[#allocation21_spill] sm:$0xff] %v11643_v1  ;;  %v11647_v12 = vpop.f32.mrf.mxu0  ;;  %v3647_v53 = vrot.slane %v13454_v34, 6 }
 0x165   : > { %13452 = vst [vmem:[#allocation22_spill] sm:$0xff] %v11647_v12  ;;  %v11651_v39 = vadd.f32 %v9100_v11, %v1672_v6  ;;  %v9103_v5 = vpop.f32.mrf.mxu1  ;;  %v3646_v11 = vsel %vm3591_vm6, %v3643_v32, %v3645_v36  ;;  %v13456_v6 = vld [vmem:[#allocation30_spill] sm:$0xff]  ;;  %v13457_v32 = vld [vmem:[#allocation32_spill] sm:$0xff]  ;;  %v3661_v12 = vrot.slane %v11421_v33, 6 }
 0x166   : > { %v9039_v24 = vpop.f32.mrf.mxu0  ;;  %9404 = vmatmul.mubr.msk.f32.gmra.mxu0 %vm599_vm2, %v3640_v47  ;;  %v3649_v47 = vrot.slane %v13456_v6, 6  ;;  %v4144_v33 = vld [vmem:[%s13348_s4 + $0x28] sm:$0xff] }
 0x167   : > { %v1674_v49 = vadd.f32 %v9039_v24, %v11361_v56  ;;  %9406 = vmatprep.mubr.msk.f32.mxu0 %vm599_vm2, %v3642_v2  ;;  %v11656_v14 = vpop.f32.mrf.mxu1 }
 0x168   : > { %13453 = vst [vmem:[#allocation23_spill] sm:$0xff] %v11656_v14  ;;  %v11663_v13 = vpop.f32.mrf.mxu0  ;;  %v3648_v14 = vsel %vm3591_vm6, %v3645_v36, %v3647_v53 }
 0x169   : > { %13455 = vst [vmem:[#allocation24_spill] sm:$0xff] %v11663_v13  ;;  %v11667_v56 = vadd.f32 %v9103_v5, %v1674_v49  ;;  %v9180_v2 = vpop.f32.mrf.mxu1  ;;  %v3651_v13 = vrot.slane %v13457_v32, 6  ;;  %v3650_v5 = vsel %vm3591_vm6, %v3647_v53, %v3649_v47  ;;  %v3653_v49 = vrot.slane %v11390_v0, 6 }
 0x16a   : > { %v9116_v24 = vpop.f32.mrf.mxu0  ;;  %9407 = vmatmul.mubr.msk.f32.gmra.mxu0 %vm599_vm2, %v3644_v4 }
 0x16b   : > { %v2379_v25 = vadd.f32 %v9116_v24, %v11396_v54  ;;  %9409 = vmatprep.mubr.msk.f32.mxu0 %vm599_vm2, %v3646_v11  ;;  %v11672_v34 = vpop.f32.mrf.mxu1  ;;  %v3652_v36 = vsel %vm3591_vm6, %v3649_v47, %v3651_v13  ;;  %v10009_v24 = vld [vmem:[%s10142_s18 + $0x120] sm:$0xff]  ;;  %v3654_v0 = vsel %vm3591_vm6, %v3651_v13, %v3653_v49 }
 0x16c   : > { %v11676_v6 = vpop.f32.mrf.mxu0  ;;  %v3655_v32 = vrot.slane %v10009_v24, 6 }
 0x16d   : > { %v11680_v62 = vadd.f32 %v9180_v2, %v2379_v25  ;;  %v9183_v4 = vpop.f32.mrf.mxu1  ;;  %v3657_v2 = vrot.slane %v11411_v8, 6  ;;  %v10010_v8 = vld [vmem:[%s10142_s18 + $0x130] sm:$0xff] }
 0x16e   : > { %v9119_v1 = vpop.f32.mrf.mxu0  ;;  %9410 = vmatmul.mubr.msk.f32.gmra.mxu0 %vm599_vm2, %v3648_v14  ;;  %v3656_v13 = vsel %vm3591_vm6, %v3653_v49, %v3655_v32 }
 0x16f   : > { %v2381_v54 = vadd.f32 %v9119_v1, %v11417_v38  ;;  %9412 = vmatprep.mubr.msk.f32.mxu0 %vm599_vm2, %v3650_v5  ;;  %v11685_v11 = vpop.f32.mrf.mxu1  ;;  %v4145_v38 = vld [vmem:[%s13348_s4 + $0x30] sm:$0xff]  ;;  %v3658_v24 = vsel %vm3591_vm6, %v3655_v32, %v3657_v2 }
 0x170   : > { %v11689_v53 = vpop.f32.mrf.mxu0  ;;  %9426 = vmatprep.subr.mxu1 %v4145_v38 }
 0x171   : > { %v11693_v25 = vadd.f32 %v9183_v4, %v2381_v54  ;;  %v9186_v14 = vpop.f32.mrf.mxu1  ;;  %v3659_v4 = vrot.slane %v10010_v8, 6  ;;  %9427 = vmatpush3.msra.mxu1 %v4145_v38  ;;  %v3663_v38 = vrot.slane %v11437_v42, 6  ;;  %v4142_v8 = vld [vmem:[%s13348_s4 + $0x18] sm:$0xff] }
 0x172   : > { %v9122_v1 = vpop.f32.mrf.mxu0  ;;  %9413 = vmatmul.mubr.msk.f32.gmra.mxu0 %vm599_vm2, %v3652_v36  ;;  %9428 = vmatprep.subr.mxu1 %v4144_v33 }
 0x173   : > { %v2383_v47 = vadd.f32 %v9122_v1, %v11442_v19  ;;  %9415 = vmatprep.mubr.msk.f32.mxu0 %vm599_vm2, %v3654_v0  ;;  %v11701_v5 = vpop.f32.mrf.mxu1  ;;  %v3660_v0 = vsel %vm3591_vm6, %v3657_v2, %v3659_v4  ;;  %9429 = vmatpush3.msra.mxu1 %v4144_v33 }
 0x174   : > { %v11705_v54 = vpop.f32.mrf.mxu0 }
 0x175   : > { %v11709_v50 = vadd.f32 %v9186_v14, %v2383_v47  ;;  %v9189_v36 = vpop.f32.mrf.mxu1  ;;  %v3662_v14 = vsel %vm3591_vm6, %v3659_v4, %v3661_v12 }
 0x176   : > { %v9125_v52 = vpop.f32.mrf.mxu0  ;;  %9416 = vmatmul.mubr.msk.f32.gmra.mxu0 %vm599_vm2, %v3656_v13  ;;  %v3664_v13 = vsel %vm3591_vm6, %v3661_v12, %v3663_v38  ;;  %v4140_v38 = vld [vmem:[%s13348_s4 + $0x8] sm:$0xff] }
 0x177   : > { %v2385_v19 = vadd.f32 %v9125_v52, %v11465_v29  ;;  %9418 = vmatprep.mubr.msk.f32.mxu0 %vm599_vm2, %v3658_v24  ;;  %v11714_v49 = vpop.f32.mrf.mxu1  ;;  %v4143_v52 = vld [vmem:[%s13348_s4 + $0x20] sm:$0xff] }
 0x178   : > { %v11721_v32 = vpop.f32.mrf.mxu0  ;;  %9430 = vmatprep.subr.mxu1 %v4143_v52 }
 0x179   : > { %v11724_v1 = vadd.f32 %v9189_v36, %v2385_v19  ;;  %v9192_v29 = vpop.f32.mrf.mxu1  ;;  %9431 = vmatpush3.msra.mxu1 %v4143_v52  ;;  %v4139_v52 = vld [vmem:[%s13348_s4] sm:$0xff] }
 0x17a   : > { %v9128_v2 = vpop.f32.mrf.mxu0  ;;  %9419 = vmatmul.mubr.msk.f32.gmra.mxu0 %vm599_vm2, %v3660_v0  ;;  %9432 = vmatprep.subr.mxu1 %v4142_v8 }
 0x17b   : > { %v2387_v42 = vadd.f32 %v9128_v2, %v11483_v16  ;;  %9421 = vmatprep.mubr.msk.f32.mxu0 %vm599_vm2, %v3662_v14  ;;  %v11732_v47 = vpop.f32.mrf.mxu1  ;;  %9433 = vmatpush3.msra.mxu1 %v4142_v8  ;;  %v4141_v16 = vld [vmem:[%s13348_s4 + $0x10] sm:$0xff] }
 0x17c   : > { %v11738_v4 = vpop.f32.mrf.mxu0  ;;  %9434 = vmatprep.subr.mxu1 %v4141_v16 }
 0x17d   : > { %v11740_v24 = vadd.f32 %v9192_v29, %v2387_v42  ;;  %v9195_v36 = vpop.f32.mrf.mxu1  ;;  %9435 = vmatpush3.msra.mxu1 %v4141_v16 }
 0x17e   : > { %v9131_v19 = vpop.f32.mrf.mxu0  ;;  %9422 = vmatmul.mubr.msk.f32.gmra.mxu0 %vm599_vm2, %v3664_v13  ;;  %9436 = vmatprep.subr.mxu1 %v4140_v38 }
 0x17f   : > { %v2389_v12 = vadd.f32 %v9131_v19, %v11498_v9  ;;  %v11747_v0 = vpop.f32.mrf.mxu1  ;;  %9437 = vmatpush3.msra.mxu1 %v4140_v38 }
 0x180   : > { %v11752_v33 = vpop.f32.mrf.mxu0  ;;  %9438 = vmatprep.subr.mxu1 %v4139_v52 }
 0x181   : > { %v11754_v14 = vadd.f32 %v9195_v36, %v2389_v12  ;;  %v9198_v29 = vpop.f32.mrf.mxu1  ;;  %9439 = vmatpush3.msra.mxu1 %v4139_v52 }
 0x182   : > { %v9134_v2 = vpop.f32.mrf.mxu0 }
 0x183   : > { %v2391_v9 = vadd.f32 %v9134_v2, %v11512_v20  ;;  %v11760_v42 = vpop.f32.mrf.mxu1 }
 0x184   : > { %13458 = vst [vmem:[#allocation25_spill] sm:$0xff] %v11760_v42  ;;  %v11762_v13 = vpop.f32.mrf.mxu0 }
 0x185   : > { %v11764_v8 = vadd.f32 %v9198_v29, %v2391_v9  ;;  %v9201_v16 = vpop.f32.mrf.mxu1 }
 0x186   : > { %v9137_v36 = vpop.f32.mrf.mxu0 }
 0x187   : > { %v2393_v19 = vadd.f32 %v9137_v36, %v11526_v60  ;;  %v11767_v12 = vpop.f32.mrf.mxu1 }
 0x188   : > { %13459 = vst [vmem:[#allocation28_spill] sm:$0xff] %v11767_v12  ;;  %v11769_v38 = vpop.f32.mrf.mxu0 }
 0x189   : > { %13460 = vst [vmem:[#allocation30_spill] sm:$0xff] %v11769_v38  ;;  %v11771_v23 = vadd.f32 %v9201_v16, %v2393_v19  ;;  %v9204_v57 = vpop.f32.mrf.mxu1 }
 0x18a   : > { %v9140_v18 = vpop.f32.mrf.mxu0 }
 0x18b   : > { %v2395_v20 = vadd.f32 %v9140_v18, %v11540_v22  ;;  %v11774_v2 = vpop.f32.mrf.mxu1 }
 0x18c   : > { %13461 = vst [vmem:[#allocation32_spill] sm:$0xff] %v11774_v2  ;;  %v11776_v52 = vpop.f32.mrf.mxu0 }
 0x18d   : > { %13462 = vst [vmem:[#allocation36_spill] sm:$0xff] %v11776_v52  ;;  %v11778_v29 = vadd.f32 %v9204_v57, %v2395_v20  ;;  %v9207_v9 = vpop.f32.mrf.mxu1 }
 0x18e   : > { %v9143_v3 = vpop.f32.mrf.mxu0 }
 0x18f   : > { %v2397_v60 = vadd.f32 %v9143_v3, %v11554_v55  ;;  %v11781_v36 = vpop.f32.mrf.mxu1 }
 0x190   : > { %13463 = vst [vmem:[#allocation37_spill] sm:$0xff] %v11781_v36  ;;  %v11783_v7 = vpop.f32.mrf.mxu0 }
 0x191   : > { %13464 = vst [vmem:[#allocation38_spill] sm:$0xff] %v11783_v7  ;;  %v11785_v16 = vadd.f32 %v9207_v9, %v2397_v60  ;;  %v9210_v19 = vpop.f32.mrf.mxu1 }
 0x192   : > { %v9146_v46 = vpop.f32.mrf.mxu0 }
 0x193   : > { %v2399_v22 = vadd.f32 %v9146_v46, %v11568_v37  ;;  %v11788_v18 = vpop.f32.mrf.mxu1 }
 0x194   : > { %13465 = vst [vmem:[#allocation39_spill] sm:$0xff] %v11788_v18  ;;  %v11790_v2 = vpop.f32.mrf.mxu0 }
 0x195   : > { %13466 = vst [vmem:[#allocation40_spill] sm:$0xff] %v11790_v2  ;;  %v11792_v57 = vadd.f32 %v9210_v19, %v2399_v22  ;;  %v9213_v20 = vpop.f32.mrf.mxu1 }
 0x196   : > { %v9149_v10 = vpop.f32.mrf.mxu0 }
 0x197   : > { %v2401_v55 = vadd.f32 %v9149_v10, %v11582_v35  ;;  %v11795_v3 = vpop.f32.mrf.mxu1 }
 0x198   : > { %13467 = vst [vmem:[#allocation41_spill] sm:$0xff] %v11795_v3  ;;  %v11797_v36 = vpop.f32.mrf.mxu0 }
 0x199   : > { %13468 = vst [vmem:[#allocation42_spill] sm:$0xff] %v11797_v36  ;;  %v11799_v9 = vadd.f32 %v9213_v20, %v2401_v55  ;;  %v9216_v60 = vpop.f32.mrf.mxu1 }
 0x19a   : > { %v9152_v7 = vpop.f32.mrf.mxu0 }
 0x19b   : > { %v2403_v37 = vadd.f32 %v9152_v7, %v11596_v58  ;;  %v11802_v46 = vpop.f32.mrf.mxu1 }
 0x19c   : > { %13469 = vst [vmem:[#allocation43_spill] sm:$0xff] %v11802_v46  ;;  %v11804_v18 = vpop.f32.mrf.mxu0 }
 0x19d   : > { %13470 = vst [vmem:[#allocation44_spill] sm:$0xff] %v11804_v18  ;;  %v11806_v19 = vadd.f32 %v9216_v60, %v2403_v37  ;;  %v9219_v22 = vpop.f32.mrf.mxu1 }
 0x19e   : > { %v9155_v2 = vpop.f32.mrf.mxu0 }
 0x19f   : > { %v2405_v10 = vadd.f32 %v9155_v2, %v11610_v48  ;;  %v11809_v35 = vpop.f32.mrf.mxu1 }
 0x1a0   : > { %13471 = vst [vmem:[#allocation45_spill] sm:$0xff] %v11809_v35  ;;  %v11811_v3 = vpop.f32.mrf.mxu0 }
 0x1a1   : > { %13472 = vst [vmem:[#allocation46_spill] sm:$0xff] %v11811_v3  ;;  %v11813_v20 = vadd.f32 %v9219_v22, %v2405_v10  ;;  %v9222_v55 = vpop.f32.mrf.mxu1 }
 0x1a2   : > { %v9158_v36 = vpop.f32.mrf.mxu0 }
 0x1a3   : > { %v2407_v58 = vadd.f32 %v9158_v36, %v11624_v15  ;;  %v11816_v7 = vpop.f32.mrf.mxu1 }
 0x1a4   : > { %13473 = vst [vmem:[#allocation47_spill] sm:$0xff] %v11816_v7  ;;  %v11818_v46 = vpop.f32.mrf.mxu0 }
 0x1a5   : > { %13474 = vst [vmem:[#allocation48_spill] sm:$0xff] %v11818_v46  ;;  %v11820_v60 = vadd.f32 %v9222_v55, %v2407_v58  ;;  %v9225_v37 = vpop.f32.mrf.mxu1 }
 0x1a6   : > { %v9161_v18 = vpop.f32.mrf.mxu0 }
 0x1a7   : > { %v2409_v48 = vadd.f32 %v9161_v18, %v11638_v44  ;;  %v11823_v2 = vpop.f32.mrf.mxu1 }
 0x1a8   : > { %13475 = vst [vmem:[#allocation49_spill] sm:$0xff] %v11823_v2  ;;  %v11825_v35 = vpop.f32.mrf.mxu0 }
 0x1a9   : > { %13476 = vst [vmem:[#allocation50_spill] sm:$0xff] %v11825_v35  ;;  %v11827_v22 = vadd.f32 %v9225_v37, %v2409_v48  ;;  %v9228_v10 = vpop.f32.mrf.mxu1 }
 0x1aa   : > { %v9164_v3 = vpop.f32.mrf.mxu0 }
 0x1ab   : > { %v2411_v15 = vadd.f32 %v9164_v3, %v11651_v39  ;;  %v11830_v36 = vpop.f32.mrf.mxu1 }
 0x1ac   : > { %13477 = vst [vmem:[#allocation51_spill] sm:$0xff] %v11830_v36  ;;  %v11832_v7 = vpop.f32.mrf.mxu0 }
 0x1ad   : > { %13478 = vst [vmem:[#allocation52_spill] sm:$0xff] %v11832_v7  ;;  %v11834_v55 = vadd.f32 %v9228_v10, %v2411_v15  ;;  %v9231_v58 = vpop.f32.mrf.mxu1 }
 0x1ae   : > { %v9167_v46 = vpop.f32.mrf.mxu0 }
 0x1af   : > { %v2413_v44 = vadd.f32 %v9167_v46, %v11667_v56  ;;  %v11837_v18 = vpop.f32.mrf.mxu1 }
 0x1b0   : > { %13479 = vst [vmem:[#allocation53_spill] sm:$0xff] %v11837_v18  ;;  %v11839_v2 = vpop.f32.mrf.mxu0 }
 0x1b1   : > { %13480 = vst [vmem:[#allocation54_spill] sm:$0xff] %v11839_v2  ;;  %v11841_v37 = vadd.f32 %v9231_v58, %v2413_v44  ;;  %v11843_v48 = vpop.f32.mrf.mxu1 }
 0x1b2   : > { %v9244_v35 = vpop.f32.mrf.mxu0 }
 0x1b3   : > { %v11846_v39 = vadd.f32 %v9244_v35, %v11680_v62  ;;  %v11850_v10 = vpop.f32.mrf.mxu1 }
 0x1b4   : > { %v11848_v3 = vpop.f32.mrf.mxu0 }
 0x1b5   : > { %v11857_v46 = vpop.f32.mrf.mxu1 }
 0x1b6   : > { %v9247_v15 = vpop.f32.mrf.mxu0 }
 0x1b7   : > { %v11853_v36 = vadd.f32 %v9247_v15, %v11693_v25  ;;  %v11862_v18 = vpop.f32.mrf.mxu1 }
 0x1b8   : > { %v11855_v56 = vpop.f32.mrf.mxu0 }
 0x1b9   : > { %v11869_v7 = vpop.f32.mrf.mxu1 }
 0x1ba   : > { %v9250_v58 = vpop.f32.mrf.mxu0 }
 0x1bb   : > { %v11860_v44 = vadd.f32 %v9250_v58, %v11709_v50  ;;  %v11876_v52 = vpop.f32.mrf.mxu1 }
 0x1bc   : > { %v11864_v62 = vpop.f32.mrf.mxu0 }
 0x1bd   : > { %v11883_v41 = vpop.f32.mrf.mxu1 }
 0x1be   : > { %v9253_v35 = vpop.f32.mrf.mxu0 }
 0x1bf   : > { %v11867_v2 = vadd.f32 %v9253_v35, %v11724_v1  ;;  %v11890_v42 = vpop.f32.mrf.mxu1 }
 0x1c0   : > { %v11871_v25 = vpop.f32.mrf.mxu0 }
 0x1c1   : > { %v11897_v17 = vpop.f32.mrf.mxu1 }
 0x1c2   : > { %v9256_v15 = vpop.f32.mrf.mxu0 }
 0x1c3   : > { %v11874_v12 = vadd.f32 %v9256_v15, %v11740_v24 }
 0x1c4   : > { %v11878_v50 = vpop.f32.mrf.mxu0 }
 0x1c6   : > { %v9259_v58 = vpop.f32.mrf.mxu0 }
 0x1c7   : > { %v11881_v51 = vadd.f32 %v9259_v58, %v11754_v14 }
 0x1c8   : > { %v11885_v1 = vpop.f32.mrf.mxu0 }
 0x1c9   : > { %13481 = vst [vmem:[#allocation55_spill] sm:$0xff] %v11881_v51  ;;  %13482 = vst [vmem:[#allocation56_spill] sm:$0xff] %v11885_v1  ;;  %v11904_v1 = vpop.f32.mrf.mxu1 }
 0x1ca   : > { %v9262_v35 = vpop.f32.mrf.mxu0 }
 0x1cb   : > { %v11888_v38 = vadd.f32 %v9262_v35, %v11764_v8 }
 0x1cc   : > { %v11892_v24 = vpop.f32.mrf.mxu0 }
 0x1cd   : > { %13483 = vst [vmem:[#allocation57_spill] sm:$0xff] %v11888_v38  ;;  %13484 = vst [vmem:[#allocation58_spill] sm:$0xff] %v11892_v24  ;;  %v11911_v24 = vpop.f32.mrf.mxu1 }
 0x1ce   : > { %v9265_v15 = vpop.f32.mrf.mxu0 }
 0x1cf   : > { %v11895_v21 = vadd.f32 %v9265_v15, %v11771_v23 }
 0x1d0   : > { %v11899_v14 = vpop.f32.mrf.mxu0 }
 0x1d1   : > { %13485 = vst [vmem:[#allocation59_spill] sm:$0xff] %v11895_v21  ;;  %13486 = vst [vmem:[#allocation60_spill] sm:$0xff] %v11899_v14  ;;  %v11918_v14 = vpop.f32.mrf.mxu1 }
 0x1d2   : > { %v9268_v58 = vpop.f32.mrf.mxu0 }
 0x1d3   : > { %v11902_v51 = vadd.f32 %v9268_v58, %v11778_v29 }
 0x1d4   : > { %v11906_v8 = vpop.f32.mrf.mxu0 }
 0x1d5   : > { %13487 = vst [vmem:[#allocation61_spill] sm:$0xff] %v11902_v51  ;;  %13488 = vst [vmem:[#allocation62_spill] sm:$0xff] %v11906_v8  ;;  %v11925_v8 = vpop.f32.mrf.mxu1 }
 0x1d6   : > { %v9271_v35 = vpop.f32.mrf.mxu0 }
 0x1d7   : > { %v11909_v38 = vadd.f32 %v9271_v35, %v11785_v16 }
 0x1d8   : > { %v11913_v23 = vpop.f32.mrf.mxu0 }
 0x1d9   : > { %13489 = vst [vmem:[#allocation63_spill] sm:$0xff] %v11909_v38  ;;  %13490 = vst [vmem:[#allocation64_spill] sm:$0xff] %v11913_v23  ;;  %v11932_v23 = vpop.f32.mrf.mxu1 }
 0x1da   : > { %v9274_v15 = vpop.f32.mrf.mxu0 }
 0x1db   : > { %v11916_v21 = vadd.f32 %v9274_v15, %v11792_v57 }
 0x1dc   : > { %v11920_v29 = vpop.f32.mrf.mxu0 }
 0x1dd   : > { %13491 = vst [vmem:[#allocation65_spill] sm:$0xff] %v11916_v21  ;;  %13492 = vst [vmem:[#allocation66_spill] sm:$0xff] %v11920_v29  ;;  %v11939_v29 = vpop.f32.mrf.mxu1 }
 0x1de   : > { %v9277_v58 = vpop.f32.mrf.mxu0 }
 0x1df   : > { %v11923_v51 = vadd.f32 %v9277_v58, %v11799_v9 }
 0x1e0   : > { %v11927_v16 = vpop.f32.mrf.mxu0 }
 0x1e1   : > { %13493 = vst [vmem:[#allocation67_spill] sm:$0xff] %v11923_v51  ;;  %13494 = vst [vmem:[#allocation68_spill] sm:$0xff] %v11927_v16  ;;  %v11946_v16 = vpop.f32.mrf.mxu1 }
 0x1e2   : > { %v9280_v35 = vpop.f32.mrf.mxu0 }
 0x1e3   : > { %v11930_v38 = vadd.f32 %v9280_v35, %v11806_v19 }
 0x1e4   : > { %v11934_v57 = vpop.f32.mrf.mxu0 }
 0x1e5   : > { %13495 = vst [vmem:[#allocation69_spill] sm:$0xff] %v11930_v38  ;;  %13496 = vst [vmem:[#allocation70_spill] sm:$0xff] %v11934_v57  ;;  %v1941_v38 = vadd.f32 %v11386_v63, %v11394_v30 }
 0x1e6   : > { %v9283_v15 = vpop.f32.mrf.mxu0 }
 0x1e7   : > { %v11937_v21 = vadd.f32 %v9283_v15, %v11813_v20  ;;  %v11955_v20 = vpop.f32.mrf.mxu1 }
 0x1e8   : > { %v11941_v9 = vpop.f32.mrf.mxu0 }
 0x1e9   : > { %13497 = vst [vmem:[#allocation71_spill] sm:$0xff] %v11937_v21  ;;  %13498 = vst [vmem:[#allocation72_spill] sm:$0xff] %v11941_v9  ;;  %v2378_v21 = vadd.f32 %v11676_v6, %v1941_v38 }
 0x1ea   : > { %v9286_v58 = vpop.f32.mrf.mxu0 }
 0x1eb   : > { %v11944_v51 = vadd.f32 %v9286_v58, %v11820_v60  ;;  %v1943_v60 = vadd.f32 %v11407_v26, %v11415_v59  ;;  %v2813_v63 = vadd.f32 %v11672_v34, %v2378_v21  ;;  %v3550_v21 = vadd.f32 %v11843_v48, %v11846_v39 }
 0x1ec   : > { %v11948_v19 = vpop.f32.mrf.mxu0 }
 0x1ed   : > { %13499 = vst [vmem:[#allocation73_spill] sm:$0xff] %v11944_v51  ;;  %13500 = vst [vmem:[#allocation74_spill] sm:$0xff] %v11948_v19  ;;  %v11965_v51 = vpop.f32.mrf.mxu1  ;;  %v2380_v30 = vadd.f32 %v11689_v53, %v1943_v60  ;;  %v3113_v6 = vadd.f32 %v11848_v3, %v2813_v63  ;;  %v13505_v53 = vld [vmem:[#allocation35_spill] sm:$0xff]  ;;  %v11992_v63 = vld [vmem:[%s13346_s2] ss:$0 sm:$0xff] }
 0x1ee   : > { %v9289_v35 = vpop.f32.mrf.mxu0 }
 0x1ef   : > { %v11953_v57 = vadd.f32 %v9289_v35, %v11827_v22  ;;  %v13503_v35 = vld [vmem:[#allocation34_spill] sm:$0xff]  ;;  %v11977_v26 = vpop.f32.mrf.mxu1  ;;  %v3549_v3 = vadd.f32 %v11850_v10, %v3113_v6  ;;  %v1949_v10 = vadd.f32 %v11474_v31, %v11481_v40  ;;  %v3554_v31 = vadd.f32 %v11869_v7, %v11860_v44 }
 0x1f0   : > { %v11957_v15 = vpop.f32.mrf.mxu0 }
 0x1f1   : > { %13501 = vst [vmem:[#allocation75_spill] sm:$0xff] %v11953_v57  ;;  %13502 = vst [vmem:[#allocation76_spill] sm:$0xff] %v11957_v15  ;;  %v13504_v57 = vld [vmem:[#allocation33_spill] sm:$0xff] }
 0x1f2   : > { %v9292_v9 = vpop.f32.mrf.mxu0  ;;  %v1945_v15 = vadd.f32 %v13504_v57, %v13503_v35  ;;  %v1947_v57 = vadd.f32 %v13505_v53, %v11463_v28  ;;  %v3552_v28 = vadd.f32 %v11857_v46, %v11853_v36 }
 0x1f3   : > { %v11963_v58 = vadd.f32 %v9292_v9, %v11834_v55  ;;  %v2815_v55 = vadd.f32 %v11685_v11, %v2380_v30  ;;  %v11994_v11 = vpop.f32.mrf.mxu1 }
 0x1f4   : > { %v11967_v19 = vpop.f32.mrf.mxu0  ;;  %v2382_v9 = vadd.f32 %v11705_v54, %v1945_v15  ;;  %v2384_v48 = vadd.f32 %v11721_v32, %v1947_v57 }
 0x1f5   : > { %v12007_v32 = vpop.f32.mrf.mxu1 }
 0x1f6   : > { %v9295_v22 = vpop.f32.mrf.mxu0  ;;  %v2817_v15 = vadd.f32 %v11701_v5, %v2382_v9  ;;  %v2386_v5 = vadd.f32 %v11738_v4, %v1949_v10  ;;  %v2819_v36 = vadd.f32 %v11714_v49, %v2384_v48 }
 0x1f7   : > { %v11975_v38 = vadd.f32 %v9295_v22, %v11841_v37  ;;  %v3115_v37 = vadd.f32 %v11855_v56, %v2815_v55  ;;  %v12020_v7 = vpop.f32.mrf.mxu1 }
 0x1f8   : > { %v11979_v59 = vpop.f32.mrf.mxu0  ;;  %v3117_v35 = vadd.f32 %v11864_v62, %v2817_v15  ;;  %v3119_v53 = vadd.f32 %v11871_v25, %v2819_v36  ;;  %v2821_v49 = vadd.f32 %v11732_v47, %v2386_v5  ;;  %v1953_v25 = vadd.f32 %v11503_v61, %v11510_v45 }
 0x1f9   : > { %v3551_v22 = vadd.f32 %v11862_v18, %v3115_v37  ;;  %v1951_v18 = vadd.f32 %v11489_v43, %v11496_v27  ;;  %v3556_v27 = vadd.f32 %v11883_v41, %v11867_v2  ;;  %v3558_v45 = vadd.f32 %v11897_v17, %v11874_v12 }
 0x1fa   : > { %v9372_v34 = vpop.f32.mrf.mxu0  ;;  %v3553_v4 = vadd.f32 %v11876_v52, %v3117_v35  ;;  %v3555_v47 = vadd.f32 %v11890_v42, %v3119_v53  ;;  %v3121_v48 = vadd.f32 %v11878_v50, %v2821_v49  ;;  %v2390_v41 = vadd.f32 %v11762_v13, %v1953_v25  ;;  %v13506_v50 = vld [vmem:[#allocation4_spill] sm:$0xff] }
 0x1fb   : > { %v3986_v60 = vadd.f32 %v9372_v34, %v3550_v21  ;;  %v2388_v43 = vadd.f32 %v11752_v33, %v1951_v18  ;;  %v12034_v33 = vpop.f32.mrf.mxu1  ;;  %v13511_v18 = vld [vmem:[#allocation55_spill] sm:$0xff]  ;;  %v13515_v25 = vld [vmem:[#allocation36_spill] sm:$0xff] }
 0x1fc   : > { %v3806_v54 = vpop.f32.mrf.mxu0  ;;  %v3557_v13 = vadd.f32 %v11904_v1, %v3121_v48  ;;  %v13517_v48 = vld [vmem:[#allocation57_spill] sm:$0xff] }
 0x1fd   : > { %v3985_v39 = vadd.f32 %v3806_v54, %v3549_v3  ;;  %v4029_v56 = vadd.f32 %v11992_v63, %v3986_v60  ;;  %v2823_v61 = vadd.f32 %v11747_v0, %v2388_v43  ;;  %v13509_v0 = vld [vmem:[#allocation25_spill] sm:$0xff]  ;;  %v12048_v12 = vpop.f32.mrf.mxu1  ;;  %v13514_v43 = vld [vmem:[#allocation58_spill] sm:$0xff] }
 0x1fe   : > { %v9375_v30 = vpop.f32.mrf.mxu0  ;;  %v2825_v17 = vadd.f32 %v13509_v0, %v2390_v41  ;;  %v13518_v41 = vld [vmem:[#allocation8_spill] sm:$0xff] }
 0x1ff   : > { %v4028_v6 = vadd.f32 %v11992_v63, %v3985_v39  ;;  %v3988_v55 = vadd.f32 %v9375_v30, %v3552_v28  ;;  %v4065_v62 = vmax.f32 %v4029_v56, 0.0  ;;  %v13507_v56 = vld [vmem:[#allocation3_spill] sm:$0xff] }
 0x200   : > { %v3816_v9 = vpop.f32.mrf.mxu0  ;;  %v1955_v30 = vadd.f32 %v13507_v56, %v13506_v50  ;;  %v13520_v56 = vld [vmem:[#allocation60_spill] sm:$0xff] }
 0x201   : > { %v4064_v40 = vmax.f32 %v4028_v6, 0.0  ;;  %v3987_v46 = vadd.f32 %v3816_v9, %v3551_v22  ;;  %v4031_v21 = vadd.f32 %v11992_v63, %v3988_v55  ;;  %v13508_v55 = vld [vmem:[#allocation56_spill] sm:$0xff] }
 0x202   : > { %v9378_v34 = vpop.f32.mrf.mxu0  ;;  %v3123_v5 = vadd.f32 %v13508_v55, %v2823_v61 }
 0x203   : > { %v4030_v57 = vadd.f32 %v11992_v63, %v3987_v46  ;;  %v3990_v3 = vadd.f32 %v9378_v34, %v3554_v31  ;;  %9440 = vmatprep.mubr.msk.f32.mxu1 %vm4147_vm7, %v4064_v40  ;;  %v4067_v60 = vmax.f32 %v4031_v21, 0.0  ;;  %v13510_v40 = vld [vmem:[#allocation30_spill] sm:$0xff] }
 0x204   : > { %v3826_v44 = vpop.f32.mrf.mxu0  ;;  %9441 = vmatmul.mubr.msk.f32.vlgmr.msra.gmra.mxu1 %vm4147_vm7, %v4065_v62  ;;  %v2392_v46 = vadd.f32 %v13510_v40, %v1955_v30  ;;  %v3560_v62 = vadd.f32 %v11911_v24, %v13511_v18  ;;  %v13512_v34 = vld [vmem:[#allocation6_spill] sm:$0xff]  ;;  %v13525_v40 = vld [vmem:[#allocation9_spill] sm:$0xff] }
 0x205   : > { %v4066_v52 = vmax.f32 %v4030_v57, 0.0  ;;  %v3989_v37 = vadd.f32 %v3826_v44, %v3553_v4  ;;  %v4033_v54 = vadd.f32 %v11992_v63, %v3990_v3  ;;  %v13513_v4 = vld [vmem:[#allocation5_spill] sm:$0xff]  ;;  %v3559_v44 = vadd.f32 %v11918_v14, %v3123_v5  ;;  %v13522_v5 = vld [vmem:[#allocation38_spill] sm:$0xff] }
 0x206   : > { %v9381_v15 = vpop.f32.mrf.mxu0  ;;  %v1957_v53 = vadd.f32 %v13513_v4, %v13512_v34  ;;  %v13526_v34 = vld [vmem:[#allocation62_spill] sm:$0xff] }
 0x207   : > { %v4032_v28 = vadd.f32 %v11992_v63, %v3989_v37  ;;  %v3992_v39 = vadd.f32 %v9381_v15, %v3556_v27  ;;  %9443 = vmatprep.mubr.msk.f32.mxu1 %vm4147_vm7, %v4066_v52  ;;  %v4069_v22 = vmax.f32 %v4033_v54, 0.0  ;;  %v3125_v27 = vadd.f32 %v13514_v43, %v2825_v17  ;;  %v13516_v15 = vld [vmem:[#allocation28_spill] sm:$0xff]  ;;  %v13528_v43 = vld [vmem:[#allocation37_spill] sm:$0xff] }
 0x208   : > { %v3836_v2 = vpop.f32.mrf.mxu0  ;;  %9444 = vmatmul.mubr.msk.f32.gmra.mxu1 %vm4147_vm7, %v4067_v60  ;;  %v2394_v24 = vadd.f32 %v13515_v25, %v1957_v53  ;;  %v12062_v60 = vpop.f32.mrf.mxu1 }
 0x209   : > { %v4068_v42 = vmax.f32 %v4032_v28, 0.0  ;;  %v3991_v10 = vadd.f32 %v3836_v2, %v3555_v47  ;;  %v4035_v35 = vadd.f32 %v11992_v63, %v3992_v39  ;;  %v2827_v47 = vadd.f32 %v13516_v15, %v2392_v46  ;;  %v13519_v2 = vld [vmem:[#allocation7_spill] sm:$0xff] }
 0x20a   : > { %v9384_v6 = vpop.f32.mrf.mxu0  ;;  %v3562_v28 = vadd.f32 %v11925_v8, %v13517_v48  ;;  %v1959_v61 = vadd.f32 %v13519_v2, %v13518_v41  ;;  %v3561_v50 = vadd.f32 %v11932_v23, %v3125_v27 }
 0x20b   : > { %v4034_v9 = vadd.f32 %v11992_v63, %v3991_v10  ;;  %v3994_v36 = vadd.f32 %v9384_v6, %v3558_v45  ;;  %9446 = vmatprep.mubr.msk.f32.mxu1 %vm4147_vm7, %v4068_v42  ;;  %v4071_v57 = vmax.f32 %v4035_v35, 0.0  ;;  %v3127_v30 = vadd.f32 %v13520_v56, %v2827_v47  ;;  %v13521_v6 = vld [vmem:[#allocation32_spill] sm:$0xff] }
 0x20c   : > { %v3846_v31 = vpop.f32.mrf.mxu0  ;;  %9447 = vmatmul.mubr.msk.f32.gmra.mxu1 %vm4147_vm7, %v4069_v22  ;;  %v2829_v8 = vadd.f32 %v13521_v6, %v2394_v24  ;;  %v13530_v24 = vld [vmem:[#allocation12_spill] sm:$0xff]  ;;  %v13536_v6 = vld [vmem:[#allocation14_spill] sm:$0xff] }
 0x20d   : > { %v4070_v1 = vmax.f32 %v4034_v9, 0.0  ;;  %v3993_v21 = vadd.f32 %v3846_v31, %v3557_v13  ;;  %v4037_v3 = vadd.f32 %v11992_v63, %v3994_v36  ;;  %v12076_v13 = vpop.f32.mrf.mxu1  ;;  %v2396_v9 = vadd.f32 %v13522_v5, %v1959_v61  ;;  %v13523_v36 = vld [vmem:[#allocation59_spill] sm:$0xff]  ;;  %v13524_v31 = vld [vmem:[#allocation10_spill] sm:$0xff] }
 0x20e   : > { %v9387_v49 = vpop.f32.mrf.mxu0  ;;  %v3564_v0 = vadd.f32 %v11939_v29, %v13523_v36  ;;  %v1961_v46 = vadd.f32 %v13525_v40, %v13524_v31  ;;  %v3129_v4 = vadd.f32 %v13526_v34, %v2829_v8  ;;  %v13537_v8 = vld [vmem:[#allocation13_spill] sm:$0xff] }
 0x20f   : > { %v4036_v52 = vadd.f32 %v11992_v63, %v3993_v21  ;;  %v3996_v37 = vadd.f32 %v9387_v49, %v3560_v62  ;;  %9449 = vmatprep.mubr.msk.f32.mxu1 %vm4147_vm7, %v4070_v1  ;;  %v4073_v45 = vmax.f32 %v4037_v3, 0.0  ;;  %v3563_v21 = vadd.f32 %v11946_v16, %v3127_v30  ;;  %v13527_v3 = vld [vmem:[#allocation40_spill] sm:$0xff]  ;;  %v12090_v49 = vpop.f32.mrf.mxu1  ;;  %v13535_v30 = vld [vmem:[#allocation63_spill] sm:$0xff]  ;;  %v13541_v34 = vld [vmem:[#allocation65_spill] sm:$0xff] }
 0x210   : > { %v3856_v54 = vpop.f32.mrf.mxu0  ;;  %9450 = vmatmul.mubr.msk.f32.gmra.mxu1 %vm4147_vm7, %v4071_v57  ;;  %v2398_v29 = vadd.f32 %v13527_v3, %v1961_v46  ;;  %v2831_v27 = vadd.f32 %v13528_v43, %v2396_v9  ;;  %v13539_v46 = vld [vmem:[#allocation44_spill] sm:$0xff]  ;;  %v13543_v3 = vld [vmem:[#allocation15_spill] sm:$0xff] }
 0x211   : > { %v4072_v14 = vmax.f32 %v4036_v52, 0.0  ;;  %v3995_v39 = vadd.f32 %v3856_v54, %v3559_v44  ;;  %v4039_v42 = vadd.f32 %v11992_v63, %v3996_v37  ;;  %v13529_v52 = vld [vmem:[#allocation61_spill] sm:$0xff]  ;;  %v13531_v54 = vld [vmem:[#allocation11_spill] sm:$0xff] }
 0x212   : > { %v9390_v10 = vpop.f32.mrf.mxu0  ;;  %v3566_v37 = vadd.f32 %v11955_v20, %v13529_v52  ;;  %v1963_v15 = vadd.f32 %v13531_v54, %v13530_v24  ;;  %v13545_v54 = vld [vmem:[#allocation43_spill] sm:$0xff] }
 0x213   : > { %v4038_v22 = vadd.f32 %v11992_v63, %v3995_v39  ;;  %v3998_v35 = vadd.f32 %v9390_v10, %v3562_v28  ;;  %9452 = vmatprep.mubr.msk.f32.mxu1 %vm4147_vm7, %v4072_v14  ;;  %v4075_v18 = vmax.f32 %v4039_v42, 0.0  ;;  %v3565_v14 = vadd.f32 %v11965_v51, %v3129_v4  ;;  %v13532_v39 = vld [vmem:[#allocation64_spill] sm:$0xff]  ;;  %v12104_v42 = vpop.f32.mrf.mxu1 }
 0x214   : > { %v3866_v55 = vpop.f32.mrf.mxu0  ;;  %9453 = vmatmul.mubr.msk.f32.gmra.mxu1 %vm4147_vm7, %v4073_v45  ;;  %v3131_v41 = vadd.f32 %v13532_v39, %v2831_v27  ;;  %v13533_v45 = vld [vmem:[#allocation39_spill] sm:$0xff]  ;;  %v3570_v4 = vadd.f32 %v12007_v32, %v13541_v34 }
 0x215   : > { %v4074_v23 = vmax.f32 %v4038_v22, 0.0  ;;  %v3997_v17 = vadd.f32 %v3866_v55, %v3561_v50  ;;  %v4041_v62 = vadd.f32 %v11992_v63, %v3998_v35  ;;  %v2833_v20 = vadd.f32 %v13533_v45, %v2398_v29  ;;  %v13534_v50 = vld [vmem:[#allocation42_spill] sm:$0xff] }
 0x216   : > { %v9393_v1 = vpop.f32.mrf.mxu0  ;;  %v2400_v56 = vadd.f32 %v13534_v50, %v1963_v15  ;;  %v3568_v22 = vadd.f32 %v11977_v26, %v13535_v30  ;;  %v1965_v55 = vadd.f32 %v13537_v8, %v13536_v6  ;;  %v13550_v30 = vld [vmem:[#allocation70_spill] sm:$0xff]  ;;  %v13551_v6 = vld [vmem:[#allocation27_spill] sm:$0xff] }
 0x217   : > { %v4040_v53 = vadd.f32 %v11992_v63, %v3997_v17  ;;  %v4000_v57 = vadd.f32 %v9393_v1, %v3564_v0  ;;  %9455 = vmatprep.mubr.msk.f32.mxu1 %vm4147_vm7, %v4074_v23  ;;  %v4077_v47 = vmax.f32 %v4041_v62, 0.0  ;;  %v3567_v0 = vadd.f32 %v11994_v11, %v3131_v41  ;;  %v13538_v23 = vld [vmem:[#allocation66_spill] sm:$0xff]  ;;  %v13540_v1 = vld [vmem:[#allocation41_spill] sm:$0xff] }
 0x218   : > { %v3876_v44 = vpop.f32.mrf.mxu0  ;;  %9456 = vmatmul.mubr.msk.f32.gmra.mxu1 %vm4147_vm7, %v4075_v18  ;;  %v3133_v17 = vadd.f32 %v13538_v23, %v2833_v20  ;;  %v2402_v26 = vadd.f32 %v13539_v46, %v1965_v55  ;;  %v12118_v18 = vpop.f32.mrf.mxu1  ;;  %v13553_v55 = vld [vmem:[#allocation48_spill] sm:$0xff] }
 0x219   : > { %v4076_v16 = vmax.f32 %v4040_v53, 0.0  ;;  %v3999_v25 = vadd.f32 %v3876_v44, %v3563_v21  ;;  %v4043_v48 = vadd.f32 %v11992_v63, %v4000_v57  ;;  %v2835_v21 = vadd.f32 %v13540_v1, %v2400_v56  ;;  %v13542_v57 = vld [vmem:[#allocation16_spill] sm:$0xff]  ;;  %v13558_v1 = vld [vmem:[#allocation22_spill] sm:$0xff] }
 0x21a   : > { %v9396_v28 = vpop.f32.mrf.mxu0  ;;  %v1967_v29 = vadd.f32 %v13543_v3, %v13542_v57  ;;  %v3569_v52 = vadd.f32 %v12020_v7, %v3133_v17  ;;  %v2837_v32 = vadd.f32 %v13545_v54, %v2402_v26  ;;  %v12132_v15 = vpop.f32.mrf.mxu1  ;;  %v13555_v17 = vld [vmem:[#allocation69_spill] sm:$0xff]  ;;  %v13556_v46 = vld [vmem:[#allocation20_spill] sm:$0xff]  ;;  %v13557_v26 = vld [vmem:[#allocation19_spill] sm:$0xff] }
 0x21b   : > { %v4042_v2 = vadd.f32 %v11992_v63, %v3999_v25  ;;  %v4002_v61 = vadd.f32 %v9396_v28, %v3566_v37  ;;  %9458 = vmatprep.mubr.msk.f32.mxu1 %vm4147_vm7, %v4076_v16  ;;  %v4079_v5 = vmax.f32 %v4043_v48, 0.0  ;;  %v13544_v37 = vld [vmem:[#allocation68_spill] sm:$0xff]  ;;  %v13546_v48 = vld [vmem:[#allocation46_spill] sm:$0xff] }
 0x21c   : > { %v3886_v10 = vpop.f32.mrf.mxu0  ;;  %9459 = vmatmul.mubr.msk.f32.gmra.mxu1 %vm4147_vm7, %v4077_v47  ;;  %v3135_v16 = vadd.f32 %v13544_v37, %v2835_v21  ;;  %v2404_v28 = vadd.f32 %v13546_v48, %v1967_v29  ;;  %v13559_v57 = vld [vmem:[#allocation72_spill] sm:$0xff] }
 0x21d   : > { %v4078_v51 = vmax.f32 %v4042_v2, 0.0  ;;  %v4001_v35 = vadd.f32 %v3886_v10, %v3565_v14  ;;  %v4045_v9 = vadd.f32 %v11992_v63, %v4002_v61  ;;  %v13547_v14 = vld [vmem:[#allocation67_spill] sm:$0xff]  ;;  %v13548_v2 = vld [vmem:[#allocation18_spill] sm:$0xff]  ;;  %v13549_v61 = vld [vmem:[#allocation17_spill] sm:$0xff] }
 0x21e   : > { %v9399_v36 = vpop.f32.mrf.mxu0  ;;  %v3572_v39 = vadd.f32 %v12034_v33, %v13547_v14  ;;  %v1969_v45 = vadd.f32 %v13549_v61, %v13548_v2  ;;  %v3571_v56 = vadd.f32 %v12048_v12, %v3135_v16  ;;  %v13552_v33 = vld [vmem:[#allocation26_spill] sm:$0xff]  ;;  %v3574_v12 = vadd.f32 %v12062_v60, %v13555_v17  ;;  %v13560_v60 = vld [vmem:[#allocation31_spill] sm:$0xff] }
 0x21f   : > { %v4044_v31 = vadd.f32 %v11992_v63, %v4001_v35  ;;  %v4004_v40 = vadd.f32 %v9399_v36, %v3568_v22  ;;  %9461 = vmatprep.mubr.msk.f32.mxu1 %vm4147_vm7, %v4078_v51  ;;  %v4081_v44 = vmax.f32 %v4045_v9, 0.0  ;;  %v3137_v22 = vadd.f32 %v13550_v30, %v2837_v32  ;;  %v9353_v9 = vpop.f32.mrf.mxu1  ;;  %v13564_v32 = vld [vmem:[#allocation71_spill] sm:$0xff] }
 0x220   : > { %v3896_v62 = vpop.f32.mrf.mxu0  ;;  %9462 = vmatmul.mubr.msk.f32.gmra.mxu1 %vm4147_vm7, %v4079_v5  ;;  %v1223_v8 = vadd.f32 %v13552_v33, %v13551_v6  ;;  %v2406_v5 = vadd.f32 %v13553_v55, %v1969_v45  ;;  %v13570_v33 = vld [vmem:[#allocation73_spill] sm:$0xff] }
 0x221   : > { %v4080_v11 = vmax.f32 %v4044_v31, 0.0  ;;  %v4003_v53 = vadd.f32 %v3896_v62, %v3567_v0  ;;  %v4047_v43 = vadd.f32 %v11992_v63, %v4004_v40  ;;  %v13554_v0 = vld [vmem:[#allocation45_spill] sm:$0xff]  ;;  %v1971_v62 = vadd.f32 %v13557_v26, %v13556_v46  ;;  %v3520_v16 = vpop.f32.mrf.mxu1 }
 0x222   : > { %v9402_v27 = vpop.f32.mrf.mxu0  ;;  %v2839_v23 = vadd.f32 %v13554_v0, %v2404_v28  ;;  %v1671_v21 = vadd.f32 %v13558_v1, %v1223_v8  ;;  %v13565_v28 = vld [vmem:[#allocation21_spill] sm:$0xff]  ;;  %v3578_v8 = vadd.f32 %v12118_v18, %v13570_v33 }
 0x223   : > { %v4046_v25 = vadd.f32 %v11992_v63, %v4003_v53  ;;  %v4006_v24 = vadd.f32 %v9402_v27, %v3570_v4  ;;  %9464 = vmatprep.mubr.msk.f32.mxu1 %vm4147_vm7, %v4080_v11  ;;  %v4083_v20 = vmax.f32 %v4047_v43, 0.0  ;;  %v3573_v53 = vadd.f32 %v12076_v13, %v3137_v22  ;;  %v13561_v43 = vld [vmem:[#allocation29_spill] sm:$0xff]  ;;  %v9356_v22 = vpop.f32.mrf.mxu1 }
 0x224   : > { %v3906_v47 = vpop.f32.mrf.mxu0  ;;  %9465 = vmatmul.mubr.msk.f32.gmra.mxu1 %vm4147_vm7, %v4081_v44  ;;  %v3139_v3 = vadd.f32 %v13559_v57, %v2839_v23  ;;  %v1233_v27 = vadd.f32 %v13561_v43, %v13560_v60  ;;  %v3576_v13 = vadd.f32 %v12090_v49, %v13564_v32  ;;  %v1973_v14 = vadd.f32 %v13565_v28, %v1671_v21  ;;  %v13568_v49 = vld [vmem:[#allocation52_spill] sm:$0xff] }
 0x225   : > { %v4082_v7 = vmax.f32 %v4046_v25, 0.0  ;;  %v4005_v41 = vadd.f32 %v3906_v47, %v3569_v52  ;;  %v4049_v10 = vadd.f32 %v11992_v63, %v4006_v24  ;;  %v13562_v52 = vld [vmem:[#allocation47_spill] sm:$0xff]  ;;  %v13563_v24 = vld [vmem:[#allocation50_spill] sm:$0xff]  ;;  %v3530_v18 = vpop.f32.mrf.mxu1 }
 0x226   : > { %v9405_v50 = vpop.f32.mrf.mxu0  ;;  %v2841_v37 = vadd.f32 %v13562_v52, %v2406_v5  ;;  %v2408_v54 = vadd.f32 %v13563_v24, %v1971_v62  ;;  %v3575_v45 = vadd.f32 %v12104_v42, %v3139_v3  ;;  %v2410_v30 = vadd.f32 %v13568_v49, %v1973_v14  ;;  %v13571_v5 = vld [vmem:[#allocation23_spill] sm:$0xff]  ;;  %v13576_v24 = vld [vmem:[#allocation53_spill] sm:$0xff] }
 0x227   : > { %v4048_v51 = vadd.f32 %v11992_v63, %v4005_v41  ;;  %v4008_v35 = vadd.f32 %v9405_v50, %v3572_v39  ;;  %9467 = vmatprep.mubr.msk.f32.mxu1 %vm4147_vm7, %v4082_v7  ;;  %v4085_v34 = vmax.f32 %v4049_v10, 0.0  ;;  %v13566_v39 = vld [vmem:[#allocation24_spill] sm:$0xff]  ;;  %v13573_v62 = vld [vmem:[#allocation51_spill] sm:$0xff] }
 0x228   : > { %v3916_v36 = vpop.f32.mrf.mxu0  ;;  %9468 = vmatmul.mubr.msk.f32.gmra.mxu1 %vm4147_vm7, %v4083_v20  ;;  %v1673_v7 = vadd.f32 %v13566_v39, %v1233_v27  ;;  %v13567_v20 = vld [vmem:[#allocation74_spill] sm:$0xff]  ;;  %v2845_v1 = vadd.f32 %v13573_v62, %v2410_v30 }
 0x229   : > { %v4084_v31 = vmax.f32 %v4048_v51, 0.0  ;;  %v4007_v40 = vadd.f32 %v3916_v36, %v3571_v56  ;;  %v4051_v4 = vadd.f32 %v11992_v63, %v4008_v35  ;;  %v3141_v10 = vadd.f32 %v13567_v20, %v2841_v37  ;;  %v13569_v35 = vld [vmem:[#allocation49_spill] sm:$0xff]  ;;  %v9359_v37 = vpop.f32.mrf.mxu1 }
 0x22a   : > { %v9408_v11 = vpop.f32.mrf.mxu0  ;;  %v2843_v6 = vadd.f32 %v13569_v35, %v2408_v54  ;;  %v1975_v36 = vadd.f32 %v13571_v5, %v1673_v7  ;;  %v3145_v43 = vadd.f32 %v11967_v19, %v2845_v1  ;;  %v3582_v54 = vadd.f32 %v9356_v22, %v11963_v58 }
 0x22b   : > { %v4050_v29 = vadd.f32 %v11992_v63, %v4007_v40  ;;  %v4010_v44 = vadd.f32 %v9408_v11, %v3574_v12  ;;  %9470 = vmatprep.mubr.msk.f32.mxu1 %vm4147_vm7, %v4084_v31  ;;  %v4087_v41 = vmax.f32 %v4051_v4, 0.0  ;;  %v3577_v12 = vadd.f32 %v12132_v15, %v3141_v10  ;;  %v13572_v31 = vld [vmem:[#allocation76_spill] sm:$0xff]  ;;  %v13575_v11 = vld [vmem:[#allocation75_spill] sm:$0xff]  ;;  %v3540_v7 = vpop.f32.mrf.mxu1 }
 0x22c   : > { %v3926_v25 = vpop.f32.mrf.mxu0  ;;  %9471 = vmatmul.mubr.msk.f32.gmra.mxu1 %vm4147_vm7, %v4085_v34  ;;  %v3143_v40 = vadd.f32 %v13572_v31, %v2843_v6  ;;  %v13574_v34 = vld [vmem:[#allocation54_spill] sm:$0xff]  ;;  %v3581_v19 = vadd.f32 %v3530_v18, %v3145_v43  ;;  %v3584_v58 = vadd.f32 %v9359_v37, %v11975_v38 }
 0x22d   : > { %v4086_v47 = vmax.f32 %v4050_v29, 0.0  ;;  %v4009_v48 = vadd.f32 %v3926_v25, %v3573_v53  ;;  %v4053_v2 = vadd.f32 %v11992_v63, %v4010_v44  ;;  %v2412_v4 = vadd.f32 %v13574_v34, %v1975_v36 }
 0x22e   : > { %v9411_v61 = vpop.f32.mrf.mxu0  ;;  %v3580_v53 = vadd.f32 %v9353_v9, %v13575_v11  ;;  %v3579_v60 = vadd.f32 %v3520_v16, %v3143_v40 }
 0x22f   : > { %v4052_v50 = vadd.f32 %v11992_v63, %v4009_v48  ;;  %v4012_v56 = vadd.f32 %v9411_v61, %v3576_v13  ;;  %9473 = vmatprep.mubr.msk.f32.mxu1 %vm4147_vm7, %v4086_v47  ;;  %v4089_v0 = vmax.f32 %v4053_v2, 0.0  ;;  %v2847_v9 = vadd.f32 %v13576_v24, %v2412_v4 }
 0x230   : > { %v3936_v51 = vpop.f32.mrf.mxu0  ;;  %9474 = vmatmul.mubr.msk.f32.gmra.mxu1 %vm4147_vm7, %v4087_v41 }
 0x231   : > { %v4088_v55 = vmax.f32 %v4052_v50, 0.0  ;;  %v4011_v42 = vadd.f32 %v3936_v51, %v3575_v45  ;;  %v4055_v23 = vadd.f32 %v11992_v63, %v4012_v56  ;;  %v3147_v28 = vadd.f32 %v11979_v59, %v2847_v9 }
 0x232   : > { %v9414_v17 = vpop.f32.mrf.mxu0 }
 0x233   : > { %v4054_v46 = vadd.f32 %v11992_v63, %v4011_v42  ;;  %v4014_v26 = vadd.f32 %v9414_v17, %v3578_v8  ;;  %9476 = vmatprep.mubr.msk.f32.mxu1 %vm4147_vm7, %v4088_v55  ;;  %v4091_v15 = vmax.f32 %v4055_v23, 0.0  ;;  %v3583_v50 = vadd.f32 %v3540_v7, %v3147_v28  ;;  %v4101_v55 = vld [vmem:[%s13347_s3 + $0x8] sm:$0xff]  ;;  %v4114_v28 = vld [vmem:[%s13347_s3 + $0x70] sm:$0xff] }
 0x234   : > { %v3946_v21 = vpop.f32.mrf.mxu0  ;;  %9477 = vmatmul.mubr.msk.f32.gmra.mxu1 %vm4147_vm7, %v4089_v0  ;;  %v13374_v8 = vmov 0.0   ;;  %4608 = vmatprep.mubr.f32.mxu0 %v4101_v55  ;;  %v4117_v7 = vld [vmem:[%s13347_s3 + $0x88] sm:$0xff] }
 0x235   : > { %v4090_v57 = vmax.f32 %v4054_v46, 0.0  ;;  %v4013_v3 = vadd.f32 %v3946_v21, %v3577_v12  ;;  %v4057_v29 = vadd.f32 %v11992_v63, %v4014_v26  ;;  %9494 = vmatprep.subr.mxu1 %v13374_v8  ;;  %v4121_v55 = vld [vmem:[%s13347_s3 + $0xa8] sm:$0xff] }
 0x236   : > { %v9417_v44 = vpop.f32.mrf.mxu0 }
 0x237   : > { %v4056_v27 = vadd.f32 %v11992_v63, %v4013_v3  ;;  %v4016_v52 = vadd.f32 %v9417_v44, %v3580_v53  ;;  %9479 = vmatprep.mubr.msk.f32.mxu1 %vm4147_vm7, %v4090_v57  ;;  %v4093_v47 = vmax.f32 %v4057_v29, 0.0 }
 0x238   : > { %v3956_v25 = vpop.f32.mrf.mxu0  ;;  %9480 = vmatmul.mubr.msk.f32.gmra.mxu1 %vm4147_vm7, %v4091_v15 }
 0x239   : > { %v4092_v32 = vmax.f32 %v4056_v27, 0.0  ;;  %v4015_v13 = vadd.f32 %v3956_v25, %v3579_v60  ;;  %v4059_v16 = vadd.f32 %v11992_v63, %v4016_v52 }
 0x23a   : > { %v9420_v48 = vpop.f32.mrf.mxu0 }
 0x23b   : > { %v4058_v14 = vadd.f32 %v11992_v63, %v4015_v13  ;;  %v4018_v39 = vadd.f32 %v9420_v48, %v3582_v54  ;;  %9482 = vmatprep.mubr.msk.f32.mxu1 %vm4147_vm7, %v4092_v32  ;;  %v4095_v45 = vmax.f32 %v4059_v16, 0.0  ;;  %v4105_v16 = vld [vmem:[%s13347_s3 + $0x28] sm:$0xff]  ;;  %v4108_v48 = vld [vmem:[%s13347_s3 + $0x40] sm:$0xff] }
 0x23c   : > { %v3966_v41 = vpop.f32.mrf.mxu0  ;;  %9483 = vmatmul.mubr.msk.f32.gmra.mxu1 %vm4147_vm7, %v4093_v47  ;;  %v4102_v47 = vld [vmem:[%s13347_s3 + $0x10] sm:$0xff] }
 0x23d   : > { %v4094_v2 = vmax.f32 %v4058_v14, 0.0  ;;  %v4017_v61 = vadd.f32 %v3966_v41, %v3581_v19  ;;  %v4061_v20 = vadd.f32 %v11992_v63, %v4018_v39  ;;  %v4111_v19 = vld [vmem:[%s13347_s3 + $0x58] sm:$0xff]  ;;  %v4100_v14 = vld [vmem:[%s13347_s3] sm:$0xff] }
 0x23e   : > { %v9423_v10 = vpop.f32.mrf.mxu0  ;;  %v4104_v39 = vld [vmem:[%s13347_s3 + $0x20] sm:$0xff]  ;;  %v4103_v41 = vld [vmem:[%s13347_s3 + $0x18] sm:$0xff] }
 0x23f   : > { %v4060_v59 = vadd.f32 %v11992_v63, %v4017_v61  ;;  %v4020_v56 = vadd.f32 %v9423_v10, %v3584_v58  ;;  %9485 = vmatprep.mubr.msk.f32.mxu1 %vm4147_vm7, %v4094_v2  ;;  %v4097_v51 = vmax.f32 %v4061_v20, 0.0  ;;  %v4107_v58 = vld [vmem:[%s13347_s3 + $0x38] sm:$0xff]  ;;  %v4120_v2 = vld [vmem:[%s13347_s3 + $0xa0] sm:$0xff]  ;;  %v4106_v61 = vld [vmem:[%s13347_s3 + $0x30] sm:$0xff] }
 0x240   : > { %v3976_v49 = vpop.f32.mrf.mxu0  ;;  %9486 = vmatmul.mubr.msk.f32.gmra.mxu1 %vm4147_vm7, %v4095_v45  ;;  %v4110_v45 = vld [vmem:[%s13347_s3 + $0x50] sm:$0xff]  ;;  %v4123_v20 = vld [vmem:[%s13347_s3 + $0xb8] sm:$0xff]  ;;  %v4109_v10 = vld [vmem:[%s13347_s3 + $0x48] sm:$0xff] }
 0x241   : > { %v4096_v30 = vmax.f32 %v4060_v59, 0.0  ;;  %v4019_v22 = vadd.f32 %v3976_v49, %v3583_v50  ;;  %v4063_v38 = vadd.f32 %v11992_v63, %v4020_v56  ;;  %v4113_v50 = vld [vmem:[%s13347_s3 + $0x68] sm:$0xff]  ;;  %v4126_v59 = vld [vmem:[%s13347_s3 + $0xd0] sm:$0xff]  ;;  %v4112_v56 = vld [vmem:[%s13347_s3 + $0x60] sm:$0xff] }
 0x242   : > { %v4116_v49 = vld [vmem:[%s13347_s3 + $0x80] sm:$0xff] }
 0x243   : > { %v4062_v35 = vadd.f32 %v11992_v63, %v4019_v22  ;;  %9488 = vmatprep.mubr.msk.f32.mxu1 %vm4147_vm7, %v4096_v30  ;;  %v4099_v33 = vmax.f32 %v4063_v38, 0.0  ;;  %v4129_v30 = vld [vmem:[%s13347_s3 + $0xe8] sm:$0xff]  ;;  %v4115_v22 = vld [vmem:[%s13347_s3 + $0x78] sm:$0xff]  ;;  %v4132_v38 = vld [vmem:[%s13347_s3 + $0x100] sm:$0xff] }
 0x244   : > { %9489 = vmatmul.mubr.msk.f32.gmra.mxu1 %vm4147_vm7, %v4097_v51  ;;  %v4119_v51 = vld [vmem:[%s13347_s3 + $0x98] sm:$0xff] }
 0x245   : > { %v4098_v6 = vmax.f32 %v4062_v35, 0.0  ;;  %v4118_v35 = vld [vmem:[%s13347_s3 + $0x90] sm:$0xff] }
 0x247   : > { %9491 = vmatprep.mubr.msk.f32.mxu1 %vm4147_vm7, %v4098_v6  ;;  %v4122_v6 = vld [vmem:[%s13347_s3 + $0xb0] sm:$0xff] }
 0x248   : > { %9492 = vmatmul.mubr.msk.f32.gmra.mxu1 %vm4147_vm7, %v4099_v33  ;;  %v4135_v33 = vld [vmem:[%s13347_s3 + $0x118] sm:$0xff] }
 0x249   : > { %9502 = vmatprep.mubr.msk.f32.mxu1 %vm10020_vm8, %v13374_v8 }
 0x2c4   : > { %v12218_v63 = vpop.f32.mrf.mxu1 }
 0x2c6   : > { %v12220_v42 = vpop.f32.mrf.mxu1 }
 0x2c8   : > { %v12222_v5 = vpop.f32.mrf.mxu1 }
 0x2ca   : > { %v12224_v36 = vpop.f32.mrf.mxu1 }
 0x2cc   : > { %v12226_v0 = vpop.f32.mrf.mxu1 }
 0x2ce   : > { %v12228_v23 = vpop.f32.mrf.mxu1 }
 0x2d0   : > { %v9451_v17 = vpop.f32.mrf.mxu1 }
 0x2d2   : > { %v4352_v12 = vpop.f32.mrf.mxu1 }
 0x2d4   : > { %v9454_v31 = vpop.f32.mrf.mxu1 }
 0x2d6   : > { %v4362_v40 = vpop.f32.mrf.mxu1 }
 0x2d8   : > { %v9457_v46 = vpop.f32.mrf.mxu1 }
 0x2da   : > { %v4372_v26 = vpop.f32.mrf.mxu1 }
 0x2dc   : > { %v9460_v62 = vpop.f32.mrf.mxu1 }
 0x2de   : > { %v4382_v1 = vpop.f32.mrf.mxu1 }
 0x2e0   : > { %v9463_v18 = vpop.f32.mrf.mxu1 }
 0x2e2   : > { %v4392_v21 = vpop.f32.mrf.mxu1 }
 0x2e4   : > { %v12230_v34 = vpop.f32.mrf.mxu1 }
 0x2e6   : > { %v12232_v4 = vpop.f32.mrf.mxu1 }
 0x2e8   : > { %v9469_v11 = vpop.f32.mrf.mxu1 }
 0x2ea   : > { %v4412_v53 = vpop.f32.mrf.mxu1 }
 0x2ec   : > { %v9472_v57 = vpop.f32.mrf.mxu1 }
 0x2ee   : > { %v4422_v3 = vpop.f32.mrf.mxu1 }
 0x2f0   : > { %v9475_v15 = vpop.f32.mrf.mxu1 }
 0x2f2   : > { %v4432_v29 = vpop.f32.mrf.mxu1 }
 0x2f4   : > { %v9478_v44 = vpop.f32.mrf.mxu1 }
 0x2f6   : > { %v4442_v60 = vpop.f32.mrf.mxu1 }
 0x2f8   : > { %v9481_v43 = vpop.f32.mrf.mxu1 }
 0x2fa   : > { %v4452_v27 = vpop.f32.mrf.mxu1 }
 0x2fc   : > { %v9484_v52 = vpop.f32.mrf.mxu1 }
 0x2fe   : > { %v4462_v37 = vpop.f32.mrf.mxu1 }
 0x300   : > { %v9487_v25 = vpop.f32.mrf.mxu1 }
 0x301   : > { %8542 = vmatprep.subr.mxu0 %v9487_v25 }
 0x302   : > { %v4472_v24 = vpop.f32.mrf.mxu1  ;;  %8543 = vmatpush3.msra.mxu0 %v9463_v18  ;;  %v4805_v18 = vld [vmem:[%s13349_s5 + $0x8] sm:$0xff] }
 0x303   : > { %8544 = vmatprep.subr.mxu0 %v4472_v24 }
 0x304   : > { %v9490_v9 = vpop.f32.mrf.mxu1  ;;  %8545 = vmatpush3.msra.mxu0 %v4392_v21  ;;  %v7932_v21 = vld [vmem:[%s13349_s5 + $0x48] sm:$0xff] }
 0x305   : > { %8546 = vmatprep.subr.mxu0 %v9484_v52 }
 0x306   : > { %v4482_v54 = vpop.f32.mrf.mxu1  ;;  %8547 = vmatpush3.msra.mxu0 %v9460_v62  ;;  %v4807_v62 = vld [vmem:[%s13349_s5 + $0x18] sm:$0xff] }
 0x307   : > { %8548 = vmatprep.subr.mxu0 %v4462_v37 }
 0x308   : > { %v9493_v32 = vpop.f32.mrf.mxu1  ;;  %8549 = vmatpush3.msra.mxu0 %v4382_v1  ;;  %v4806_v1 = vld [vmem:[%s13349_s5 + $0x10] sm:$0xff] }
 0x309   : > { %8550 = vmatprep.subr.mxu0 %v9481_v43  ;;  %9495 = vmatpush3.msk.msra.mxu1 %vm1247_vm3, %v9493_v32 }
 0x30a   : > { %v4492_v13 = vpop.f32.mrf.mxu1  ;;  %8551 = vmatpush3.msra.mxu0 %v9457_v46  ;;  %9496 = vmatprep.subr.mxu1 %v13374_v8  ;;  %v4136_v46 = vld [vmem:[%s13347_s3 + $0x120] sm:$0xf] }
 0x30b   : > { %8552 = vmatprep.subr.mxu0 %v4452_v27  ;;  %9497 = vmatpush3.msra.mxu1 %v4492_v13 }
 0x30c   : > { %8553 = vmatpush3.msra.mxu0 %v4372_v26  ;;  %9498 = vmatprep.subr.mxu1 %v13374_v8  ;;  %v4808_v26 = vld [vmem:[%s13349_s5 + $0x20] sm:$0xff] }
 0x30d   : > { %8554 = vmatprep.subr.mxu0 %v9478_v44  ;;  %9499 = vmatpush3.msra.mxu1 %v9490_v9 }
 0x30e   : > { %8555 = vmatpush3.msra.mxu0 %v9454_v31  ;;  %9500 = vmatprep.subr.mxu1 %v13374_v8  ;;  %v4133_v31 = vld [vmem:[%s13347_s3 + $0x108] sm:$0xff] }
 0x30f   : > { %8556 = vmatprep.subr.mxu0 %v4442_v60  ;;  %9501 = vmatpush3.msra.mxu1 %v4482_v54 }
 0x310   : > { %8557 = vmatpush3.msra.mxu0 %v4362_v40  ;;  %9503 = vmatmul.mubr.msk.f32.vlgmr.msra.gmra.mxu1 %vm4501_vm9, %v4102_v47  ;;  %v4137_v40 = vld [vmem:[%s13347_s3 + $0x128] sm:$0xf] }
 0x311   : > { %8558 = vmatprep.subr.mxu0 %v9475_v15  ;;  %9505 = vmatprep.mubr.msk.f32.mxu1 %vm10020_vm8, %v13374_v8  ;;  %v12433_v15 = vld [vmem:[%s13349_s5 + $0x70] sm:$0xff] }
 0x312   : > { %8559 = vmatpush3.msra.mxu0 %v9451_v17  ;;  %v4130_v17 = vld [vmem:[%s13347_s3 + $0xf0] sm:$0xff]  ;;  %9566 = vmatprep.subr.mxu1 %v4808_v26 }
 0x313   : > { %8560 = vmatprep.subr.mxu0 %v4432_v29  ;;  %9567 = vmatpush3.msra.mxu1 %v4808_v26 }
 0x314   : > { %8561 = vmatpush3.msra.mxu0 %v4352_v12  ;;  %9506 = vmatmul.mubr.msk.f32.gmra.mxu1 %vm4501_vm9, %v4105_v16  ;;  %v4134_v12 = vld [vmem:[%s13347_s3 + $0x110] sm:$0xff] }
 0x315   : > { %8562 = vmatprep.subr.mxu0 %v9472_v57  ;;  %9508 = vmatprep.mubr.msk.f32.mxu1 %vm10020_vm8, %v13374_v8  ;;  %v7928_v57 = vld [vmem:[%s13349_s5 + $0x28] sm:$0xff] }
 0x316   : > { %8563 = vmatpush3.msra.mxu0 %v12226_v0  ;;  %v4127_v0 = vld [vmem:[%s13347_s3 + $0xd8] sm:$0xff]  ;;  %9568 = vmatprep.subr.mxu1 %v4807_v62 }
 0x317   : > { %8564 = vmatprep.subr.mxu0 %v4422_v3  ;;  %9569 = vmatpush3.msra.mxu1 %v4807_v62  ;;  %v7972_v3 = vld [vmem:[%s13349_s5 + $0x98] sm:$0xff] }
 0x318   : > { %8565 = vmatpush3.msra.mxu0 %v12228_v23  ;;  %9509 = vmatmul.mubr.msk.f32.gmra.mxu1 %vm4501_vm9, %v4108_v48  ;;  %v4131_v23 = vld [vmem:[%s13347_s3 + $0xf8] sm:$0xff] }
 0x319   : > { %8566 = vmatprep.subr.mxu0 %v9469_v11  ;;  %9511 = vmatprep.mubr.msk.f32.mxu1 %vm10020_vm8, %v13374_v8  ;;  %v7930_v11 = vld [vmem:[%s13349_s5 + $0x38] sm:$0xff] }
 0x31a   : > { %8567 = vmatpush3.msra.mxu0 %v12222_v5  ;;  %v4124_v5 = vld [vmem:[%s13347_s3 + $0xc0] sm:$0xff]  ;;  %9570 = vmatprep.subr.mxu1 %v4806_v1 }
 0x31b   : > { %8568 = vmatprep.subr.mxu0 %v4412_v53  ;;  %9571 = vmatpush3.msra.mxu1 %v4806_v1  ;;  %v7929_v53 = vld [vmem:[%s13349_s5 + $0x30] sm:$0xff] }
 0x31c   : > { %8569 = vmatpush3.msra.mxu0 %v12224_v36  ;;  %9512 = vmatmul.mubr.msk.f32.gmra.mxu1 %vm4501_vm9, %v4111_v19  ;;  %v4128_v36 = vld [vmem:[%s13347_s3 + $0xe0] sm:$0xff] }
 0x31d   : > { %8570 = vmatprep.subr.mxu0 %v12230_v34  ;;  %9514 = vmatprep.mubr.msk.f32.mxu1 %vm10020_vm8, %v13374_v8  ;;  %v4804_v34 = vld [vmem:[%s13349_s5] sm:$0xff] }
 0x31e   : > { %8571 = vmatpush3.msra.mxu0 %v12218_v63  ;;  %v4125_v63 = vld [vmem:[%s13347_s3 + $0xc8] sm:$0xff]  ;;  %9572 = vmatprep.subr.mxu1 %v4805_v18 }
 0x31f   : > { %8572 = vmatprep.subr.mxu0 %v12232_v4  ;;  %9573 = vmatpush3.msra.mxu1 %v4805_v18  ;;  %v7931_v4 = vld [vmem:[%s13349_s5 + $0x40] sm:$0xff]  ;;  %v7954_v18 = vld [vmem:[%s13349_s5 + $0x58] sm:$0xff] }
 0x320   : > { %8573 = vmatpush3.msra.mxu0 %v12220_v42  ;;  %9515 = vmatmul.mubr.msk.f32.gmra.mxu1 %vm4501_vm9, %v4114_v28  ;;  %v4138_v42 = vld [vmem:[%s13347_s3 + $0x130] sm:$0xf] }
 0x321   : > { %4609 = vmatmul.mubr.f32.vlgmr.msra.gmra.mxu0 %v4100_v14  ;;  %9517 = vmatprep.mubr.msk.f32.mxu1 %vm10020_vm8, %v13374_v8 }
 0x322   : > { %4613 = vmatprep.mubr.f32.mxu0 %v4104_v39  ;;  %9541 = vmatprep.subr.mxu0 %v7932_v21 }
 0x323   : > { %9542 = vmatpush3.msra.mxu0 %v7932_v21  ;;  %9574 = vmatprep.subr.mxu1 %v4804_v34 }
 0x324   : > { %9518 = vmatmul.mubr.msk.f32.gmra.mxu1 %vm4501_vm9, %v4117_v7  ;;  %9543 = vmatprep.subr.mxu0 %v7931_v4 }
 0x325   : > { %4614 = vmatmul.mubr.f32.gmra.mxu0 %v4103_v41  ;;  %9520 = vmatprep.mubr.msk.f32.mxu1 %vm10020_vm8, %v13374_v8 }
 0x326   : > { %4618 = vmatprep.mubr.f32.mxu0 %v4107_v58  ;;  %9575 = vmatpush3.msra.mxu1 %v4804_v34  ;;  %v12499_v34 = vld [vmem:[%s13349_s5 + $0xe8] sm:$0xff] }
 0x327   : > { %9544 = vmatpush3.msra.mxu0 %v7931_v4  ;;  %9616 = vmatprep.subr.mxu1 %v7972_v3 }
 0x328   : > { %9521 = vmatmul.mubr.msk.f32.gmra.mxu1 %vm4501_vm9, %v4120_v2  ;;  %9545 = vmatprep.subr.mxu0 %v7930_v11 }
 0x329   : > { %4619 = vmatmul.mubr.f32.gmra.mxu0 %v4106_v61  ;;  %9523 = vmatprep.mubr.msk.f32.mxu1 %vm10020_vm8, %v13374_v8  ;;  %v7971_v61 = vld [vmem:[%s13349_s5 + $0x90] sm:$0xff] }
 0x32a   : > { %4623 = vmatprep.mubr.f32.mxu0 %v4110_v45  ;;  %9546 = vmatpush3.msra.mxu0 %v7930_v11 }
 0x32b   : > { %9547 = vmatprep.subr.mxu0 %v7929_v53 }
 0x32c   : > { %9524 = vmatmul.mubr.msk.f32.gmra.mxu1 %vm4501_vm9, %v4123_v20  ;;  %9548 = vmatpush3.msra.mxu0 %v7929_v53 }
 0x32d   : > { %4624 = vmatmul.mubr.f32.gmra.mxu0 %v4109_v10  ;;  %9526 = vmatprep.mubr.msk.f32.mxu1 %vm10020_vm8, %v13374_v8 }
 0x32e   : > { %4628 = vmatprep.mubr.f32.mxu0 %v4113_v50  ;;  %9549 = vmatprep.subr.mxu0 %v7928_v57 }
 0x32f   : > { %9550 = vmatpush3.msra.mxu0 %v7928_v57 }
 0x330   : > { %9527 = vmatmul.mubr.msk.f32.gmra.mxu1 %vm4501_vm9, %v4126_v59  ;;  %9591 = vmatprep.subr.mxu0 %v12433_v15 }
 0x331   : > { %4629 = vmatmul.mubr.f32.gmra.mxu0 %v4112_v56  ;;  %9529 = vmatprep.mubr.msk.f32.mxu1 %vm10020_vm8, %v13374_v8  ;;  %v7970_v56 = vld [vmem:[%s13349_s5 + $0x88] sm:$0xff] }
 0x332   : > { %4633 = vmatprep.mubr.f32.mxu0 %v4116_v49 }
 0x334   : > { %9530 = vmatmul.mubr.msk.f32.gmra.mxu1 %vm4501_vm9, %v4129_v30 }
 0x335   : > { %4634 = vmatmul.mubr.f32.gmra.mxu0 %v4115_v22  ;;  %9532 = vmatprep.mubr.msk.f32.mxu1 %vm10020_vm8, %v13374_v8 }
 0x336   : > { %4638 = vmatprep.mubr.f32.mxu0 %v4119_v51 }
 0x338   : > { %9533 = vmatmul.mubr.msk.f32.gmra.mxu1 %vm4501_vm9, %v4132_v38  ;;  %v7969_v38 = vld [vmem:[%s13349_s5 + $0x80] sm:$0xff] }
 0x339   : > { %4639 = vmatmul.mubr.f32.gmra.mxu0 %v4118_v35  ;;  %9535 = vmatprep.mubr.msk.f32.mxu1 %vm10020_vm8, %v13374_v8 }
 0x33a   : > { %4643 = vmatprep.mubr.f32.mxu0 %v4122_v6 }
 0x33c   : > { %9536 = vmatmul.mubr.msk.f32.gmra.mxu1 %vm4501_vm9, %v4135_v33 }
 0x33d   : > { %4644 = vmatmul.mubr.f32.gmra.mxu0 %v4121_v55  ;;  %9538 = vmatprep.mubr.msk.f32.mxu1 %vm10020_vm8, %v13374_v8 }
 0x33e   : > { %4648 = vmatprep.mubr.f32.mxu0 %v4125_v63 }
 0x340   : > { %9539 = vmatmul.mubr.msk.f32.gmra.mxu1 %vm4501_vm9, %v4138_v42 }
 0x341   : > { %4649 = vmatmul.mubr.f32.gmra.mxu0 %v4124_v5 }
 0x342   : > { %4653 = vmatprep.mubr.f32.mxu0 %v4128_v36  ;;  %v7956_v36 = vld [vmem:[%s13349_s5 + $0x68] sm:$0xff] }
 0x345   : > { %4654 = vmatmul.mubr.f32.gmra.mxu0 %v4127_v0  ;;  %v7968_v0 = vld [vmem:[%s13349_s5 + $0x78] sm:$0xff] }
 0x346   : > { %4658 = vmatprep.mubr.f32.mxu0 %v4131_v23 }
 0x349   : > { %4659 = vmatmul.mubr.f32.gmra.mxu0 %v4130_v17 }
 0x34a   : > { %4663 = vmatprep.mubr.f32.mxu0 %v4134_v12 }
 0x34d   : > { %4664 = vmatmul.mubr.f32.gmra.mxu0 %v4133_v31 }
 0x34e   : > { %4668 = vmatprep.mubr.f32.mxu0 %v4137_v40  ;;  %v7955_v40 = vld [vmem:[%s13349_s5 + $0x60] sm:$0xff] }
 0x351   : > { %4669 = vmatmul.mubr.f32.gmra.mxu0 %v4136_v46 }
 0x3d0   : > { %v4740_v29 = vpop.f32.mrf.mxu1 }
 0x3d2   : > { %v9504_v44 = vpop.f32.mrf.mxu1 }
 0x3d4   : > { %v4745_v60 = vpop.f32.mrf.mxu1 }
 0x3d6   : > { %v9507_v43 = vpop.f32.mrf.mxu1 }
 0x3d8   : > { %v4750_v27 = vpop.f32.mrf.mxu1 }
 0x3da   : > { %v9510_v52 = vpop.f32.mrf.mxu1 }
 0x3db   : > { %v12523_v52 = vld [vmem:[%s13349_s5 + $0xc0] sm:$0xff] }
 0x3dc   : > { %v4755_v37 = vpop.f32.mrf.mxu1 }
 0x3de   : > { %v9513_v25 = vpop.f32.mrf.mxu1 }
 0x3e0   : > { %v4760_v24 = vpop.f32.mrf.mxu1 }
 0x3e1   : > { %v8574_v9 = vpop.f32.mrf.mxu0 }
 0x3e2   : > { %v9516_v54 = vpop.f32.mrf.mxu1 }
 0x3e3   : > { %v8575_v32 = vpop.f32.mrf.mxu0 }
 0x3e4   : > { %v8576_v13 = vadd.f32 %v8575_v32, %v8574_v9  ;;  %v12436_v47 = vpop.f32.mrf.mxu1 }
 0x3e5   : > { %v8577_v16 = vpop.f32.mrf.mxu0 }
 0x3e6   : > { %v12438_v48 = vadd.f32 %v8576_v13, %v4740_v29  ;;  %v9519_v19 = vpop.f32.mrf.mxu1 }
 0x3e7   : > { %v8578_v28 = vpop.f32.mrf.mxu0 }
 0x3e8   : > { %v8579_v14 = vadd.f32 %v8578_v28, %v8577_v16  ;;  %9576 = vmatprep.mubr.msk.f32.mxu1 %vm4844_vm10, %v12438_v48  ;;  %v12442_v39 = vpop.f32.mrf.mxu1  ;;  %v4825_v45 = vrot.slane %v12438_v48, 1 }
 0x3e9   : > { %v8580_v7 = vpop.f32.mrf.mxu0 }
 0x3ea   : > { %v12444_v41 = vadd.f32 %v8579_v14, %v4745_v60  ;;  %v9522_v58 = vpop.f32.mrf.mxu1 }
 0x3eb   : > { %v8581_v2 = vpop.f32.mrf.mxu0 }
 0x3ec   : > { %v8582_v20 = vadd.f32 %v8581_v2, %v8580_v7  ;;  %9577 = vmatmul.mubr.msk.f32.vlgmr.msra.gmra.mxu1 %vm4844_vm10, %v12444_v41  ;;  %v4826_v10 = vrot.slane %v12444_v41, 1  ;;  %v12453_v50 = vpop.f32.mrf.mxu1 }
 0x3ed   : > { %v8583_v59 = vpop.f32.mrf.mxu0  ;;  %9617 = vmatpush3.msra.mxu1 %v7972_v3  ;;  %v7953_v3 = vld [vmem:[%s13349_s5 + $0x50] sm:$0xff] }
 0x3ee   : > { %v12458_v49 = vadd.f32 %v8582_v20, %v4750_v27  ;;  %v4827_v30 = vsel %vm527_vm1, %v4825_v45, %v4826_v10  ;;  %v9525_v22 = vpop.f32.mrf.mxu1  ;;  %9618 = vmatprep.subr.mxu1 %v7971_v61 }
 0x3ef   : > { %v8584_v51 = vpop.f32.mrf.mxu0  ;;  %9551 = vmatprep.mubr.msk.f32.mxu0 %vm4844_vm10, %v4827_v30  ;;  %9619 = vmatpush3.msra.mxu1 %v7971_v61 }
 0x3f0   : > { %v8585_v35 = vadd.f32 %v8584_v51, %v8583_v59  ;;  %9579 = vmatprep.mubr.msk.f32.mxu1 %vm4844_vm10, %v12458_v49  ;;  %v4828_v6 = vrot.slane %v12458_v49, 1  ;;  %v12468_v33 = vpop.f32.mrf.mxu1  ;;  %9620 = vmatprep.subr.mxu1 %v7970_v56  ;;  %v6082_v11 = vrot.slane %v12458_v49, 6 }
 0x3f1   : > { %v8586_v55 = vpop.f32.mrf.mxu0  ;;  %9621 = vmatpush3.msra.mxu1 %v7970_v56 }
 0x3f2   : > { %v12470_v63 = vadd.f32 %v8585_v35, %v4755_v37  ;;  %v4829_v42 = vsel %vm527_vm1, %v4826_v10, %v4828_v6  ;;  %v9528_v5 = vpop.f32.mrf.mxu1  ;;  %9622 = vmatprep.subr.mxu1 %v7969_v38 }
 0x3f3   : > { %v8587_v23 = vpop.f32.mrf.mxu0  ;;  %9552 = vmatmul.mubr.msk.f32.vlgmr.msra.gmra.mxu0 %vm4844_vm10, %v4829_v42  ;;  %9623 = vmatpush3.msra.mxu1 %v7969_v38 }
 0x3f4   : > { %v8588_v17 = vadd.f32 %v8587_v23, %v8586_v55  ;;  %9580 = vmatmul.mubr.msk.f32.gmra.mxu1 %vm4844_vm10, %v12470_v63  ;;  %v4830_v12 = vrot.slane %v12470_v63, 1  ;;  %v12483_v31 = vpop.f32.mrf.mxu1  ;;  %9592 = vmatpush3.msra.mxu0 %v12433_v15  ;;  %v6083_v26 = vrot.slane %v12470_v63, 6 }
 0x3f5   : > { %v8589_v46 = vpop.f32.mrf.mxu0  ;;  %9593 = vmatprep.subr.mxu0 %v7956_v36  ;;  %9624 = vmatprep.subr.mxu1 %v7968_v0 }
 0x3f6   : > { %v12490_v62 = vadd.f32 %v8588_v17, %v4760_v24  ;;  %v4831_v1 = vsel %vm527_vm1, %v4828_v6, %v4830_v12  ;;  %9594 = vmatpush3.msra.mxu0 %v7956_v36  ;;  %9625 = vmatpush3.msra.mxu1 %v7968_v0  ;;  %v9531_v21 = vpop.f32.mrf.mxu1  ;;  %v12513_v44 = vsel %vm3591_vm6, %v6082_v11, %v6083_v26  ;;  %v5124_v0 = vrot.slane %v12458_v49, 2 }
 0x3f7   : > { %v8590_v4 = vpop.f32.mrf.mxu0  ;;  %9554 = vmatprep.mubr.msk.f32.mxu0 %vm4844_vm10, %v4831_v1  ;;  %9595 = vmatprep.subr.mxu0 %v7955_v40 }
 0x3f8   : > { %v8591_v53 = vadd.f32 %v8590_v4, %v8589_v46  ;;  %9582 = vmatprep.mubr.msk.f32.mxu1 %vm4844_vm10, %v12490_v62  ;;  %v4832_v57 = vrot.slane %v12490_v62, 1  ;;  %9596 = vmatpush3.msra.mxu0 %v7955_v40  ;;  %v12509_v15 = vpop.f32.mrf.mxu1  ;;  %v6085_v60 = vrot.slane %v12490_v62, 6  ;;  %v5122_v40 = vrot.slane %v12444_v41, 2 }
 0x3f9   : > { %v8592_v29 = vpop.f32.mrf.mxu0  ;;  %9597 = vmatprep.subr.mxu0 %v7954_v18  ;;  %9666 = vmatprep.subr.mxu1 %v12499_v34  ;;  %v5126_v46 = vrot.slane %v12470_v63, 2  ;;  %v5128_v21 = vrot.slane %v12490_v62, 2 }
 0x3fa   : > { %v12517_v43 = vadd.f32 %v8591_v53, %v12436_v47  ;;  %v4833_v27 = vsel %vm527_vm1, %v4830_v12, %v4832_v57  ;;  %9598 = vmatpush3.msra.mxu0 %v7954_v18  ;;  %v9534_v37 = vpop.f32.mrf.mxu1  ;;  %v12527_v24 = vsel %vm3591_vm6, %v6083_v26, %v6085_v60  ;;  %v5121_v53 = vrot.slane %v12438_v48, 2 }
 0x3fb   : > { %v8593_v25 = vpop.f32.mrf.mxu0  ;;  %9555 = vmatmul.mubr.msk.f32.gmra.mxu0 %vm4844_vm10, %v4833_v27  ;;  %9599 = vmatprep.subr.mxu0 %v7953_v3  ;;  %v5129_v37 = vsel %vm1247_vm3, %v5126_v46, %v5128_v21 }
 0x3fc   : > { %v8594_v9 = vadd.f32 %v8593_v25, %v8592_v29  ;;  %9583 = vmatmul.mubr.msk.f32.gmra.mxu1 %vm4844_vm10, %v12517_v43  ;;  %v4834_v54 = vrot.slane %v12517_v43, 1  ;;  %9600 = vmatpush3.msra.mxu0 %v7953_v3  ;;  %v12532_v32 = vpop.f32.mrf.mxu1  ;;  %v6087_v47 = vrot.slane %v12517_v43, 6  ;;  %v5127_v29 = vsel %vm1247_vm3, %v5124_v0, %v5126_v46  ;;  %v8001_v25 = vld [vmem:[%s13349_s5 + $0xe0] sm:$0xff] }
 0x3fd   : > { %v8595_v13 = vpop.f32.mrf.mxu0  ;;  %9641 = vmatprep.subr.mxu0 %v12523_v52  ;;  %v5123_v48 = vsel %vm1247_vm3, %v5121_v53, %v5122_v40  ;;  %v5433_v46 = vrot.slane %v12470_v63, 3  ;;  %v8017_v53 = vld [vmem:[%s13349_s5 + $0x110] sm:$0xff] }
 0x3fe   : > { %v12537_v16 = vadd.f32 %v8594_v9, %v12442_v39  ;;  %v4835_v19 = vsel %vm527_vm1, %v4832_v57, %v4834_v54  ;;  %v9537_v28 = vpop.f32.mrf.mxu1  ;;  %v12542_v7 = vsel %vm3591_vm6, %v6085_v60, %v6087_v47  ;;  %v5130_v60 = vrot.slane %v12517_v43, 2 }
 0x3ff   : > { %v8596_v14 = vpop.f32.mrf.mxu0  ;;  %9557 = vmatprep.mubr.msk.f32.mxu0 %vm4844_vm10, %v4835_v19 }
 0x400   : > { %v8597_v58 = vadd.f32 %v8596_v14, %v8595_v13  ;;  %9585 = vmatprep.mubr.msk.f32.mxu1 %vm4844_vm10, %v12537_v16  ;;  %v4836_v2 = vrot.slane %v12537_v16, 1  ;;  %v12547_v61 = vpop.f32.mrf.mxu1  ;;  %v6089_v39 = vrot.slane %v12537_v16, 6  ;;  %v7986_v14 = vld [vmem:[%s13349_s5 + $0xb8] sm:$0xff] }
 0x401   : > { %v8598_v45 = vpop.f32.mrf.mxu0 }
 0x402   : > { %v12551_v20 = vadd.f32 %v8597_v58, %v12453_v50  ;;  %v4837_v10 = vsel %vm527_vm1, %v4834_v54, %v4836_v2  ;;  %v9540_v59 = vpop.f32.mrf.mxu1  ;;  %v12556_v30 = vsel %vm3591_vm6, %v6087_v47, %v6089_v39  ;;  %v5131_v54 = vsel %vm1247_vm3, %v5128_v21, %v5130_v60 }
 0x403   : > { %v8599_v56 = vpop.f32.mrf.mxu0  ;;  %9558 = vmatmul.mubr.msk.f32.gmra.mxu0 %vm4844_vm10, %v4837_v10  ;;  %v7999_v10 = vld [vmem:[%s13349_s5 + $0xd0] sm:$0xff]  ;;  %v5611_v21 = vrot.slane %v12537_v16, 4 }
 0x404   : > { %v8600_v22 = vadd.f32 %v8599_v56, %v8598_v45  ;;  %9586 = vmatmul.mubr.msk.f32.gmra.mxu1 %vm4844_vm10, %v12551_v20  ;;  %v4838_v51 = vrot.slane %v12551_v20, 1  ;;  %v6091_v35 = vrot.slane %v12551_v20, 6  ;;  %v5134_v13 = vrot.slane %v12551_v20, 2 }
 0x405   : > { %v8601_v38 = vpop.f32.mrf.mxu0 }
 0x406   : > { %v12563_v50 = vadd.f32 %v8600_v22, %v12468_v33  ;;  %v4839_v6 = vsel %vm527_vm1, %v4836_v2, %v4838_v51  ;;  %v12568_v42 = vsel %vm3591_vm6, %v6089_v39, %v6091_v35  ;;  %v5603_v22 = vrot.slane %v12458_v49, 4 }
 0x407   : > { %v8602_v55 = vpop.f32.mrf.mxu0  ;;  %9560 = vmatprep.mubr.msk.f32.mxu0 %vm4844_vm10, %v4839_v6  ;;  %v5605_v6 = vrot.slane %v12470_v63, 4 }
 0x408   : > { %v8603_v5 = vadd.f32 %v8602_v55, %v8601_v38  ;;  %9588 = vmatprep.mubr.msk.f32.mxu1 %vm4844_vm10, %v12563_v50  ;;  %v4840_v36 = vrot.slane %v12563_v50, 1  ;;  %v6093_v33 = vrot.slane %v12563_v50, 6  ;;  %v5136_v28 = vrot.slane %v12563_v50, 2  ;;  %v7984_v38 = vld [vmem:[%s13349_s5 + $0xa8] sm:$0xff] }
 0x409   : > { %v8604_v23 = vpop.f32.mrf.mxu0 }
 0x40a   : > { %v12576_v17 = vadd.f32 %v8603_v5, %v12483_v31  ;;  %v4841_v12 = vsel %vm527_vm1, %v4838_v51, %v4840_v36  ;;  %v12583_v1 = vsel %vm3591_vm6, %v6091_v35, %v6093_v33  ;;  %v5125_v31 = vsel %vm1247_vm3, %v5122_v40, %v5124_v0  ;;  %v7998_v51 = vld [vmem:[%s13349_s5 + $0xc8] sm:$0xff]  ;;  %v7983_v0 = vld [vmem:[%s13349_s5 + $0xa0] sm:$0xff] }
 0x40b   : > { %9561 = vmatmul.mubr.msk.f32.gmra.mxu0 %vm4844_vm10, %v4841_v12  ;;  %v8605_v26 = vpop.f32.mrf.mxu0  ;;  %v5137_v45 = vsel %vm1247_vm3, %v5134_v13, %v5136_v28  ;;  %v5602_v35 = vrot.slane %v12444_v41, 4  ;;  %v5431_v5 = vrot.slane %v12458_v49, 3  ;;  %v5430_v12 = vrot.slane %v12444_v41, 3 }
 0x40c   : > { %9589 = vmatmul.mubr.msk.f32.gmra.mxu1 %vm4844_vm10, %v12576_v17  ;;  %v4842_v18 = vrot.slane %v12576_v17, 1  ;;  %v8606_v4 = vadd.f32 %v8605_v26, %v8604_v23  ;;  %v6095_v11 = vrot.slane %v12576_v17, 6  ;;  %v5138_v2 = vrot.slane %v12576_v17, 2 }
 0x40d   : > { %9626 = vmatprep.mubr.msk.f32.mxu1 %vm4844_vm10, %v5125_v31  ;;  %v5604_v55 = vsel %vm672_vm0, %v5602_v35, %v5603_v22  ;;  %v8607_v23 = vpop.f32.mrf.mxu0  ;;  %v12679_v40 = vsel %vm672_vm0, %v5603_v22, %v5605_v6  ;;  %v5609_v26 = vrot.slane %v12517_v43, 4  ;;  %v5435_v41 = vrot.slane %v12490_v62, 3 }
 0x40e   : > { %v4843_v57 = vsel %vm527_vm1, %v4840_v36, %v4842_v18  ;;  %v12595_v3 = vadd.f32 %v8606_v4, %v12509_v15  ;;  %v12601_v27 = vsel %vm3591_vm6, %v6093_v33, %v6095_v11  ;;  %v5132_v15 = vrot.slane %v12537_v16, 2  ;;  %v8032_v33 = vld [vmem:[%s13349_s5 + $0x138] sm:$0xff] }
 0x40f   : > { %9563 = vmatprep.mubr.msk.f32.mxu0 %vm4844_vm10, %v4843_v57  ;;  %v5139_v59 = vsel %vm1247_vm3, %v5136_v28, %v5138_v2  ;;  %v5607_v36 = vrot.slane %v12490_v62, 4  ;;  %v8608_v4 = vpop.f32.mrf.mxu0  ;;  %v5437_v57 = vrot.slane %v12517_v43, 3  ;;  %v8016_v28 = vld [vmem:[%s13349_s5 + $0x108] sm:$0xff]  ;;  %v5445_v35 = vrot.slane %v12576_v17, 3 }
 0x410   : > { %9564 = vmatmul.mubr.msk.f32.gmra.mxu0 %vm4844_vm10, %v4842_v18  ;;  %9627 = vmatmul.mubr.msk.f32.vlgmr.msra.gmra.mxu1 %vm4844_vm10, %v5127_v29  ;;  %v6097_v9 = vrot.slane %v12595_v3, 6  ;;  %v5133_v19 = vsel %vm1247_vm3, %v5130_v60, %v5132_v15  ;;  %v5135_v58 = vsel %vm1247_vm3, %v5132_v15, %v5134_v13  ;;  %v5292_v39 = vrot.slane %v12595_v3, 2 }
 0x411   : > { %9601 = vmatprep.mubr.msk.f32.mxu0 %vm4844_vm10, %v5123_v48  ;;  %9629 = vmatprep.mubr.msk.f32.mxu1 %vm4844_vm10, %v5129_v37  ;;  %v5432_v18 = vsel %vm1984_vm4, %v5430_v12, %v5431_v5  ;;  %v12704_v60 = vsel %vm672_vm0, %v5607_v36, %v5609_v26  ;;  %v8609_v48 = vadd.f32 %v8608_v4, %v8607_v23  ;;  %v5615_v13 = vrot.slane %v12563_v50, 4  ;;  %v8014_v23 = vld [vmem:[%s13349_s5 + $0xf8] sm:$0xff]  ;;  %v8610_v4 = vpop.f32.mrf.mxu0 }
 0x412   : > { %9667 = vmatpush3.msra.mxu1 %v12499_v34  ;;  %v12620_v47 = vsel %vm3591_vm6, %v6095_v11, %v6097_v9  ;;  %v8000_v34 = vld [vmem:[%s13349_s5 + $0xd8] sm:$0xff]  ;;  %v5293_v56 = vsel %vm1247_vm3, %v5138_v2, %v5292_v39  ;;  %v8031_v11 = vld [vmem:[%s13349_s5 + $0x130] sm:$0xff]  ;;  %v5436_v15 = vsel %vm1984_vm4, %v5433_v46, %v5435_v41 }
 0x413   : > { %9668 = vmatprep.subr.mxu1 %v8001_v25 }
 0x414   : > { %9602 = vmatmul.mubr.msk.f32.vlgmr.msra.gmra.mxu0 %vm4844_vm10, %v5125_v31  ;;  %9630 = vmatmul.mubr.msk.f32.gmra.mxu1 %vm4844_vm10, %v5131_v54  ;;  %v12688_v31 = vsel %vm672_vm0, %v5605_v6, %v5607_v36  ;;  %v8028_v36 = vld [vmem:[%s13349_s5 + $0x118] sm:$0xff] }
 0x415   : > { %9604 = vmatprep.mubr.msk.f32.mxu0 %vm4844_vm10, %v5127_v29  ;;  %9632 = vmatprep.mubr.msk.f32.mxu1 %vm4844_vm10, %v5133_v19  ;;  %v5434_v29 = vsel %vm1984_vm4, %v5431_v5, %v5433_v46  ;;  %v5911_v5 = vrot.slane %v12470_v63, 5 }
 0x416   : > { %9669 = vmatpush3.msra.mxu1 %v8001_v25  ;;  %9642 = vmatpush3.msra.mxu0 %v12523_v52  ;;  %v7985_v52 = vld [vmem:[%s13349_s5 + $0xb0] sm:$0xff]  ;;  %v12712_v25 = vsel %vm672_vm0, %v5609_v26, %v5611_v21  ;;  %v5913_v26 = vrot.slane %v12490_v62, 5 }
 0x417   : > { %9670 = vmatprep.subr.mxu1 %v8000_v34  ;;  %9643 = vmatprep.subr.mxu0 %v7986_v14 }
 0x418   : > { %9605 = vmatmul.mubr.msk.f32.gmra.mxu0 %vm4844_vm10, %v5129_v37  ;;  %9633 = vmatmul.mubr.msk.f32.gmra.mxu1 %vm4844_vm10, %v5135_v58  ;;  %v5613_v37 = vrot.slane %v12551_v20, 4 }
 0x419   : > { %9607 = vmatprep.mubr.msk.f32.mxu0 %vm4844_vm10, %v5131_v54  ;;  %9635 = vmatprep.mubr.msk.f32.mxu1 %vm4844_vm10, %v5137_v45  ;;  %v5439_v54 = vrot.slane %v12537_v16, 3 }
 0x41a   : > { %9671 = vmatpush3.msra.mxu1 %v8000_v34  ;;  %9644 = vmatpush3.msra.mxu0 %v7986_v14  ;;  %v5438_v34 = vsel %vm1984_vm4, %v5435_v41, %v5437_v57  ;;  %v12727_v14 = vsel %vm672_vm0, %v5611_v21, %v5613_v37  ;;  %v5915_v41 = vrot.slane %v12517_v43, 5  ;;  %v8013_v21 = vld [vmem:[%s13349_s5 + $0xf0] sm:$0xff] }
 0x41b   : > { %9672 = vmatprep.subr.mxu1 %v7999_v10  ;;  %9645 = vmatprep.subr.mxu0 %v7985_v52 }
 0x41c   : > { %9608 = vmatmul.mubr.msk.f32.gmra.mxu0 %vm4844_vm10, %v5133_v19  ;;  %9636 = vmatmul.mubr.msk.f32.gmra.mxu1 %vm4844_vm10, %v5139_v59  ;;  %v8030_v19 = vld [vmem:[%s13349_s5 + $0x128] sm:$0xff]  ;;  %v5916_v43 = vsel %vm3155_vm5, %v5913_v26, %v5915_v41 }
 0x41d   : > { %9610 = vmatprep.mubr.msk.f32.mxu0 %vm4844_vm10, %v5135_v58  ;;  %9638 = vmatprep.mubr.msk.f32.mxu1 %vm4844_vm10, %v5293_v56  ;;  %v12730_v58 = vadd.f32 %v8609_v48, %v12532_v32  ;;  %v5619_v32 = vrot.slane %v12595_v3, 4  ;;  %v8015_v56 = vld [vmem:[%s13349_s5 + $0x100] sm:$0xff] }
 0x41e   : > { %9673 = vmatpush3.msra.mxu1 %v7999_v10  ;;  %9646 = vmatpush3.msra.mxu0 %v7985_v52  ;;  %v12739_v10 = vsel %vm672_vm0, %v5613_v37, %v5615_v13  ;;  %v5443_v52 = vrot.slane %v12563_v50, 3  ;;  %v8047_v48 = vld [vmem:[%s13349_s5 + $0x160] sm:$0xff]  ;;  %v5921_v37 = vrot.slane %v12563_v50, 5 }
 0x41f   : > { %9674 = vmatprep.subr.mxu1 %v7998_v51  ;;  %9647 = vmatprep.subr.mxu0 %v7984_v38  ;;  %v5621_v22 = vrot.slane %v12730_v58, 4  ;;  %v5449_v63 = vrot.slane %v12730_v58, 3 }
 0x420   : > { %9611 = vmatmul.mubr.msk.f32.gmra.mxu0 %vm4844_vm10, %v5137_v45  ;;  %9639 = vmatmul.mubr.msk.f32.gmra.mxu1 %vm4844_vm10, %v5292_v39  ;;  %v5617_v45 = vrot.slane %v12576_v17, 4  ;;  %v5440_v39 = vsel %vm1984_vm4, %v5437_v57, %v5439_v54  ;;  %v5446_v12 = vsel %vm1984_vm4, %v5443_v52, %v5445_v35  ;;  %v5919_v57 = vrot.slane %v12551_v20, 5 }
 0x421   : > { %9676 = vmatprep.mubr.msk.f32.mxu1 %vm4844_vm10, %v5604_v55  ;;  %9613 = vmatprep.mubr.msk.f32.mxu0 %vm4844_vm10, %v5139_v59  ;;  %v8029_v59 = vld [vmem:[%s13349_s5 + $0x120] sm:$0xff]  ;;  %v12782_v46 = vsel %vm672_vm0, %v5619_v32, %v5621_v22 }
 0x422   : > { %9675 = vmatpush3.msra.mxu1 %v7998_v51  ;;  %9648 = vmatpush3.msra.mxu0 %v7984_v38  ;;  %v12755_v38 = vsel %vm672_vm0, %v5615_v13, %v5617_v45  ;;  %v12763_v55 = vsel %vm672_vm0, %v5617_v45, %v5619_v32  ;;  %v5922_v50 = vsel %vm3155_vm5, %v5919_v57, %v5921_v37 }
 0x423   : > { %9649 = vmatprep.subr.mxu0 %v7983_v0  ;;  %9716 = vmatprep.subr.mxu1 %v8032_v33 }
 0x424   : > { %9614 = vmatmul.mubr.msk.f32.gmra.mxu0 %vm4844_vm10, %v5138_v2  ;;  %9677 = vmatmul.mubr.msk.f32.vlgmr.msra.gmra.mxu1 %vm4844_vm10, %v12679_v40  ;;  %v5441_v2 = vrot.slane %v12551_v20, 3 }
 0x425   : > { %9651 = vmatprep.mubr.msk.f32.mxu0 %vm4844_vm10, %v5432_v18  ;;  %9679 = vmatprep.mubr.msk.f32.mxu1 %vm4844_vm10, %v12688_v31 }
 0x426   : > { %9650 = vmatpush3.msra.mxu0 %v7983_v0  ;;  %9717 = vmatpush3.msra.mxu1 %v8032_v33  ;;  %v5442_v51 = vsel %vm1984_vm4, %v5439_v54, %v5441_v2  ;;  %v5444_v6 = vsel %vm1984_vm4, %v5441_v2, %v5443_v52  ;;  %v5447_v0 = vrot.slane %v12595_v3, 3  ;;  %v5910_v33 = vrot.slane %v12458_v49, 5 }
 0x427   : > { %9718 = vmatprep.subr.mxu1 %v8031_v11  ;;  %9691 = vmatprep.subr.mxu0 %v8017_v53  ;;  %v5923_v54 = vrot.slane %v12576_v17, 5 }
 0x428   : > { %9652 = vmatmul.mubr.msk.f32.vlgmr.msra.gmra.mxu0 %vm4844_vm10, %v5434_v29  ;;  %9680 = vmatmul.mubr.msk.f32.gmra.mxu1 %vm4844_vm10, %v12704_v60  ;;  %v5912_v49 = vsel %vm3155_vm5, %v5910_v33, %v5911_v5  ;;  %v5448_v18 = vsel %vm1984_vm4, %v5445_v35, %v5447_v0  ;;  %v5450_v62 = vsel %vm1984_vm4, %v5447_v0, %v5449_v63  ;;  %v8611_v29 = vpop.f32.mrf.mxu0 }
 0x429   : > { %9654 = vmatprep.mubr.msk.f32.mxu0 %vm4844_vm10, %v5436_v15  ;;  %9682 = vmatprep.mubr.msk.f32.mxu1 %vm4844_vm10, %v12712_v25  ;;  %v8612_v15 = vadd.f32 %v8611_v29, %v8610_v4  ;;  %v5924_v17 = vsel %vm3155_vm5, %v5921_v37, %v5923_v54 }
 0x42a   : > { %9719 = vmatpush3.msra.mxu1 %v8031_v11  ;;  %9692 = vmatpush3.msra.mxu0 %v8017_v53  ;;  %v5914_v11 = vsel %vm3155_vm5, %v5911_v5, %v5913_v26  ;;  %v5917_v53 = vrot.slane %v12537_v16, 5 }
 0x42b   : > { %9720 = vmatprep.subr.mxu1 %v8030_v19  ;;  %9693 = vmatprep.subr.mxu0 %v8016_v28  ;;  %v4801_v13 = vadd.f32 %v8612_v15, %v12547_v61 }
 0x42c   : > { %9655 = vmatmul.mubr.msk.f32.gmra.mxu0 %vm4844_vm10, %v5438_v34  ;;  %9683 = vmatmul.mubr.msk.f32.gmra.mxu1 %vm4844_vm10, %v12727_v14  ;;  %v5918_v16 = vsel %vm3155_vm5, %v5915_v41, %v5917_v53  ;;  %v5920_v20 = vsel %vm3155_vm5, %v5917_v53, %v5919_v57 }
 0x42d   : > { %9657 = vmatprep.mubr.msk.f32.mxu0 %vm4844_vm10, %v5440_v39  ;;  %9685 = vmatprep.mubr.msk.f32.mxu1 %vm4844_vm10, %v12739_v10  ;;  %v5775_v2 = vrot.slane %v4801_v13, 4 }
 0x42e   : > { %9721 = vmatpush3.msra.mxu1 %v8030_v19  ;;  %9694 = vmatpush3.msra.mxu0 %v8016_v28  ;;  %v5927_v19 = vrot.slane %v12730_v58, 5  ;;  %v5929_v28 = vrot.slane %v4801_v13, 5 }
 0x42f   : > { %9722 = vmatprep.subr.mxu1 %v8029_v59  ;;  %9695 = vmatprep.subr.mxu0 %v8015_v56  ;;  %v5776_v39 = vsel %vm672_vm0, %v5621_v22, %v5775_v2 }
 0x430   : > { %9658 = vmatmul.mubr.msk.f32.gmra.mxu0 %vm4844_vm10, %v5442_v51  ;;  %9686 = vmatmul.mubr.msk.f32.gmra.mxu1 %vm4844_vm10, %v12755_v38  ;;  %v5930_v45 = vsel %vm3155_vm5, %v5927_v19, %v5929_v28 }
 0x431   : > { %9660 = vmatprep.mubr.msk.f32.mxu0 %vm4844_vm10, %v5444_v6  ;;  %9688 = vmatprep.mubr.msk.f32.mxu1 %vm4844_vm10, %v12763_v55 }
 0x432   : > { %9723 = vmatpush3.msra.mxu1 %v8029_v59  ;;  %9696 = vmatpush3.msra.mxu0 %v8015_v56 }
 0x433   : > { %9724 = vmatprep.subr.mxu1 %v8028_v36  ;;  %9697 = vmatprep.subr.mxu0 %v8014_v23 }
 0x434   : > { %9661 = vmatmul.mubr.msk.f32.gmra.mxu0 %vm4844_vm10, %v5446_v12  ;;  %9689 = vmatmul.mubr.msk.f32.gmra.mxu1 %vm4844_vm10, %v12782_v46 }
 0x435   : > { %9726 = vmatprep.mubr.msk.f32.mxu1 %vm4844_vm10, %v5912_v49  ;;  %9663 = vmatprep.mubr.msk.f32.mxu0 %vm4844_vm10, %v5448_v18 }
 0x436   : > { %9725 = vmatpush3.msra.mxu1 %v8028_v36  ;;  %9698 = vmatpush3.msra.mxu0 %v8014_v23 }
 0x437   : > { %9699 = vmatprep.subr.mxu0 %v8013_v21 }
 0x438   : > { %9664 = vmatmul.mubr.msk.f32.gmra.mxu0 %vm4844_vm10, %v5450_v62  ;;  %9727 = vmatmul.mubr.msk.f32.vlgmr.msra.gmra.mxu1 %vm4844_vm10, %v5914_v11 }
 0x439   : > { %9701 = vmatprep.mubr.msk.f32.mxu0 %vm4844_vm10, %v12679_v40  ;;  %9729 = vmatprep.mubr.msk.f32.mxu1 %vm4844_vm10, %v5916_v43  ;;  %v8046_v40 = vld [vmem:[%s13349_s5 + $0x158] sm:$0xff] }
 0x43a   : > { %9700 = vmatpush3.msra.mxu0 %v8013_v21 }
 0x43b   : > { %9741 = vmatprep.subr.mxu0 %v8047_v48 }
 0x43c   : > { %9702 = vmatmul.mubr.msk.f32.vlgmr.msra.gmra.mxu0 %vm4844_vm10, %v12688_v31  ;;  %9730 = vmatmul.mubr.msk.f32.gmra.mxu1 %vm4844_vm10, %v5918_v16  ;;  %v5925_v31 = vrot.slane %v12595_v3, 5  ;;  %v6280_v3 = vld [vmem:[%s13352_s8] sm:$0xff] }
 0x43d   : > { %9704 = vmatprep.mubr.msk.f32.mxu0 %vm4844_vm10, %v12704_v60  ;;  %9732 = vmatprep.mubr.msk.f32.mxu1 %vm4844_vm10, %v5920_v20  ;;  %v8045_v60 = vld [vmem:[%s13349_s5 + $0x150] sm:$0xff] }
 0x43e   : > { %9742 = vmatpush3.msra.mxu0 %v8047_v48  ;;  %v5926_v61 = vsel %vm3155_vm5, %v5923_v54, %v5925_v31  ;;  %v5928_v34 = vsel %vm3155_vm5, %v5925_v31, %v5927_v19 }
 0x43f   : > { %9743 = vmatprep.subr.mxu0 %v8046_v40 }
 0x440   : > { %9705 = vmatmul.mubr.msk.f32.gmra.mxu0 %vm4844_vm10, %v12712_v25  ;;  %9733 = vmatmul.mubr.msk.f32.gmra.mxu1 %vm4844_vm10, %v5922_v50  ;;  %v8044_v25 = vld [vmem:[%s13349_s5 + $0x148] sm:$0xff] }
 0x441   : > { %9707 = vmatprep.mubr.msk.f32.mxu0 %vm4844_vm10, %v12727_v14  ;;  %9735 = vmatprep.mubr.msk.f32.mxu1 %vm4844_vm10, %v5924_v17  ;;  %v8043_v14 = vld [vmem:[%s13349_s5 + $0x140] sm:$0xff] }
 0x442   : > { %9744 = vmatpush3.msra.mxu0 %v8046_v40 }
 0x443   : > { %9745 = vmatprep.subr.mxu0 %v8045_v60 }
 0x444   : > { %9708 = vmatmul.mubr.msk.f32.gmra.mxu0 %vm4844_vm10, %v12739_v10  ;;  %9736 = vmatmul.mubr.msk.f32.gmra.mxu1 %vm4844_vm10, %v5926_v61  ;;  %v6099_v10 = vrot.slane %v12730_v58, 6 }
 0x445   : > { %9710 = vmatprep.mubr.msk.f32.mxu0 %vm4844_vm10, %v12755_v38  ;;  %9746 = vmatpush3.msra.mxu0 %v8045_v60 }
 0x446   : > { %9747 = vmatprep.subr.mxu0 %v8044_v25  ;;  %9738 = vmatprep.mubr.msk.f32.mxu1 %vm4844_vm10, %v5928_v34 }
 0x447   : > { %9748 = vmatpush3.msra.mxu0 %v8044_v25 }
 0x448   : > { %9711 = vmatmul.mubr.msk.f32.gmra.mxu0 %vm4844_vm10, %v12763_v55  ;;  %9739 = vmatmul.mubr.msk.f32.gmra.mxu1 %vm4844_vm10, %v5930_v45 }
 0x449   : > { %9713 = vmatprep.mubr.msk.f32.mxu0 %vm4844_vm10, %v12782_v46  ;;  %9749 = vmatprep.subr.mxu0 %v8043_v14 }
 0x44a   : > { %9750 = vmatpush3.msra.mxu0 %v8043_v14 }
 0x44b   : > { %9789 = vmatprep.subr.mxu0 %v13374_v8 }
 0x44c   : > { %9714 = vmatmul.mubr.msk.f32.gmra.mxu0 %vm4844_vm10, %v5776_v39 }
 0x44d   : > { %9751 = vmatprep.mubr.msk.f32.mxu0 %vm4844_vm10, %v12513_v44  ;;  %v6101_v44 = vrot.slane %v4801_v13, 6 }
 0x450   : > { %9752 = vmatmul.mubr.msk.f32.vlgmr.msra.gmra.mxu0 %vm4844_vm10, %v12527_v24  ;;  %v6100_v24 = vsel %vm3591_vm6, %v6097_v9, %v6099_v10 }
 0x451   : > { %9754 = vmatprep.mubr.msk.f32.mxu0 %vm4844_vm10, %v12542_v7  ;;  %v6102_v7 = vsel %vm3591_vm6, %v6099_v10, %v6101_v44 }
 0x454   : > { %9755 = vmatmul.mubr.msk.f32.gmra.mxu0 %vm4844_vm10, %v12556_v30  ;;  %v6283_v30 = vld [vmem:[%s13352_s8 + $0x18] sm:$0xff] }
 0x455   : > { %9757 = vmatprep.mubr.msk.f32.mxu0 %vm4844_vm10, %v12568_v42  ;;  %9766 = vmatprep.subr.mxu1 %v6283_v30  ;;  %v6282_v42 = vld [vmem:[%s13352_s8 + $0x10] sm:$0xff] }
 0x456   : > { %9767 = vmatpush3.msra.mxu1 %v6283_v30 }
 0x457   : > { %9768 = vmatprep.subr.mxu1 %v6282_v42 }
 0x458   : > { %9758 = vmatmul.mubr.msk.f32.gmra.mxu0 %vm4844_vm10, %v12583_v1  ;;  %9769 = vmatpush3.msra.mxu1 %v6282_v42  ;;  %v6281_v1 = vld [vmem:[%s13352_s8 + $0x8] sm:$0xff] }
 0x459   : > { %9760 = vmatprep.mubr.msk.f32.mxu0 %vm4844_vm10, %v12601_v27  ;;  %9770 = vmatprep.subr.mxu1 %v6281_v1 }
 0x45a   : > { %9771 = vmatpush3.msra.mxu1 %v6281_v1 }
 0x45b   : > { %9772 = vmatprep.subr.mxu1 %v6280_v3 }
 0x45c   : > { %9761 = vmatmul.mubr.msk.f32.gmra.mxu0 %vm4844_vm10, %v12620_v47  ;;  %9773 = vmatpush3.msra.mxu1 %v6280_v3 }
 0x45d   : > { %9763 = vmatprep.mubr.msk.f32.mxu0 %vm4844_vm10, %v6100_v24  ;;  %9824 = vmatprep.subr.mxu1 %v13374_v8 }
 0x460   : > { %9764 = vmatmul.mubr.msk.f32.gmra.mxu0 %vm4844_vm10, %v6102_v7 }
 0x461   : > { %9809 = vmatprep.mubr.msk.f32.mxu0 %vm10020_vm8, %v13374_v8 }
 0x4ac   : > { %v9578_v27 = vpop.f32.mrf.mxu1 }
 0x4ae   : > { %v12899_v9 = vpop.f32.mrf.mxu1 }
 0x4b3   : > { %v9553_v47 = vpop.f32.mrf.mxu0 }
 0x4b4   : > { %v12901_v58 = vpop.f32.mrf.mxu1  ;;  %v5072_v3 = vadd.f32 %v9578_v27, %v9553_v47 }
 0x4b5   : > { %v4931_v52 = vpop.f32.mrf.mxu0 }
 0x4b6   : > { %v12903_v32 = vpop.f32.mrf.mxu1 }
 0x4bb   : > { %v9556_v59 = vpop.f32.mrf.mxu0 }
 0x4bc   : > { %v12905_v56 = vpop.f32.mrf.mxu1 }
 0x4bd   : > { %v12907_v22 = vpop.f32.mrf.mxu0 }
 0x4be   : > { %v12909_v51 = vpop.f32.mrf.mxu1 }
 0x4c3   : > { %v12911_v38 = vpop.f32.mrf.mxu0 }
 0x4c4   : > { %v12913_v35 = vpop.f32.mrf.mxu1  ;;  %v5092_v27 = vadd.f32 %v12905_v56, %v12911_v38 }
 0x4c5   : > { %v12915_v6 = vpop.f32.mrf.mxu0 }
 0x4c6   : > { %v12917_v55 = vpop.f32.mrf.mxu1 }
 0x4cb   : > { %v12919_v5 = vpop.f32.mrf.mxu0 }
 0x4cc   : > { %v12921_v36 = vpop.f32.mrf.mxu1 }
 0x4cd   : > { %v12923_v0 = vpop.f32.mrf.mxu0 }
 0x4ce   : > { %v12925_v23 = vpop.f32.mrf.mxu1  ;;  %v5097_v38 = vadd.f32 %v12917_v55, %v12923_v0 }
 0x4d0   : > { %v12927_v33 = vpop.f32.mrf.mxu0  ;;  %v9628_v63 = vpop.f32.mrf.mxu1 }
 0x4d2   : > { %v12929_v12 = vpop.f32.mrf.mxu0  ;;  %v5364_v46 = vpop.f32.mrf.mxu1 }
 0x4d3   : > { %v5107_v0 = vadd.f32 %v12925_v23, %v12929_v12 }
 0x4d4   : > { %v9603_v26 = vpop.f32.mrf.mxu0  ;;  %v9631_v49 = vpop.f32.mrf.mxu1 }
 0x4d6   : > { %v5226_v18 = vpop.f32.mrf.mxu0  ;;  %v12931_v41 = vpop.f32.mrf.mxu1 }
 0x4d8   : > { %v9606_v21 = vpop.f32.mrf.mxu0  ;;  %v12933_v4 = vpop.f32.mrf.mxu1 }
 0x4da   : > { %v5236_v62 = vpop.f32.mrf.mxu0  ;;  %v12935_v11 = vpop.f32.mrf.mxu1 }
 0x4dc   : > { %v9609_v53 = vpop.f32.mrf.mxu0  ;;  %v12937_v43 = vpop.f32.mrf.mxu1 }
 0x4de   : > { %v5246_v57 = vpop.f32.mrf.mxu0  ;;  %v12939_v29 = vpop.f32.mrf.mxu1 }
 0x4df   : > { %13577 = vst [vmem:[#allocation34_spill] sm:$0xff] %v12939_v29 }
 0x4e0   : > { %v9612_v48 = vpop.f32.mrf.mxu0  ;;  %v12941_v16 = vpop.f32.mrf.mxu1 }
 0x4e1   : > { %13578 = vst [vmem:[#allocation33_spill] sm:$0xff] %v12941_v16  ;;  %v5082_v16 = vadd.f32 %v12901_v58, %v9556_v59  ;;  %v5280_v58 = vadd.f32 %v9609_v53, %v5092_v27 }
 0x4e2   : > { %v12943_v37 = vpop.f32.mrf.mxu0  ;;  %v12945_v15 = vpop.f32.mrf.mxu1 }
 0x4e3   : > { %13579 = vst [vmem:[#allocation35_spill] sm:$0xff] %v12945_v15  ;;  %v5276_v15 = vadd.f32 %v9603_v26, %v5072_v3  ;;  %v5087_v26 = vadd.f32 %v12909_v51, %v12915_v6  ;;  %v5418_v51 = vadd.f32 %v12933_v4, %v5280_v58 }
 0x4e4   : > { %v12947_v20 = vpop.f32.mrf.mxu0  ;;  %v9678_v54 = vpop.f32.mrf.mxu1 }
 0x4e6   : > { %v12949_v40 = vpop.f32.mrf.mxu0  ;;  %v5709_v50 = vpop.f32.mrf.mxu1 }
 0x4e7   : > { %13580 = vst [vmem:[#allocation4_spill] sm:$0xff] %v12949_v40 }
 0x4e8   : > { %v9653_v31 = vpop.f32.mrf.mxu0  ;;  %v12951_v13 = vpop.f32.mrf.mxu1 }
 0x4ea   : > { %v5537_v17 = vpop.f32.mrf.mxu0  ;;  %v12953_v60 = vpop.f32.mrf.mxu1 }
 0x4ec   : > { %v9656_v19 = vpop.f32.mrf.mxu0  ;;  %v12955_v61 = vpop.f32.mrf.mxu1 }
 0x4ed   : > { %13581 = vst [vmem:[#allocation3_spill] sm:$0xff] %v12955_v61 }
 0x4ee   : > { %v5547_v28 = vpop.f32.mrf.mxu0  ;;  %v12957_v25 = vpop.f32.mrf.mxu1 }
 0x4ef   : > { %13582 = vst [vmem:[#allocation56_spill] sm:$0xff] %v12957_v25 }
 0x4f0   : > { %v9659_v34 = vpop.f32.mrf.mxu0  ;;  %v12959_v14 = vpop.f32.mrf.mxu1 }
 0x4f1   : > { %13583 = vst [vmem:[#allocation25_spill] sm:$0xff] %v12959_v14  ;;  %v5067_v14 = vadd.f32 %v12899_v9, %v4931_v52 }
 0x4f2   : > { %v5557_v2 = vpop.f32.mrf.mxu0  ;;  %v12961_v45 = vpop.f32.mrf.mxu1 }
 0x4f3   : > { %13584 = vst [vmem:[#allocation30_spill] sm:$0xff] %v12961_v45 }
 0x4f4   : > { %v9662_v39 = vpop.f32.mrf.mxu0  ;;  %v12963_v10 = vpop.f32.mrf.mxu1 }
 0x4f5   : > { %13585 = vst [vmem:[#allocation55_spill] sm:$0xff] %v12963_v10  ;;  %v5275_v10 = vadd.f32 %v5226_v18, %v5067_v14 }
 0x4f6   : > { %v12965_v44 = vpop.f32.mrf.mxu0  ;;  %v12967_v24 = vpop.f32.mrf.mxu1 }
 0x4f7   : > { %13586 = vst [vmem:[#allocation6_spill] sm:$0xff] %v12965_v44  ;;  %13587 = vst [vmem:[#allocation5_spill] sm:$0xff] %v12967_v24  ;;  %v5077_v24 = vadd.f32 %v12903_v32, %v12907_v22  ;;  %v5278_v44 = vadd.f32 %v9606_v21, %v5082_v16  ;;  %v5413_v9 = vadd.f32 %v5364_v46, %v5275_v10 }
 0x4f8   : > { %v12969_v7 = vpop.f32.mrf.mxu0  ;;  %v9728_v42 = vpop.f32.mrf.mxu1  ;;  %v5102_v32 = vadd.f32 %v12913_v35, %v12919_v5  ;;  %v5279_v21 = vadd.f32 %v5246_v57, %v5087_v26  ;;  %v5112_v35 = vadd.f32 %v12921_v36, %v12927_v33  ;;  %v5281_v5 = vadd.f32 %v12943_v37, %v5097_v38 }
 0x4f9   : > { %13588 = vst [vmem:[#allocation58_spill] sm:$0xff] %v12969_v7  ;;  %v5414_v7 = vadd.f32 %v9628_v63, %v5276_v15  ;;  %v5277_v47 = vadd.f32 %v5236_v62, %v5077_v24  ;;  %v5586_v59 = vadd.f32 %v5537_v17, %v5413_v9  ;;  %v5416_v18 = vadd.f32 %v9631_v49, %v5278_v44  ;;  %v13592_v44 = vld [vmem:[#allocation3_spill] sm:$0xff] }
 0x4fa   : > { %v12971_v30 = vpop.f32.mrf.mxu0  ;;  %v6017_v25 = vpop.f32.mrf.mxu1  ;;  %v5282_v46 = vadd.f32 %v9612_v48, %v5102_v32  ;;  %v5591_v17 = vadd.f32 %v9659_v34, %v5418_v51  ;;  %v5284_v4 = vadd.f32 %v12947_v20, %v5112_v35  ;;  %v13597_v9 = vld [vmem:[#allocation35_spill] sm:$0xff] }
 0x4fb   : > { %13589 = vst [vmem:[#allocation36_spill] sm:$0xff] %v12971_v30  ;;  %v5587_v40 = vadd.f32 %v9653_v31, %v5414_v7  ;;  %v5589_v16 = vadd.f32 %v9656_v19, %v5416_v18  ;;  %v5415_v15 = vadd.f32 %v12931_v41, %v5277_v47  ;;  %v5758_v49 = vadd.f32 %v5709_v50, %v5586_v59  ;;  %v13590_v19 = vld [vmem:[#allocation4_spill] sm:$0xff]  ;;  %v13598_v59 = vld [vmem:[#allocation25_spill] sm:$0xff] }
 0x4fc   : > { %v9703_v1 = vpop.f32.mrf.mxu0  ;;  %v9731_v29 = vpop.f32.mrf.mxu1  ;;  %v5417_v41 = vadd.f32 %v12935_v11, %v5279_v21  ;;  %v5420_v48 = vadd.f32 %v12937_v43, %v5282_v46  ;;  %v13591_v11 = vld [vmem:[#allocation34_spill] sm:$0xff]  ;;  %v5763_v23 = vadd.f32 %v13592_v44, %v5591_v17  ;;  %v13601_v17 = vld [vmem:[#allocation55_spill] sm:$0xff] }
 0x4fd   : > { %v5759_v56 = vadd.f32 %v9678_v54, %v5587_v40  ;;  %v5588_v31 = vadd.f32 %v5547_v28, %v5415_v15  ;;  %v5761_v55 = vadd.f32 %v12951_v13, %v5589_v16  ;;  %v5283_v28 = vadd.f32 %v13590_v19, %v5107_v0  ;;  %v13003_v43 = vld [vmem:[%s13350_s6] ss:$0 sm:$0xff] }
 0x4fe   : > { %v5845_v8 = vpop.f32.mrf.mxu0  ;;  %v6027_v22 = vpop.f32.mrf.mxu1  ;;  %v5590_v50 = vadd.f32 %v5557_v2, %v5417_v41  ;;  %v5593_v34 = vadd.f32 %v9662_v39, %v5420_v48  ;;  %v13593_v2 = vld [vmem:[#allocation6_spill] sm:$0xff] }
 0x4ff   : > { %v5895_v6 = vadd.f32 %v9703_v1, %v5759_v56  ;;  %v5894_v54 = vadd.f32 %v5845_v8, %v5758_v49  ;;  %v5760_v33 = vadd.f32 %v12953_v60, %v5588_v31  ;;  %v5419_v8 = vadd.f32 %v13591_v11, %v5281_v5  ;;  %v13600_v46 = vld [vmem:[#allocation30_spill] sm:$0xff] }
 0x500   : > { %v9706_v45 = vpop.f32.mrf.mxu0  ;;  %v9734_v53 = vpop.f32.mrf.mxu1  ;;  %v5421_v26 = vadd.f32 %v13597_v9, %v5283_v28  ;;  %v5765_v18 = vadd.f32 %v13598_v59, %v5593_v34 }
 0x501   : > { %v5897_v36 = vadd.f32 %v9706_v45, %v5761_v55  ;;  %v6067_v37 = vadd.f32 %v9728_v42, %v5895_v6  ;;  %v6066_v20 = vadd.f32 %v6017_v25, %v5894_v54  ;;  %v5592_v60 = vadd.f32 %v13593_v2, %v5419_v8  ;;  %v13594_v45 = vld [vmem:[#allocation33_spill] sm:$0xff]  ;;  %v13595_v42 = vld [vmem:[#allocation56_spill] sm:$0xff] }
 0x502   : > { %v5855_v61 = vpop.f32.mrf.mxu0  ;;  %v6037_v14 = vpop.f32.mrf.mxu1  ;;  %v5422_v24 = vadd.f32 %v13594_v45, %v5284_v4  ;;  %v5762_v1 = vadd.f32 %v13595_v42, %v5590_v50  ;;  %v13602_v50 = vld [vmem:[#allocation5_spill] sm:$0xff] }
 0x503   : > { %v5896_v10 = vadd.f32 %v5855_v61, %v5760_v33  ;;  %v6069_v27 = vadd.f32 %v9731_v29, %v5897_v36  ;;  %v13596_v61 = vld [vmem:[#allocation58_spill] sm:$0xff]  ;;  %v5764_v31 = vadd.f32 %v13600_v46, %v5592_v60  ;;  %v6277_v46 = vld [vmem:[%s13351_s7 + $0x10] sm:$0xff] }
 0x504   : > { %v9709_v30 = vpop.f32.mrf.mxu0  ;;  %v5595_v47 = vadd.f32 %v13596_v61, %v5422_v24  ;;  %v9737_v58 = vpop.f32.mrf.mxu1 }
 0x505   : > { %v5899_v39 = vadd.f32 %v9709_v30, %v5763_v23  ;;  %v6068_v56 = vadd.f32 %v6027_v22, %v5896_v10  ;;  %v13599_v30 = vld [vmem:[#allocation36_spill] sm:$0xff] }
 0x506   : > { %v5865_v52 = vpop.f32.mrf.mxu0  ;;  %v5594_v38 = vadd.f32 %v13599_v30, %v5421_v26  ;;  %v6047_v5 = vpop.f32.mrf.mxu1  ;;  %v5767_v41 = vadd.f32 %v13601_v17, %v5595_v47  ;;  %v13603_v26 = vmov 0.0   ;;  %v6275_v30 = vld [vmem:[%s13351_s7] sm:$0xff]  ;;  %v8084_v17 = vld [vmem:[%s13353_s9 + $0x30] sm:$0xff] }
 0x507   : > { %v5898_v21 = vadd.f32 %v5865_v52, %v5762_v1  ;;  %v6071_v35 = vadd.f32 %v9734_v53, %v5899_v39 }
 0x508   : > { %v9712_v63 = vpop.f32.mrf.mxu0  ;;  %v5766_v36 = vadd.f32 %v13602_v50, %v5594_v38  ;;  %v9740_v28 = vpop.f32.mrf.mxu1  ;;  %v6276_v38 = vld [vmem:[%s13351_s7 + $0x8] sm:$0xff]  ;;  %v6541_v50 = vld [vmem:[%s13353_s9 + $0x10] sm:$0xff] }
 0x509   : > { %v5901_v51 = vadd.f32 %v9712_v63, %v5765_v18  ;;  %v6070_v48 = vadd.f32 %v6037_v14, %v5898_v21 }
 0x50a   : > { %v5875_v62 = vpop.f32.mrf.mxu0 }
 0x50b   : > { %v5900_v0 = vadd.f32 %v5875_v62, %v5764_v31  ;;  %v6073_v19 = vadd.f32 %v9737_v58, %v5901_v51  ;;  %v6278_v31 = vld [vmem:[%s13351_s7 + $0x18] sm:$0xff]  ;;  %v8077_v51 = vld [vmem:[%s13353_s9 + $0x28] sm:$0xff] }
 0x50c   : > { %v9715_v57 = vpop.f32.mrf.mxu0 }
 0x50d   : > { %v5903_v53 = vadd.f32 %v9715_v57, %v5767_v41  ;;  %v6072_v14 = vadd.f32 %v6047_v5, %v5900_v0  ;;  %v8085_v5 = vld [vmem:[%s13353_s9 + $0x38] sm:$0xff] }
 0x50e   : > { %v5885_v40 = vpop.f32.mrf.mxu0 }
 0x50f   : > { %v5902_v8 = vadd.f32 %v5885_v40, %v5766_v36  ;;  %v6075_v23 = vadd.f32 %v9740_v28, %v5903_v53 }
 0x510   : > { %v9753_v13 = vpop.f32.mrf.mxu0 }
 0x511   : > { %v6239_v12 = vadd.f32 %v9753_v13, %v6067_v37 }
 0x512   : > { %v6189_v7 = vpop.f32.mrf.mxu0 }
 0x513   : > { %v6238_v3 = vadd.f32 %v6189_v7, %v6066_v20  ;;  %v6256_v32 = vadd.f32 %v13003_v43, %v6239_v12  ;;  %v6057_v20 = vpop.f32.mrf.mxu1 }
 0x514   : > { %v9756_v25 = vpop.f32.mrf.mxu0  ;;  %v6074_v24 = vadd.f32 %v6057_v20, %v5902_v8  ;;  %v6539_v8 = vld [vmem:[%s13353_s9] sm:$0xff] }
 0x515   : > { %v6255_v16 = vadd.f32 %v13003_v43, %v6238_v3  ;;  %v6241_v15 = vadd.f32 %v9756_v25, %v6069_v27  ;;  %v6266_v54 = vmax.f32 %v6256_v32, 0.0 }
 0x516   : > { %v6199_v29 = vpop.f32.mrf.mxu0 }
 0x517   : > { %v6265_v6 = vmax.f32 %v6255_v16, 0.0  ;;  %v6240_v49 = vadd.f32 %v6199_v29, %v6068_v56  ;;  %v6258_v52 = vadd.f32 %v13003_v43, %v6241_v15  ;;  %v6279_v29 = vld [vmem:[%s13351_s7 + $0x20] sm:$0xf] }
 0x518   : > { %v9759_v55 = vpop.f32.mrf.mxu0 }
 0x519   : > { %v6257_v22 = vadd.f32 %v13003_v43, %v6240_v49  ;;  %v6243_v4 = vadd.f32 %v9759_v55, %v6071_v35  ;;  %9774 = vmatprep.mubr.msk.f32.mxu1 %vm6284_vm11, %v6265_v6  ;;  %v6268_v34 = vmax.f32 %v6258_v52, 0.0  ;;  %v8076_v6 = vld [vmem:[%s13353_s9 + $0x20] sm:$0xff]  ;;  %v8075_v35 = vld [vmem:[%s13353_s9 + $0x18] sm:$0xff] }
 0x51a   : > { %v6209_v63 = vpop.f32.mrf.mxu0  ;;  %9775 = vmatmul.mubr.msk.f32.vlgmr.msra.gmra.mxu1 %vm6284_vm11, %v6266_v54  ;;  %v8086_v49 = vld [vmem:[%s13353_s9 + $0x40] sm:$0xff] }
 0x51b   : > { %v6267_v33 = vmax.f32 %v6257_v22, 0.0  ;;  %v6242_v37 = vadd.f32 %v6209_v63, %v6070_v48  ;;  %v6260_v11 = vadd.f32 %v13003_v43, %v6243_v4  ;;  %9825 = vmatpush3.msra.mxu1 %v8077_v51 }
 0x51c   : > { %v9762_v62 = vpop.f32.mrf.mxu0  ;;  %9826 = vmatprep.subr.mxu1 %v13603_v26 }
 0x51d   : > { %v6259_v13 = vadd.f32 %v13003_v43, %v6242_v37  ;;  %v6245_v10 = vadd.f32 %v9762_v62, %v6073_v19  ;;  %9777 = vmatprep.mubr.msk.f32.mxu1 %vm6284_vm11, %v6267_v33  ;;  %v6270_v2 = vmax.f32 %v6260_v11, 0.0  ;;  %9827 = vmatpush3.msra.mxu1 %v8076_v6  ;;  %v6540_v33 = vld [vmem:[%s13353_s9 + $0x8] sm:$0xff]  ;;  %v8098_v37 = vld [vmem:[%s13353_s9 + $0x70] sm:$0xff]  ;;  %v8120_v6 = vld [vmem:[%s13353_s9 + $0xc0] sm:$0xff] }
 0x51e   : > { %v6219_v44 = vpop.f32.mrf.mxu0  ;;  %9778 = vmatmul.mubr.msk.f32.gmra.mxu1 %vm6284_vm11, %v6268_v34  ;;  %9828 = vmatprep.subr.mxu1 %v13603_v26 }
 0x51f   : > { %v6269_v57 = vmax.f32 %v6259_v13, 0.0  ;;  %v6244_v12 = vadd.f32 %v6219_v44, %v6072_v14  ;;  %v6262_v60 = vadd.f32 %v13003_v43, %v6245_v10  ;;  %9829 = vmatpush3.msra.mxu1 %v8075_v35  ;;  %v8097_v10 = vld [vmem:[%s13353_s9 + $0x68] sm:$0xff]  ;;  %v8096_v44 = vld [vmem:[%s13353_s9 + $0x60] sm:$0xff]  ;;  %v8115_v35 = vld [vmem:[%s13353_s9 + $0xb0] sm:$0xff] }
 0x520   : > { %v9765_v45 = vpop.f32.mrf.mxu0  ;;  %9839 = vmatprep.subr.mxu1 %v13603_v26 }
 0x521   : > { %v6261_v40 = vadd.f32 %v13003_v43, %v6244_v12  ;;  %v6247_v7 = vadd.f32 %v9765_v45, %v6075_v23  ;;  %9780 = vmatprep.mubr.msk.f32.mxu1 %vm6284_vm11, %v6269_v57  ;;  %v6272_v3 = vmax.f32 %v6262_v60, 0.0  ;;  %v8110_v45 = vld [vmem:[%s13353_s9 + $0xa0] sm:$0xff] }
 0x522   : > { %v6229_v39 = vpop.f32.mrf.mxu0  ;;  %9781 = vmatmul.mubr.msk.f32.gmra.mxu1 %vm6284_vm11, %v6270_v2  ;;  %v8092_v2 = vld [vmem:[%s13353_s9 + $0x58] sm:$0xff] }
 0x523   : > { %v6271_v42 = vmax.f32 %v6261_v40, 0.0  ;;  %v6246_v1 = vadd.f32 %v6229_v39, %v6074_v24  ;;  %v6264_v27 = vadd.f32 %v13003_v43, %v6247_v7  ;;  %v8091_v40 = vld [vmem:[%s13353_s9 + $0x50] sm:$0xff]  ;;  %v8090_v7 = vld [vmem:[%s13353_s9 + $0x48] sm:$0xff] }
 0x525   : > { %v6263_v61 = vadd.f32 %v13003_v43, %v6246_v1  ;;  %9783 = vmatprep.mubr.msk.f32.mxu1 %vm6284_vm11, %v6271_v42  ;;  %v6274_v9 = vmax.f32 %v6264_v27, 0.0  ;;  %v8109_v1 = vld [vmem:[%s13353_s9 + $0x98] sm:$0xff]  ;;  %v8108_v27 = vld [vmem:[%s13353_s9 + $0x90] sm:$0xff] }
 0x526   : > { %9784 = vmatmul.mubr.msk.f32.gmra.mxu1 %vm6284_vm11, %v6272_v3 }
 0x527   : > { %v6273_v47 = vmax.f32 %v6263_v61, 0.0 }
 0x529   : > { %9786 = vmatprep.mubr.msk.f32.mxu1 %vm6284_vm11, %v6273_v47 }
 0x52a   : > { %9787 = vmatmul.mubr.msk.f32.gmra.mxu1 %vm6284_vm11, %v6274_v9 }
 0x52b   : > { %9830 = vmatprep.mubr.msk.f32.mxu1 %vm10020_vm8, %v13603_v26 }
 0x5da   : > { %v9776_v58 = vpop.f32.mrf.mxu1 }
 0x5dc   : > { %v6381_v59 = vpop.f32.mrf.mxu1 }
 0x5de   : > { %v9779_v18 = vpop.f32.mrf.mxu1 }
 0x5e0   : > { %v6391_v32 = vpop.f32.mrf.mxu1 }
 0x5e2   : > { %v9782_v25 = vpop.f32.mrf.mxu1 }
 0x5e4   : > { %v6401_v21 = vpop.f32.mrf.mxu1 }
 0x5e6   : > { %v9785_v43 = vpop.f32.mrf.mxu1 }
 0x5e8   : > { %v6411_v16 = vpop.f32.mrf.mxu1 }
 0x5ea   : > { %v9788_v15 = vpop.f32.mrf.mxu1 }
 0x5eb   : > { %9790 = vmatpush3.msk.msra.mxu0 %vm1247_vm3, %v9788_v15 }
 0x5ec   : > { %v6421_v56 = vpop.f32.mrf.mxu1  ;;  %9791 = vmatprep.subr.mxu0 %v13603_v26 }
 0x5ed   : > { %9792 = vmatpush3.msra.mxu0 %v6421_v56 }
 0x5ee   : > { %9793 = vmatprep.subr.mxu0 %v13603_v26 }
 0x5ef   : > { %9794 = vmatpush3.msra.mxu0 %v9785_v43 }
 0x5f0   : > { %9795 = vmatprep.subr.mxu0 %v13603_v26 }
 0x5f1   : > { %9796 = vmatpush3.msra.mxu0 %v6411_v16  ;;  %v8102_v16 = vld [vmem:[%s13353_s9 + $0x78] sm:$0xff] }
 0x5f2   : > { %9797 = vmatprep.subr.mxu0 %v13603_v26 }
 0x5f3   : > { %9798 = vmatpush3.msra.mxu0 %v9782_v25  ;;  %v8103_v25 = vld [vmem:[%s13353_s9 + $0x80] sm:$0xff] }
 0x5f4   : > { %9799 = vmatprep.subr.mxu0 %v13603_v26 }
 0x5f5   : > { %9800 = vmatpush3.msra.mxu0 %v6401_v21 }
 0x5f6   : > { %9801 = vmatprep.subr.mxu0 %v13603_v26 }
 0x5f7   : > { %9802 = vmatpush3.msra.mxu0 %v9779_v18 }
 0x5f8   : > { %9803 = vmatprep.subr.mxu0 %v13603_v26 }
 0x5f9   : > { %9804 = vmatpush3.msra.mxu0 %v6391_v32 }
 0x5fa   : > { %9805 = vmatprep.subr.mxu0 %v13603_v26 }
 0x5fb   : > { %9806 = vmatpush3.msra.mxu0 %v9776_v58  ;;  %v8104_v58 = vld [vmem:[%s13353_s9 + $0x88] sm:$0xff] }
 0x5fc   : > { %9807 = vmatprep.subr.mxu0 %v13603_v26 }
 0x5fd   : > { %9808 = vmatpush3.msra.mxu0 %v6381_v59 }
 0x5fe   : > { %9810 = vmatmul.mubr.msk.f32.vlgmr.msra.gmra.mxu0 %vm6430_vm12, %v6275_v30  ;;  %9854 = vmatprep.subr.mxu0 %v13603_v26 }
 0x5ff   : > { %9812 = vmatprep.mubr.msk.f32.mxu0 %vm10020_vm8, %v13603_v26  ;;  %9855 = vmatpush3.msra.mxu0 %v8086_v49  ;;  %v8116_v49 = vld [vmem:[%s13353_s9 + $0xb8] sm:$0xff] }
 0x600   : > { %9856 = vmatprep.subr.mxu0 %v13603_v26 }
 0x601   : > { %9857 = vmatpush3.msra.mxu0 %v8085_v5  ;;  %v8114_v5 = vld [vmem:[%s13353_s9 + $0xa8] sm:$0xff] }
 0x602   : > { %9813 = vmatmul.mubr.msk.f32.gmra.mxu0 %vm6430_vm12, %v6276_v38  ;;  %9858 = vmatprep.subr.mxu0 %v13603_v26  ;;  %v8122_v38 = vld [vmem:[%s13353_s9 + $0xd0] sm:$0xff] }
 0x603   : > { %9815 = vmatprep.mubr.msk.f32.mxu0 %vm10020_vm8, %v13603_v26  ;;  %9859 = vmatpush3.msra.mxu0 %v8084_v17 }
 0x604   : > { %9884 = vmatprep.subr.mxu0 %v13603_v26 }
 0x606   : > { %9816 = vmatmul.mubr.msk.f32.gmra.mxu0 %vm6430_vm12, %v6277_v46 }
 0x607   : > { %9818 = vmatprep.mubr.msk.f32.mxu0 %vm10020_vm8, %v13603_v26 }
 0x60a   : > { %9819 = vmatmul.mubr.msk.f32.gmra.mxu0 %vm6430_vm12, %v6278_v31  ;;  %v8121_v31 = vld [vmem:[%s13353_s9 + $0xc8] sm:$0xff] }
 0x60b   : > { %9821 = vmatprep.mubr.msk.f32.mxu0 %vm10020_vm8, %v13603_v26 }
 0x60e   : > { %9822 = vmatmul.mubr.msk.f32.gmra.mxu0 %vm6430_vm12, %v6279_v29 }
 0x60f   : > { %9860 = vmatprep.mubr.msk.f32.mxu0 %vm10020_vm8, %v13603_v26 }
 0x6be   : > { %v13102_v41 = vpop.f32.mrf.mxu0 }
 0x6bf   : > { %v6549_v55 = vrot.slane %v13102_v41, 1  ;;  %v6731_v0 = vrot.slane %v13102_v41, 2  ;;  %v6931_v12 = vrot.slane %v13102_v41, 7  ;;  %v6830_v61 = vrot.slane %v13102_v41, 6 }
 0x6c0   : > { %v9811_v54 = vpop.f32.mrf.mxu0 }
 0x6c2   : > { %v13104_v52 = vpop.f32.mrf.mxu0 }
 0x6c3   : > { %v6550_v22 = vrot.slane %v13104_v52, 1  ;;  %v6732_v4 = vrot.slane %v13104_v52, 2  ;;  %v6932_v23 = vrot.slane %v13104_v52, 7  ;;  %v6831_v3 = vrot.slane %v13104_v52, 6 }
 0x6c4   : > { %v9814_v48 = vpop.f32.mrf.mxu0  ;;  %v7121_v32 = vrot.slane %v13104_v52, 4 }
 0x6c5   : > { %v6551_v36 = vsel %vm527_vm1, %v6549_v55, %v6550_v22  ;;  %v6733_v63 = vsel %vm1247_vm3, %v6731_v0, %v6732_v4  ;;  %v6933_v60 = vsel %vm6930_vm14, %v6931_v12, %v6932_v23  ;;  %v6832_v59 = vsel %vm3591_vm6, %v6830_v61, %v6831_v3 }
 0x6c6   : > { %v13115_v53 = vpop.f32.mrf.mxu0  ;;  %9831 = vmatmul.mubr.msk.f32.vlgmr.msra.gmra.mxu1 %vm6554_vm13, %v6551_v36  ;;  %9861 = vmatmul.mubr.msk.f32.vlgmr.msra.gmra.mxu0 %vm6554_vm13, %v6733_v63 }
 0x6c7   : > { %9833 = vmatprep.mubr.msk.f32.mxu1 %vm10020_vm8, %v13603_v26  ;;  %v6552_v19 = vrot.slane %v13115_v53, 1  ;;  %9840 = vmatpush3.msra.mxu1 %v6541_v50  ;;  %v6734_v28 = vrot.slane %v13115_v53, 2  ;;  %v6934_v24 = vrot.slane %v13115_v53, 7  ;;  %v7122_v9 = vrot.slane %v13115_v53, 4 }
 0x6c8   : > { %9841 = vmatprep.subr.mxu1 %v13603_v26  ;;  %9863 = vmatprep.mubr.msk.f32.mxu0 %vm10020_vm8, %v13603_v26  ;;  %v9817_v34 = vpop.f32.mrf.mxu0  ;;  %v6833_v18 = vrot.slane %v13115_v53, 6  ;;  %v7222_v17 = vrot.slane %v13115_v53, 5 }
 0x6c9   : > { %v6553_v11 = vsel %vm527_vm1, %v6550_v22, %v6552_v19  ;;  %9842 = vmatpush3.msra.mxu1 %v6540_v33  ;;  %v6735_v62 = vsel %vm1247_vm3, %v6732_v4, %v6734_v28  ;;  %9885 = vmatpush3.msra.mxu0 %v8098_v37  ;;  %v6935_v42 = vsel %vm6930_vm14, %v6932_v23, %v6934_v24  ;;  %vm7449_vm1 = vcmask 0  }
 0x6ca   : > { %9834 = vmatmul.mubr.msk.f32.gmra.mxu1 %vm6554_vm13, %v6553_v11  ;;  %9843 = vmatprep.subr.mxu1 %v13603_v26  ;;  %v13139_v13 = vpop.f32.mrf.mxu0  ;;  %v7123_v43 = vsel %vm672_vm0, %v7121_v32, %v7122_v9  ;;  %v6834_v56 = vsel %vm3591_vm6, %v6831_v3, %v6833_v18 }
 0x6cb   : > { %9836 = vmatprep.mubr.msk.f32.mxu1 %vm10020_vm8, %v13603_v26  ;;  %9864 = vmatmul.mubr.msk.f32.gmra.mxu0 %vm6554_vm13, %v6735_v62  ;;  %v6936_v39 = vrot.slane %v13139_v13, 7  ;;  %v7124_v21 = vrot.slane %v13139_v13, 4  ;;  %v6835_v15 = vrot.slane %v13139_v13, 6  ;;  %v7224_v54 = vrot.slane %v13139_v13, 5 }
 0x6cc   : > { %9844 = vmatpush3.msra.mxu1 %v6539_v8  ;;  %9866 = vmatprep.mubr.msk.f32.mxu0 %vm10020_vm8, %v13603_v26  ;;  %v9820_v14 = vpop.f32.mrf.mxu0 }
 0x6cd   : > { %9886 = vmatprep.subr.mxu0 %v13603_v26  ;;  %9869 = vmatprep.subr.mxu1 %v13603_v26  ;;  %v6937_v47 = vsel %vm6930_vm14, %v6934_v24, %v6936_v39  ;;  %v7125_v46 = vsel %vm672_vm0, %v7122_v9, %v7124_v21  ;;  %v6836_v29 = vsel %vm3591_vm6, %v6833_v18, %v6835_v15 }
 0x6ce   : > { %9837 = vmatmul.mubr.msk.f32.gmra.mxu1 %vm6554_vm13, %v6552_v19  ;;  %9887 = vmatpush3.msra.mxu0 %v8097_v10  ;;  %v13156_v57 = vpop.f32.mrf.mxu0  ;;  %v7225_v22 = vsel %vm3155_vm5, %v7222_v17, %v7224_v54 }
 0x6cf   : > { %9845 = vmatprep.mubr.msk.f32.mxu1 %vm10020_vm8, %v13603_v26  ;;  %9867 = vmatmul.mubr.msk.f32.gmra.mxu0 %vm6554_vm13, %v6734_v28  ;;  %v7126_v30 = vrot.slane %v13156_v57, 4  ;;  %v7226_v0 = vrot.slane %v13156_v57, 5 }
 0x6d0   : > { %9888 = vmatprep.subr.mxu0 %v13603_v26  ;;  %9890 = vmatprep.mubr.msk.f32.mxu0 %vm10020_vm8, %v13603_v26  ;;  %v9823_v20 = vpop.f32.mrf.mxu0 }
 0x6d1   : > { %9889 = vmatpush3.msra.mxu0 %v8096_v44  ;;  %v7127_v51 = vsel %vm672_vm0, %v7124_v21, %v7126_v30  ;;  %v7227_v4 = vsel %vm3155_vm5, %v7224_v54, %v7226_v0  ;;  %vm7434_vm0 = vcmask 128000  }
 0x6d2   : > { %9846 = vmatmul.mubr.msk.f32.vlgmr.msra.gmra.mxu1 %vm6554_vm13, %v13102_v41  ;;  %9914 = vmatprep.subr.mxu0 %v13603_v26  ;;  %v7221_v41 = vrot.slane %v13104_v52, 5 }
 0x6d3   : > { %9848 = vmatprep.mubr.msk.f32.mxu1 %vm10020_vm8, %v13603_v26  ;;  %9891 = vmatmul.mubr.msk.f32.vlgmr.msra.gmra.mxu0 %vm6554_vm13, %v6933_v60 }
 0x6d4   : > { %9870 = vmatpush3.msra.mxu1 %v8092_v2  ;;  %9893 = vmatprep.mubr.msk.f32.mxu0 %vm10020_vm8, %v13603_v26  ;;  %v7223_v55 = vsel %vm3155_vm5, %v7221_v41, %v7222_v17 }
 0x6d5   : > { %9871 = vmatprep.subr.mxu1 %v13603_v26  ;;  %9915 = vmatpush3.msra.mxu0 %v8110_v45 }
 0x6d6   : > { %9849 = vmatmul.mubr.msk.f32.gmra.mxu1 %vm6554_vm13, %v13104_v52  ;;  %9916 = vmatprep.subr.mxu0 %v13603_v26 }
 0x6d7   : > { %9851 = vmatprep.mubr.msk.f32.mxu1 %vm10020_vm8, %v13603_v26  ;;  %9872 = vmatpush3.msra.mxu1 %v8091_v40 }
 0x6d8   : > { %9873 = vmatprep.subr.mxu1 %v13603_v26  ;;  %9894 = vmatmul.mubr.msk.f32.gmra.mxu0 %vm6554_vm13, %v6935_v42 }
 0x6d9   : > { %9874 = vmatpush3.msra.mxu1 %v8090_v7  ;;  %9896 = vmatprep.mubr.msk.f32.mxu0 %vm10020_vm8, %v13603_v26 }
 0x6da   : > { %9852 = vmatmul.mubr.msk.f32.gmra.mxu1 %vm6554_vm13, %v13115_v53  ;;  %9917 = vmatpush3.msra.mxu0 %v8109_v1 }
 0x6db   : > { %9875 = vmatprep.mubr.msk.f32.mxu1 %vm10020_vm8, %v13603_v26  ;;  %9918 = vmatprep.subr.mxu0 %v13603_v26 }
 0x6dc   : > { %9897 = vmatmul.mubr.msk.f32.gmra.mxu0 %vm6554_vm13, %v6937_v47  ;;  %9899 = vmatprep.subr.mxu1 %v13603_v26 }
 0x6dd   : > { %9919 = vmatpush3.msra.mxu0 %v8108_v27  ;;  %9920 = vmatprep.mubr.msk.f32.mxu0 %vm10020_vm8, %v13603_v26 }
 0x6de   : > { %9876 = vmatmul.mubr.msk.f32.vlgmr.msra.gmra.mxu1 %vm6554_vm13, %v6832_v59  ;;  %9944 = vmatprep.subr.mxu0 %v13603_v26 }
 0x6df   : > { %9878 = vmatprep.mubr.msk.f32.mxu1 %vm10020_vm8, %v13603_v26  ;;  %9900 = vmatpush3.msra.mxu1 %v8104_v58 }
 0x6e0   : > { %9921 = vmatmul.mubr.msk.f32.vlgmr.msra.gmra.mxu0 %vm6554_vm13, %v7123_v43  ;;  %9901 = vmatprep.subr.mxu1 %v13603_v26 }
 0x6e1   : > { %9902 = vmatpush3.msra.mxu1 %v8103_v25  ;;  %9923 = vmatprep.mubr.msk.f32.mxu0 %vm10020_vm8, %v13603_v26 }
 0x6e2   : > { %9879 = vmatmul.mubr.msk.f32.gmra.mxu1 %vm6554_vm13, %v6834_v56  ;;  %9903 = vmatprep.subr.mxu1 %v13603_v26 }
 0x6e3   : > { %9881 = vmatprep.mubr.msk.f32.mxu1 %vm10020_vm8, %v13603_v26  ;;  %9904 = vmatpush3.msra.mxu1 %v8102_v16 }
 0x6e4   : > { %9924 = vmatmul.mubr.msk.f32.gmra.mxu0 %vm6554_vm13, %v7125_v46  ;;  %9929 = vmatprep.subr.mxu1 %v13603_v26 }
 0x6e5   : > { %9926 = vmatprep.mubr.msk.f32.mxu0 %vm10020_vm8, %v13603_v26  ;;  %9945 = vmatpush3.msra.mxu0 %v8122_v38 }
 0x6e6   : > { %9882 = vmatmul.mubr.msk.f32.gmra.mxu1 %vm6554_vm13, %v6836_v29  ;;  %9946 = vmatprep.subr.mxu0 %v13603_v26 }
 0x6e7   : > { %9905 = vmatprep.mubr.msk.f32.mxu1 %vm10020_vm8, %v13603_v26  ;;  %9947 = vmatpush3.msra.mxu0 %v8121_v31 }
 0x6e8   : > { %9927 = vmatmul.mubr.msk.f32.gmra.mxu0 %vm6554_vm13, %v7127_v51  ;;  %9948 = vmatprep.subr.mxu0 %v13603_v26 }
 0x6e9   : > { %9949 = vmatpush3.msra.mxu0 %v8120_v6  ;;  %9950 = vmatprep.mubr.msk.f32.mxu0 %vm10020_vm8, %v13603_v26 }
 0x6ea   : > { %9906 = vmatmul.mubr.msk.f32.vlgmr.msra.gmra.mxu1 %vm6554_vm13, %v13104_v52  ;;  %v7321_v52 = vrot.slane %v13156_v57, 6 }
 0x6eb   : > { %9908 = vmatprep.mubr.msk.f32.mxu1 %vm10020_vm8, %v13603_v26  ;;  %9930 = vmatpush3.msra.mxu1 %v8116_v49 }
 0x6ec   : > { %9951 = vmatmul.mubr.msk.f32.vlgmr.msra.gmra.mxu0 %vm6554_vm13, %v6834_v56  ;;  %9931 = vmatprep.subr.mxu1 %v13603_v26  ;;  %v7322_v48 = vsel %vm3591_vm6, %v6835_v15, %v7321_v52 }
 0x6ed   : > { %9932 = vmatpush3.msra.mxu1 %v8115_v35  ;;  %9953 = vmatprep.mubr.msk.f32.mxu0 %vm10020_vm8, %v13603_v26 }
 0x6ee   : > { %9909 = vmatmul.mubr.msk.f32.gmra.mxu1 %vm6554_vm13, %v13115_v53  ;;  %9933 = vmatprep.subr.mxu1 %v13603_v26 }
 0x6ef   : > { %9911 = vmatprep.mubr.msk.f32.mxu1 %vm10020_vm8, %v13603_v26  ;;  %9934 = vmatpush3.msra.mxu1 %v8114_v5 }
 0x6f0   : > { %9954 = vmatmul.mubr.msk.f32.gmra.mxu0 %vm6554_vm13, %v6836_v29  ;;  %9959 = vmatprep.subr.mxu1 %v13603_v26 }
 0x6f2   : > { %9912 = vmatmul.mubr.msk.f32.gmra.mxu1 %vm6554_vm13, %v13139_v13 }
 0x6f3   : > { %9935 = vmatprep.mubr.msk.f32.mxu1 %vm10020_vm8, %v13603_v26 }
 0x6f6   : > { %9936 = vmatmul.mubr.msk.f32.vlgmr.msra.gmra.mxu1 %vm6554_vm13, %v7223_v55 }
 0x6f7   : > { %9938 = vmatprep.mubr.msk.f32.mxu1 %vm10020_vm8, %v13603_v26  ;;  %9962 = vmatpush3.msra.mxu1 %v8122_v38 }
 0x6f8   : > { %9960 = vmatprep.subr.mxu1 %v13603_v26 }
 0x6f9   : > { %9963 = vmatpush3.msra.mxu1 %v8121_v31 }
 0x6fa   : > { %9939 = vmatmul.mubr.msk.f32.gmra.mxu1 %vm6554_vm13, %v7225_v22  ;;  %9961 = vmatprep.subr.mxu1 %v13603_v26 }
 0x6fb   : > { %9941 = vmatprep.mubr.msk.f32.mxu1 %vm10020_vm8, %v13603_v26  ;;  %9964 = vmatpush3.msra.mxu1 %v8120_v6 }
 0x6fe   : > { %9942 = vmatmul.mubr.msk.f32.gmra.mxu1 %vm6554_vm13, %v7227_v4 }
 0x6ff   : > { %9956 = vmatprep.mubr.msk.f32.mxu1 %vm10020_vm8, %v13603_v26 }
 0x702   : > { %9957 = vmatmul.mubr.msk.f32.vlgmr.msra.gmra.mxu1 %vm6554_vm13, %v7322_v48  ;;  %v8126_v48 = vld [vmem:[%s13354_s10] ss:$0 sm:$0xff] }
 0x786   : > { %v6627_v50 = vpop.f32.mrf.mxu1  ;;  %v6808_v36 = vpop.f32.mrf.mxu0 }
 0x788   : > { %v9832_v63 = vpop.f32.mrf.mxu1  ;;  %v9862_v53 = vpop.f32.mrf.mxu0 }
 0x78a   : > { %v6632_v33 = vpop.f32.mrf.mxu1 }
 0x78b   : > { %v6813_v37 = vpop.f32.mrf.mxu0 }
 0x78c   : > { %v9835_v19 = vpop.f32.mrf.mxu1 }
 0x78d   : > { %v9865_v28 = vpop.f32.mrf.mxu0 }
 0x78e   : > { %v6637_v34 = vpop.f32.mrf.mxu1 }
 0x78f   : > { %v6818_v11 = vpop.f32.mrf.mxu0 }
 0x790   : > { %v9838_v62 = vpop.f32.mrf.mxu1 }
 0x791   : > { %v9868_v8 = vpop.f32.mrf.mxu0 }
 0x792   : > { %v6713_v10 = vpop.f32.mrf.mxu1 }
 0x793   : > { %v7010_v26 = vpop.f32.mrf.mxu0  ;;  %v6714_v27 = vadd.f32 %v6713_v10, %v6627_v50 }
 0x794   : > { %v9847_v14 = vpop.f32.mrf.mxu1 }
 0x795   : > { %v9892_v13 = vpop.f32.mrf.mxu0  ;;  %v6822_v18 = vadd.f32 %v6808_v36, %v6714_v27 }
 0x796   : > { %v6718_v44 = vpop.f32.mrf.mxu1 }
 0x797   : > { %v6719_v59 = vadd.f32 %v6718_v44, %v6632_v33  ;;  %v7422_v44 = vld [vmem:[%s13355_s11 + $0x8] sm:$0xff] }
 0x798   : > { %v9850_v23 = vpop.f32.mrf.mxu1  ;;  %v7015_v57 = vpop.f32.mrf.mxu0 }
 0x799   : > { %v6823_v15 = vadd.f32 %v6813_v37, %v6719_v59 }
 0x79a   : > { %v6723_v12 = vpop.f32.mrf.mxu1  ;;  %v9895_v20 = vpop.f32.mrf.mxu0 }
 0x79b   : > { %v6724_v38 = vadd.f32 %v6723_v12, %v6637_v34  ;;  %v7421_v34 = vld [vmem:[%s13355_s11] sm:$0xff] }
 0x79c   : > { %v9853_v2 = vpop.f32.mrf.mxu1  ;;  %v7020_v60 = vpop.f32.mrf.mxu0 }
 0x79d   : > { %v6824_v5 = vadd.f32 %v6818_v11, %v6724_v38 }
 0x79e   : > { %v6909_v45 = vpop.f32.mrf.mxu1  ;;  %v9898_v24 = vpop.f32.mrf.mxu0 }
 0x79f   : > { %v6923_v21 = vadd.f32 %v6909_v45, %v6822_v18 }
 0x7a0   : > { %v9877_v40 = vpop.f32.mrf.mxu1  ;;  %v7200_v7 = vpop.f32.mrf.mxu0 }
 0x7a1   : > { %v7024_v31 = vadd.f32 %v7010_v26, %v6923_v21 }
 0x7a2   : > { %v6914_v39 = vpop.f32.mrf.mxu1  ;;  %v9922_v42 = vpop.f32.mrf.mxu0 }
 0x7a3   : > { %v6924_v46 = vadd.f32 %v6914_v39, %v6823_v15 }
 0x7a4   : > { %v9880_v1 = vpop.f32.mrf.mxu1  ;;  %v7205_v3 = vpop.f32.mrf.mxu0 }
 0x7a5   : > { %v7025_v17 = vadd.f32 %v7015_v57, %v6924_v46 }
 0x7a6   : > { %v6919_v61 = vpop.f32.mrf.mxu1  ;;  %v9925_v47 = vpop.f32.mrf.mxu0 }
 0x7a7   : > { %v6925_v54 = vadd.f32 %v6919_v61, %v6824_v5 }
 0x7a8   : > { %v9883_v9 = vpop.f32.mrf.mxu1  ;;  %v7210_v58 = vpop.f32.mrf.mxu0 }
 0x7a9   : > { %v7026_v50 = vadd.f32 %v7020_v60, %v6925_v54 }
 0x7aa   : > { %v7099_v32 = vpop.f32.mrf.mxu1  ;;  %v9928_v25 = vpop.f32.mrf.mxu0 }
 0x7ab   : > { %v7113_v6 = vadd.f32 %v7099_v32, %v7024_v31 }
 0x7ac   : > { %v9907_v43 = vpop.f32.mrf.mxu1  ;;  %v7391_v16 = vpop.f32.mrf.mxu0 }
 0x7ad   : > { %v7214_v0 = vadd.f32 %v7200_v7, %v7113_v6  ;;  %v7423_v7 = vld [vmem:[%s13355_s11 + $0x10] sm:$0x3f]  ;;  %v7447_v43 = vld [vmem:[#allocation2] sm:$0x1] }
 0x7ae   : > { %v7104_v56 = vpop.f32.mrf.mxu1  ;;  %v9952_v30 = vpop.f32.mrf.mxu0 }
 0x7af   : > { %v7114_v55 = vadd.f32 %v7104_v56, %v7025_v17 }
 0x7b0   : > { %v9910_v29 = vpop.f32.mrf.mxu1  ;;  %v7396_v51 = vpop.f32.mrf.mxu0 }
 0x7b1   : > { %v7215_v63 = vadd.f32 %v7205_v3, %v7114_v55 }
 0x7b2   : > { %v7109_v49 = vpop.f32.mrf.mxu1  ;;  %v9955_v35 = vpop.f32.mrf.mxu0 }
 0x7b3   : > { %v7115_v33 = vadd.f32 %v7109_v49, %v7026_v50 }
 0x7b4   : > { %v9913_v41 = vpop.f32.mrf.mxu1 }
 0x7b5   : > { %v7216_v26 = vadd.f32 %v7210_v58, %v7115_v33 }
 0x7b6   : > { %v7300_v22 = vpop.f32.mrf.mxu1 }
 0x7b7   : > { %v7314_v52 = vadd.f32 %v7300_v22, %v7214_v0 }
 0x7b8   : > { %v9937_v4 = vpop.f32.mrf.mxu1 }
 0x7b9   : > { %v7405_v36 = vadd.f32 %v7391_v16, %v7314_v52 }
 0x7ba   : > { %v7305_v53 = vpop.f32.mrf.mxu1 }
 0x7bb   : > { %v7315_v37 = vadd.f32 %v7305_v53, %v7215_v63  ;;  %v7415_v19 = vadd.f32 %v8126_v48, %v7405_v36 }
 0x7bc   : > { %v9940_v28 = vpop.f32.mrf.mxu1 }
 0x7bd   : > { %v7406_v11 = vadd.f32 %v7396_v51, %v7315_v37  ;;  %v7418_v62 = vmax.f32 %v7415_v19, 0.0 }
 0x7be   : > { %v7310_v8 = vpop.f32.mrf.mxu1 }
 0x7bf   : > { %v7416_v10 = vadd.f32 %v8126_v48, %v7406_v11  ;;  %v7424_v14 = vmul.f32 %v7421_v34, %v7418_v62  ;;  %v7316_v23 = vadd.f32 %v7310_v8, %v7216_v26 }
 0x7c0   : > { %v9943_v13 = vpop.f32.mrf.mxu1 }
 0x7c1   : > { %v7428_v57 = vsel %vm7427_vm15, %v7424_v14, 0.0  ;;  %v7419_v12 = vmax.f32 %v7416_v10, 0.0 }
 0x7c2   : > { %v7401_v20 = vpop.f32.mrf.mxu1  ;;  %7429 = vadd.xlane.f32.xlu0 %v7428_v57 }
 0x7c3   : > { %v7407_v2 = vadd.f32 %v7401_v20, %v7316_v23  ;;  %v7425_v60 = vmul.f32 %v7422_v44, %v7419_v12 }
 0x7c4   : > { %v9958_v45 = vpop.f32.mrf.mxu1 }
 0x7c5   : > { %v7417_v24 = vadd.f32 %v8126_v48, %v7407_v2  ;;  %v7431_v40 = vsel %vm7427_vm15, %v7425_v60, 0.0 }
 0x7c6   : > { %7432 = vadd.xlane.f32.xlu0 %v7431_v40 }
 0x7c7   : > { %v7420_v39 = vmax.f32 %v7417_v24, 0.0 }
 0x7c9   : > { %v7426_v42 = vmul.f32 %v7423_v7, %v7420_v39 }
 0x7cb   : > { %v7435_v1 = vsel %vm7434_vm0, %v7426_v42, 0.0 }
 0x7cc   : > { %7436 = vadd.xlane.f32.xlu1 %v7435_v1 }
 0x84b   : > { %v7430_v3 = vpop.xlane.xlu0 %7429 }
 0x84f   : > { %v7433_v27 = vpop.xlane.xlu0 %7432 }
 0x850   : > { %v7438_v61 = vadd.f32 %v7433_v27, %v7430_v3 }
 0x855   : > { %v7437_v47 = vpop.xlane.xlu1 %7436 }
 0x856   : > { %v7439_v9 = vsel %vm1247_vm3, %v7437_v47, 0.0 }
 0x857   : > { %v7440_v58 = vadd.f32 %v7439_v9, %v7438_v61 }
 0x859   : > { %v7441_v59 = vrot.slane %v7440_v58, 4 }
 0x85b   : > { %v7442_v18 = vadd.f32 %v7441_v59, %v7440_v58 }
 0x85d   : > { %v7443_v32 = vrot.slane %v7442_v18, 2 }
 0x85f   : > { %v7444_v25 = vadd.f32 %v7443_v32, %v7442_v18 }
 0x861   : > { %v7445_v21 = vrot.slane %v7444_v25, 1 }
 0x863   : > { %v7446_v16 = vadd.f32 %v7445_v21, %v7444_v25 }
 0x865   : > { %v7448_v15 = vadd.f32 %v7447_v43, %v7446_v16 }
 0x867   : > { %7450 = vst.msk [vmem:[%s438_s29] sm:$0x1] %vm7449_vm1, %v7448_v15 }
 0x868 PF: > { %s25_s27 = sadd.s32 1, %s10017_s27  }
 0x869   : > { %p22_p4 = scmp.ge.s32.totalorder %s25_s27, 4  }
 0x86b   :  { %24 = sbr.rel (!%p22_p4) target bundleno = 3 (0x3), region = 126 }

</bundles_post_ra>
